<compile_context>
chip_gen: v7x
topology: tpu7x:2x2x1
jax: 0.10.0
libtpu: 0.0.40
codegen_flags: <defaults>
</compile_context>

<pallas_src>
import functools

import jax
import jax.numpy as jnp
from jax.experimental import pallas as pl
from jax.experimental.pallas import tpu as pltpu


def _gat_kernel(x_ref, w_all_ref, gw_ref, gb_ref, out_ref, *, num_heads):
    x = x_ref[...]                                   # (BG, N, F)
    BG, N, F = x.shape
    HF = num_heads * F

    # One fused, lane-dense projection for K/Q/V of all heads.
    # Collapse (BG, N) -> BG*N rows (N == 8 == sublane tile, so this reshape is
    # layout-preserving): (BG*N, F) @ (F, 3*H*F).
    x2 = x.reshape(BG * N, F)
    proj = jnp.dot(x2, w_all_ref[...],
                   preferred_element_type=jnp.float32)          # (BG*N, 3*H*F)
    proj = proj.reshape(BG, N, 3 * HF)

    acc = None
    for h in range(num_heads):                        # static unroll (H small)
        lo, hi = h * F, (h + 1) * F
        k_h = proj[:, :, 0 * HF + lo:0 * HF + hi]     # (BG, N, F)
        q_h = proj[:, :, 1 * HF + lo:1 * HF + hi]
        v_h = proj[:, :, 2 * HF + lo:2 * HF + hi]     # pre-scaled by W_m

        # e[b, i, j] = q_i . k_j  -- batched, contract last dims, no transpose.
        e = jnp.einsum('bqd,bkd->bqk', q_h, k_h,
                       preferred_element_type=jnp.float32)      # (BG, N, N)
        e = e - jnp.max(e, axis=-1, keepdims=True)
        p = jnp.exp(e)
        inv = pl.reciprocal(jnp.sum(p, axis=-1, keepdims=True), approx=False)
        attn = p * inv                                          # rows sum to 1

        o_h = jnp.einsum('bqk,bkd->bqd', attn, v_h,
                         preferred_element_type=jnp.float32)    # (BG, N, F)
        acc = o_h if acc is None else acc + o_h

    xf = x.astype(jnp.float32)
    z = (xf + acc).reshape(BG * N, F)                           # x + out
    g = jnp.dot(z, gw_ref[...], preferred_element_type=jnp.float32) + gb_ref[...]
    g = jnp.maximum(g, 0.0)                                     # ReLU
    out_ref[...] = (xf + g.reshape(BG, N, F)).astype(out_ref.dtype)


def prepare_gat_params(W_k, W_q, W_v, W_m, g_w_t, g_b):
    """One-time parameter preprocessing (hoisted out of the per-forward path).

    W_k/q/v: (H, F, F); W_m: (H,); g_w_t: (F, F) already (in, out); g_b: (1, F).
    Returns (w_all, g_w_t, g_b) with w_all: (F, 3*H*F), column layout
    [K_0..K_{H-1} | Q_0..Q_{H-1} | V_0*m_0..V_{H-1}*m_{H-1}].
    """
    H, F_in, F_out = W_k.shape
    W_v_scaled = W_v * W_m[:, None, None]            # fold W_m into V (free)
    w_stack = jnp.stack([W_k, W_q, W_v_scaled], axis=0)         # (3, H, Fi, Fo)
    w_all = jnp.transpose(w_stack, (2, 0, 1, 3)).reshape(F_in, 3 * H * F_out)
    return w_all, g_w_t, jnp.reshape(g_b, (1, F_out))


def graph_attention_layer(x, w_all, g_w_t, g_b, *, num_heads,
                          graphs_per_block=None):
    """x: (B, N, F) batch of graphs; fused params from prepare_gat_params.

    Returns (B, N, F)."""
    B, N, F = x.shape
    H = num_heads

    if graphs_per_block is None:
        graphs_per_block = min(B, max(1, 128 // N))  # ~128 MXU rows per step
    while B % graphs_per_block:                      # must divide the batch
        graphs_per_block -= 1
    BG = graphs_per_block
    grid = (B // BG,)

    kernel = functools.partial(_gat_kernel, num_heads=H)

    return pl.pallas_call(
        kernel,
        out_shape=jax.ShapeDtypeStruct((B, N, F), x.dtype),
        grid_spec=pltpu.PrefetchScalarGridSpec(
            num_scalar_prefetch=0,
            grid=grid,                                          # batch of graphs
            in_specs=[
                pl.BlockSpec((BG, N, F), lambda b: (b, 0, 0)),      # x block
                pl.BlockSpec((F, 3 * H * F), lambda b: (0, 0)),     # fused K|Q|V*W_m
                pl.BlockSpec((F, F), lambda b: (0, 0)),             # g weight (in,out)
                pl.BlockSpec((1, F), lambda b: (0, 0)),             # g bias
            ],
            out_specs=pl.BlockSpec((BG, N, F), lambda b: (b, 0, 0)),
        ),
        compiler_params=pltpu.CompilerParams(
            dimension_semantics=("parallel",),       # shard batch across TCs (v7x)
        ),
    )(x, w_all, g_w_t, g_b)


def reference_forward(x, W_k, W_q, W_v, W_m, g_w_t, g_b):
    """Pure-JAX reference: the PyTorch forward applied to each graph in the batch."""
    H = W_k.shape[0]
    out = 0.0
    for i in range(H):
        key = x @ W_k[i]                                        # (B, N, F)
        query = x @ W_q[i]
        value = x @ W_v[i]
        e = jnp.einsum('bqd,bkd->bqk', query, key)              # (B, N, N)
        attn = jax.nn.softmax(e, axis=-1)
        out = out + W_m[i] * jnp.einsum('bqk,bkd->bqd', attn, value)
    g = jax.nn.relu((x + out) @ g_w_t + g_b)
    return x + g


if __name__ == "__main__":
    # Small shapes consistent with the module: B graphs, N nodes, F = in = out.
    B, N, F, H = 32, 8, 32, 4
    key = jax.random.PRNGKey(0)
    k_x, k_wk, k_wq, k_wv, k_gw, k_gb = jax.random.split(key, 6)

    x = jax.random.normal(k_x, (B, N, F), dtype=jnp.float32)

    # Deterministic "xavier-ish" init for (H, F, F) projection weights.
    bound = (6.0 / (F + F)) ** 0.5
    W_k = jax.random.uniform(k_wk, (H, F, F), minval=-bound, maxval=bound, dtype=jnp.float32)
    W_q = jax.random.uniform(k_wq, (H, F, F), minval=-bound, maxval=bound, dtype=jnp.float32)
    W_v = jax.random.uniform(k_wv, (H, F, F), minval=-bound, maxval=bound, dtype=jnp.float32)
    # Module inits W_m to ones; use non-trivial values to exercise the W_v fold.
    W_m = jnp.linspace(0.5, 1.5, H, dtype=jnp.float32)

    # g = Linear(F, F) + ReLU; pass the linear weight pre-transposed (in, out).
    lin_bound = 1.0 / (F ** 0.5)
    g_w_t = jax.random.uniform(k_gw, (F, F), minval=-lin_bound, maxval=lin_bound, dtype=jnp.float32)
    g_b = jax.random.uniform(k_gb, (1, F), minval=-lin_bound, maxval=lin_bound, dtype=jnp.float32)

    # One-time parameter preprocessing (outside the per-forward path).
    w_all, g_w_t_p, g_b_p = prepare_gat_params(W_k, W_q, W_v, W_m, g_w_t, g_b)

    y = graph_attention_layer(x, w_all, g_w_t_p, g_b_p, num_heads=H)
    y = jax.block_until_ready(y)

    y_ref = reference_forward(x, W_k, W_q, W_v, W_m, g_w_t, g_b)
    assert y.shape == (B, N, F)
    assert jnp.allclose(y, y_ref, atol=2e-3, rtol=2e-3), "mismatch vs reference"

    print("KERNEL_OK")
</pallas_src>

<mosaic_0001>
module attributes {stable_mosaic.version = 11 : i64} {
  func.func @_gat_kernel(%arg0: i32, %arg1: memref<16x8x32xf32, #tpu.memory_space<vmem>>, %arg2: memref<32x384xf32, #tpu.memory_space<vmem>>, %arg3: memref<32x32xf32, #tpu.memory_space<vmem>>, %arg4: memref<1x32xf32, #tpu.memory_space<vmem>>, %arg5: memref<16x8x32xf32, #tpu.memory_space<vmem>>) attributes {dimension_semantics = [#tpu.dimension_semantics<parallel>], iteration_bounds = array<i64: 2>, scalar_prefetch = 0 : i64, scratch_operands = 0 : i64, tpu.core_type = #tpu.core_type<tc>, window_params = [{transform_indices = @transform_0, window_bounds = array<i64: 16, 8, 32>}, {pipeline_mode = #tpu.pipeline_mode<synchronous>, transform_indices = @transform_1, window_bounds = array<i64: 32, 384>}, {pipeline_mode = #tpu.pipeline_mode<synchronous>, transform_indices = @transform_2, window_bounds = array<i64: 32, 32>}, {pipeline_mode = #tpu.pipeline_mode<synchronous>, transform_indices = @transform_3, window_bounds = array<i64: 1, 32>}, {transform_indices = @transform_4, window_bounds = array<i64: 16, 8, 32>}]} {
    %c0 = arith.constant 0 : index
    %c0_0 = arith.constant 0 : index
    %c0_1 = arith.constant 0 : index
    %0 = vector.load %arg1[%c0, %c0_0, %c0_1] : memref<16x8x32xf32, #tpu.memory_space<vmem>>, vector<16x8x32xf32>
    %1 = vector.shape_cast %0 : vector<16x8x32xf32> to vector<128x32xf32>
    %c0_2 = arith.constant 0 : index
    %c0_3 = arith.constant 0 : index
    %2 = vector.load %arg2[%c0_2, %c0_3] : memref<32x384xf32, #tpu.memory_space<vmem>>, vector<32x384xf32>
    %cst = arith.constant dense<0.000000e+00> : vector<128x384xf32>
    %3 = tpu.matmul %1, %2, %cst {dimension_numbers = #tpu.dot_dimension_numbers<[1], [0], [0], [1], [0, 0, 1, 1], [], []>} : vector<128x32xf32>, vector<32x384xf32>, vector<128x384xf32> -> vector<128x384xf32>
    %4 = vector.shape_cast %3 : vector<128x384xf32> to vector<16x8x384xf32>
    %5 = vector.extract_strided_slice %4 {offsets = [0, 0, 0], sizes = [16, 8, 32], strides = [1, 1, 1]} : vector<16x8x384xf32> to vector<16x8x32xf32>
    %6 = vector.extract_strided_slice %4 {offsets = [0, 0, 128], sizes = [16, 8, 32], strides = [1, 1, 1]} : vector<16x8x384xf32> to vector<16x8x32xf32>
    %7 = vector.extract_strided_slice %4 {offsets = [0, 0, 256], sizes = [16, 8, 32], strides = [1, 1, 1]} : vector<16x8x384xf32> to vector<16x8x32xf32>
    "tpu.trace_start"() <{level = 10 : i32, message = "bqd,bkd->bqk"}> : () -> ()
    %cst_4 = arith.constant dense<0.000000e+00> : vector<16x8x8xf32>
    %8 = tpu.matmul %6, %5, %cst_4 {dimension_numbers = #tpu.dot_dimension_numbers<[2], [2], [1], [1], [0, 0, 0, 1, 1, 1], [0], [0]>} : vector<16x8x32xf32>, vector<16x8x32xf32>, vector<16x8x8xf32> -> vector<16x8x8xf32>
    "tpu.trace_stop"() : () -> ()
    %cst_5 = arith.constant dense<0xFF800000> : vector<16x8xf32>
    %9 = vector.multi_reduction <maximumf>, %8, %cst_5 [2] : vector<16x8x8xf32> to vector<16x8xf32>
    %10 = vector.shape_cast %9 : vector<16x8xf32> to vector<16x8x1xf32>
    %11 = vector.broadcast %10 : vector<16x8x1xf32> to vector<16x8x8xf32>
    %12 = arith.subf %8, %11 : vector<16x8x8xf32>
    %13 = math.exp %12 : vector<16x8x8xf32>
    %cst_6 = arith.constant dense<0.000000e+00> : vector<16x8xf32>
    %14 = vector.multi_reduction <add>, %13, %cst_6 [2] : vector<16x8x8xf32> to vector<16x8xf32>
    %15 = vector.shape_cast %14 : vector<16x8xf32> to vector<16x8x1xf32>
    %16 = tpu.reciprocal %15 : vector<16x8x1xf32> -> vector<16x8x1xf32>
    %17 = vector.broadcast %16 : vector<16x8x1xf32> to vector<16x8x8xf32>
    %18 = arith.mulf %13, %17 : vector<16x8x8xf32>
    "tpu.trace_start"() <{level = 10 : i32, message = "bqk,bkd->bqd"}> : () -> ()
    %cst_7 = arith.constant dense<0.000000e+00> : vector<16x8x32xf32>
    %19 = tpu.matmul %18, %7, %cst_7 {dimension_numbers = #tpu.dot_dimension_numbers<[2], [1], [1], [2], [0, 0, 0, 1, 1, 2], [0], [0]>} : vector<16x8x8xf32>, vector<16x8x32xf32>, vector<16x8x32xf32> -> vector<16x8x32xf32>
    "tpu.trace_stop"() : () -> ()
    %20 = vector.extract_strided_slice %4 {offsets = [0, 0, 32], sizes = [16, 8, 32], strides = [1, 1, 1]} : vector<16x8x384xf32> to vector<16x8x32xf32>
    %21 = vector.extract_strided_slice %4 {offsets = [0, 0, 160], sizes = [16, 8, 32], strides = [1, 1, 1]} : vector<16x8x384xf32> to vector<16x8x32xf32>
    %22 = vector.extract_strided_slice %4 {offsets = [0, 0, 288], sizes = [16, 8, 32], strides = [1, 1, 1]} : vector<16x8x384xf32> to vector<16x8x32xf32>
    "tpu.trace_start"() <{level = 10 : i32, message = "bqd,bkd->bqk"}> : () -> ()
    %cst_8 = arith.constant dense<0.000000e+00> : vector<16x8x8xf32>
    %23 = tpu.matmul %21, %20, %cst_8 {dimension_numbers = #tpu.dot_dimension_numbers<[2], [2], [1], [1], [0, 0, 0, 1, 1, 1], [0], [0]>} : vector<16x8x32xf32>, vector<16x8x32xf32>, vector<16x8x8xf32> -> vector<16x8x8xf32>
    "tpu.trace_stop"() : () -> ()
    %cst_9 = arith.constant dense<0xFF800000> : vector<16x8xf32>
    %24 = vector.multi_reduction <maximumf>, %23, %cst_9 [2] : vector<16x8x8xf32> to vector<16x8xf32>
    %25 = vector.shape_cast %24 : vector<16x8xf32> to vector<16x8x1xf32>
    %26 = vector.broadcast %25 : vector<16x8x1xf32> to vector<16x8x8xf32>
    %27 = arith.subf %23, %26 : vector<16x8x8xf32>
    %28 = math.exp %27 : vector<16x8x8xf32>
    %cst_10 = arith.constant dense<0.000000e+00> : vector<16x8xf32>
    %29 = vector.multi_reduction <add>, %28, %cst_10 [2] : vector<16x8x8xf32> to vector<16x8xf32>
    %30 = vector.shape_cast %29 : vector<16x8xf32> to vector<16x8x1xf32>
    %31 = tpu.reciprocal %30 : vector<16x8x1xf32> -> vector<16x8x1xf32>
    %32 = vector.broadcast %31 : vector<16x8x1xf32> to vector<16x8x8xf32>
    %33 = arith.mulf %28, %32 : vector<16x8x8xf32>
    "tpu.trace_start"() <{level = 10 : i32, message = "bqk,bkd->bqd"}> : () -> ()
    %cst_11 = arith.constant dense<0.000000e+00> : vector<16x8x32xf32>
    %34 = tpu.matmul %33, %22, %cst_11 {dimension_numbers = #tpu.dot_dimension_numbers<[2], [1], [1], [2], [0, 0, 0, 1, 1, 2], [0], [0]>} : vector<16x8x8xf32>, vector<16x8x32xf32>, vector<16x8x32xf32> -> vector<16x8x32xf32>
    "tpu.trace_stop"() : () -> ()
    %35 = arith.addf %19, %34 : vector<16x8x32xf32>
    %36 = vector.extract_strided_slice %4 {offsets = [0, 0, 64], sizes = [16, 8, 32], strides = [1, 1, 1]} : vector<16x8x384xf32> to vector<16x8x32xf32>
    %37 = vector.extract_strided_slice %4 {offsets = [0, 0, 192], sizes = [16, 8, 32], strides = [1, 1, 1]} : vector<16x8x384xf32> to vector<16x8x32xf32>
    %38 = vector.extract_strided_slice %4 {offsets = [0, 0, 320], sizes = [16, 8, 32], strides = [1, 1, 1]} : vector<16x8x384xf32> to vector<16x8x32xf32>
    "tpu.trace_start"() <{level = 10 : i32, message = "bqd,bkd->bqk"}> : () -> ()
    %cst_12 = arith.constant dense<0.000000e+00> : vector<16x8x8xf32>
    %39 = tpu.matmul %37, %36, %cst_12 {dimension_numbers = #tpu.dot_dimension_numbers<[2], [2], [1], [1], [0, 0, 0, 1, 1, 1], [0], [0]>} : vector<16x8x32xf32>, vector<16x8x32xf32>, vector<16x8x8xf32> -> vector<16x8x8xf32>
    "tpu.trace_stop"() : () -> ()
    %cst_13 = arith.constant dense<0xFF800000> : vector<16x8xf32>
    %40 = vector.multi_reduction <maximumf>, %39, %cst_13 [2] : vector<16x8x8xf32> to vector<16x8xf32>
    %41 = vector.shape_cast %40 : vector<16x8xf32> to vector<16x8x1xf32>
    %42 = vector.broadcast %41 : vector<16x8x1xf32> to vector<16x8x8xf32>
    %43 = arith.subf %39, %42 : vector<16x8x8xf32>
    %44 = math.exp %43 : vector<16x8x8xf32>
    %cst_14 = arith.constant dense<0.000000e+00> : vector<16x8xf32>
    %45 = vector.multi_reduction <add>, %44, %cst_14 [2] : vector<16x8x8xf32> to vector<16x8xf32>
    %46 = vector.shape_cast %45 : vector<16x8xf32> to vector<16x8x1xf32>
    %47 = tpu.reciprocal %46 : vector<16x8x1xf32> -> vector<16x8x1xf32>
    %48 = vector.broadcast %47 : vector<16x8x1xf32> to vector<16x8x8xf32>
    %49 = arith.mulf %44, %48 : vector<16x8x8xf32>
    "tpu.trace_start"() <{level = 10 : i32, message = "bqk,bkd->bqd"}> : () -> ()
    %cst_15 = arith.constant dense<0.000000e+00> : vector<16x8x32xf32>
    %50 = tpu.matmul %49, %38, %cst_15 {dimension_numbers = #tpu.dot_dimension_numbers<[2], [1], [1], [2], [0, 0, 0, 1, 1, 2], [0], [0]>} : vector<16x8x8xf32>, vector<16x8x32xf32>, vector<16x8x32xf32> -> vector<16x8x32xf32>
    "tpu.trace_stop"() : () -> ()
    %51 = arith.addf %35, %50 : vector<16x8x32xf32>
    %52 = vector.extract_strided_slice %4 {offsets = [0, 0, 96], sizes = [16, 8, 32], strides = [1, 1, 1]} : vector<16x8x384xf32> to vector<16x8x32xf32>
    %53 = vector.extract_strided_slice %4 {offsets = [0, 0, 224], sizes = [16, 8, 32], strides = [1, 1, 1]} : vector<16x8x384xf32> to vector<16x8x32xf32>
    %54 = vector.extract_strided_slice %4 {offsets = [0, 0, 352], sizes = [16, 8, 32], strides = [1, 1, 1]} : vector<16x8x384xf32> to vector<16x8x32xf32>
    "tpu.trace_start"() <{level = 10 : i32, message = "bqd,bkd->bqk"}> : () -> ()
    %cst_16 = arith.constant dense<0.000000e+00> : vector<16x8x8xf32>
    %55 = tpu.matmul %53, %52, %cst_16 {dimension_numbers = #tpu.dot_dimension_numbers<[2], [2], [1], [1], [0, 0, 0, 1, 1, 1], [0], [0]>} : vector<16x8x32xf32>, vector<16x8x32xf32>, vector<16x8x8xf32> -> vector<16x8x8xf32>
    "tpu.trace_stop"() : () -> ()
    %cst_17 = arith.constant dense<0xFF800000> : vector<16x8xf32>
    %56 = vector.multi_reduction <maximumf>, %55, %cst_17 [2] : vector<16x8x8xf32> to vector<16x8xf32>
    %57 = vector.shape_cast %56 : vector<16x8xf32> to vector<16x8x1xf32>
    %58 = vector.broadcast %57 : vector<16x8x1xf32> to vector<16x8x8xf32>
    %59 = arith.subf %55, %58 : vector<16x8x8xf32>
    %60 = math.exp %59 : vector<16x8x8xf32>
    %cst_18 = arith.constant dense<0.000000e+00> : vector<16x8xf32>
    %61 = vector.multi_reduction <add>, %60, %cst_18 [2] : vector<16x8x8xf32> to vector<16x8xf32>
    %62 = vector.shape_cast %61 : vector<16x8xf32> to vector<16x8x1xf32>
    %63 = tpu.reciprocal %62 : vector<16x8x1xf32> -> vector<16x8x1xf32>
    %64 = vector.broadcast %63 : vector<16x8x1xf32> to vector<16x8x8xf32>
    %65 = arith.mulf %60, %64 : vector<16x8x8xf32>
    "tpu.trace_start"() <{level = 10 : i32, message = "bqk,bkd->bqd"}> : () -> ()
    %cst_19 = arith.constant dense<0.000000e+00> : vector<16x8x32xf32>
    %66 = tpu.matmul %65, %54, %cst_19 {dimension_numbers = #tpu.dot_dimension_numbers<[2], [1], [1], [2], [0, 0, 0, 1, 1, 2], [0], [0]>} : vector<16x8x8xf32>, vector<16x8x32xf32>, vector<16x8x32xf32> -> vector<16x8x32xf32>
    "tpu.trace_stop"() : () -> ()
    %67 = arith.addf %51, %66 : vector<16x8x32xf32>
    %68 = arith.addf %0, %67 : vector<16x8x32xf32>
    %69 = vector.shape_cast %68 : vector<16x8x32xf32> to vector<128x32xf32>
    %c0_20 = arith.constant 0 : index
    %c0_21 = arith.constant 0 : index
    %70 = vector.load %arg3[%c0_20, %c0_21] : memref<32x32xf32, #tpu.memory_space<vmem>>, vector<32x32xf32>
    %cst_22 = arith.constant dense<0.000000e+00> : vector<128x32xf32>
    %71 = tpu.matmul %69, %70, %cst_22 {dimension_numbers = #tpu.dot_dimension_numbers<[1], [0], [0], [1], [0, 0, 1, 1], [], []>} : vector<128x32xf32>, vector<32x32xf32>, vector<128x32xf32> -> vector<128x32xf32>
    %c0_23 = arith.constant 0 : index
    %c0_24 = arith.constant 0 : index
    %72 = vector.load %arg4[%c0_23, %c0_24] : memref<1x32xf32, #tpu.memory_space<vmem>>, vector<1x32xf32>
    %73 = vector.broadcast %72 : vector<1x32xf32> to vector<128x32xf32>
    %74 = arith.addf %71, %73 : vector<128x32xf32>
    %cst_25 = arith.constant 0.000000e+00 : f32
    %75 = vector.broadcast %cst_25 : f32 to vector<128x32xf32>
    %76 = arith.maximumf %74, %75 : vector<128x32xf32>
    %77 = vector.shape_cast %76 : vector<128x32xf32> to vector<16x8x32xf32>
    %78 = arith.addf %0, %77 : vector<16x8x32xf32>
    %c0_26 = arith.constant 0 : index
    %c0_27 = arith.constant 0 : index
    %c0_28 = arith.constant 0 : index
    %79 = vector.load %arg5[%c0_26, %c0_27, %c0_28] : memref<16x8x32xf32, #tpu.memory_space<vmem>>, vector<16x8x32xf32>
    tpu.vector_store %arg5[%c0_26, %c0_27, %c0_28], %78 {strides = array<i32>} : memref<16x8x32xf32, #tpu.memory_space<vmem>>, vector<16x8x32xf32>,
    return
  }
  func.func @transform_0(%arg0: i32) -> (i32, i32, i32) {
    %c0_i32 = arith.constant 0 : i32
    %c0_i32_0 = arith.constant 0 : i32
    %c0_i32_1 = arith.constant 0 : i32
    return %arg0, %c0_i32, %c0_i32_0 : i32, i32, i32
  }
  func.func @transform_1(%arg0: i32) -> (i32, i32) {
    %c0_i32 = arith.constant 0 : i32
    %c0_i32_0 = arith.constant 0 : i32
    %c0_i32_1 = arith.constant 0 : i32
    return %c0_i32, %c0_i32_0 : i32, i32
  }
  func.func @transform_2(%arg0: i32) -> (i32, i32) {
    %c0_i32 = arith.constant 0 : i32
    %c0_i32_0 = arith.constant 0 : i32
    %c0_i32_1 = arith.constant 0 : i32
    return %c0_i32, %c0_i32_0 : i32, i32
  }
  func.func @transform_3(%arg0: i32) -> (i32, i32) {
    %c0_i32 = arith.constant 0 : i32
    %c0_i32_0 = arith.constant 0 : i32
    %c0_i32_1 = arith.constant 0 : i32
    return %c0_i32, %c0_i32_0 : i32, i32
  }
  func.func @transform_4(%arg0: i32) -> (i32, i32, i32) {
    %c0_i32 = arith.constant 0 : i32
    %c0_i32_0 = arith.constant 0 : i32
    %c0_i32_1 = arith.constant 0 : i32
    return %arg0, %c0_i32, %c0_i32_0 : i32, i32, i32
  }
}

</mosaic_0001>

<bundles_post_ra>
// kernel: tpu_custom_call.1
= control target key start
LH: loop header
LB: loop body
LE: loop exit
PB: predicated region body
PF: predicated region fallthrough
CT: control target
= control target key end

     0   :  { %9 = vsyncpa [#allocation3], 0  ;;  %s15859_s0 = inlined_call_operand.hbm [shape: f32[32,8,32], index: 0, kind: input, shape index: {}]   ;;  %s15860_s1 = inlined_call_operand.hbm [shape: f32[32,384], index: 1, kind: input, shape index: {}]   ;;  %s15861_s2 = inlined_call_operand.hbm [shape: f32[32,32], index: 2, kind: input, shape index: {}]   ;;  %s15862_s3 = inlined_call_operand.vmem [shape: f32[1,32], index: 3, kind: input, shape index: {}]   ;;  %s15863_s4 = inlined_call_operand.hbm [shape: f32[32,8,32], index: 4, kind: output, shape index: {}]  }
   0x1   :  { %11 = vsyncpa [#allocation3 + $0x1], 0 }
   0x2   :  { %12 = vsyncpa [#allocation6], 0 }
   0x3   :  { %13 = vsyncpa [#allocation4], 0 }
   0x4   :  { %15 = vsyncpa [#allocation4 + $0x1], 0  ;;  %s13370_s15 = smov 0   ;;  %s13372_s16 = smov 0  }
   0x5   :  { %s13374_s17 = smov 0   ;;  %s13376_s18 = smov 0  }
   0x6 LB: > { %s13391_s19 = sadd.s32 4294967295, %s13328_s18   ;;  %s11533_s20 = sadd.s32 4294967294, %s13328_s18   ;;  %s13328_s18 = sphi %s13376_s18, %s16148_s18   ;;  %s13324_s17 = sphi %s13374_s17, %s16147_s17   ;;  %s13320_s16 = sphi %s13372_s16, %s16146_s16   ;;  %s13316_s15 = sphi %s13370_s15, %s16145_s15  }
   0x7   : > { %p41_p0 = scmp.ne.s32.totalorder %s13320_s16, %s13316_s15  ;;  %p15864_p1 = scmp.eq.s32.totalorder %s13391_s19, 0 }
   0x8   : > { %p134_p3 = scmp.eq.s32.totalorder %s11533_s20, 1  ;;  %p11534_p5 = scmp.ge.s32.totalorder %s13328_s18, 1 }
   0x9   : > { %p13400_p4 = por %p15864_p1, %p41_p0  ;;  %p141_p7 = scmp.lt.s32.totalorder %s13328_s18, 3 }
   0xa   : > { %p13405_p6 = por %p134_p3, %p41_p0  ;;  %s13330_s24 = smov [#allocation5]  }
   0xb   : > { %s15951_s21 = scalar_select %p13400_p4, 1, 0 }
   0xc   : > { %s15952_s22 = scalar_select %p13405_p6, 1, 0 }
   0xd   : > { %p13410_p8 = pnand %p11534_p5, %p141_p7  ;;  %s153_s25 = sshll.u32 %s13330_s24, 4  ;;  %s13414_s25 = int_to_ptr.vmem [resolvable:$true] %s153_s25 }
   0xe   : > { %s13331_s27 = smov [#allocation7]   ;;  %s13172_s5 = scalar_lea.hbm %s15860_s1, 1536 }
   0xf   : > { %p12834_p9 = pneg %p13410_p8  ;;  %s166_s28 = sshll.u32 %s13331_s27, 4  ;;  %s13425_s28 = int_to_ptr.vmem [resolvable:$true] %s166_s28 }
  0x10   : > { %p13173_p12 = scmp.ne.s32.totalorder %s15860_s1, %s13172_s5  ;;  %p13179_p5 = scmp.lt.u32.totalorder %s13172_s5, %s15860_s1 }
  0x11   : > { %p13421_p11 = pnand %p12834_p9, %p15864_p1 }
  0x13   : > { %p13174_p13 = pneg %p13421_p11 }
  0x15   : > { %p13175_p0 = pnand %p13174_p13, %p13173_p12 }
  0x17   : > { %p13176_p3 = pneg %p13175_p0 }
  0x19   : > { %p13181_p7 = pnand %p13179_p5, %p13176_p3 }
  0x1b   : > { %13184 = shalt.err (!%p13181_p7)
}
  0x1c   : > { %s13185_s10 = scalar_lea.vmem %s13414_s25, 1536  ;;  %p13193_p2 = scmp.lt.s32.totalorder %s13414_s25, %s13414_s25 }
  0x1d   : > { %p13186_p9 = scmp.ne.s32.totalorder %s13414_s25, %s13185_s10  ;;  %p13194_p12 = scmp.lt.s32.totalorder %s13185_s10, %s13185_s10 }
  0x1f   : > { %p13188_p10 = pnand %p13186_p9, %p13174_p13  ;;  %p13195_p0 = por %p13194_p12, %p13193_p2 }
  0x21   : > { %p13189_p1 = pneg %p13188_p10 }
  0x23   : > { %p13196_p6 = pnand %p13195_p0, %p13189_p1 }
  0x25   : > { %13199 = shalt.err (!%p13196_p6)
}
  0x26   : > { %s13332_s11 = smov 384   ;;  %s13333_s12 = smov 24  }
  0x27   : > { %12837 = dma.hbm_to_vmem [thread:$0]  (!%p13421_p11), %s15860_s1, 1536, %s13414_s25, [#allocation6], %s13332_s11, %s13332_s11, %s13333_s12  }
  0x28   : > { %s13200_s27 = scalar_lea.hbm %s15861_s2, 512 }
  0x29   : > { %p13201_p2 = scmp.ne.s32.totalorder %s15861_s2, %s13200_s27  ;;  %p13207_p10 = scmp.lt.u32.totalorder %s13200_s27, %s15861_s2 }
  0x2b   : > { %p13203_p1 = pnand %p13201_p2, %p13174_p13 }
  0x2d   : > { %p13204_p6 = pneg %p13203_p1 }
  0x2f   : > { %p13209_p3 = pnand %p13207_p10, %p13204_p6 }
  0x31   : > { %13212 = shalt.err (!%p13209_p3)
}
  0x32   : > { %s13213_s25 = scalar_lea.vmem %s13425_s28, 512  ;;  %p13221_p12 = scmp.lt.s32.totalorder %s13425_s28, %s13425_s28 }
  0x33   : > { %p13214_p5 = scmp.ne.s32.totalorder %s13425_s28, %s13213_s25  ;;  %p13222_p0 = scmp.lt.s32.totalorder %s13213_s25, %s13213_s25 }
  0x35   : > { %p13216_p7 = pnand %p13214_p5, %p13174_p13  ;;  %p13223_p2 = por %p13222_p0, %p13221_p12 }
  0x37   : > { %p13217_p9 = pneg %p13216_p7 }
  0x39   : > { %p13224_p1 = pnand %p13223_p2, %p13217_p9 }
  0x3b   : > { %13227 = shalt.err (!%p13224_p1)
}
  0x3c   : > { %s13334_s7 = smov 128   ;;  %s13335_s8 = smov 8  }
  0x3d   : > { %12840 = dma.hbm_to_vmem [thread:$0]  (!%p13421_p11), %s15861_s2, 512, %s13425_s28, [#allocation6], %s13334_s7, %s13334_s7, %s13335_s8  }
  0x3e   : > { %s13483_s11 = sadd.s32 1, %s13328_s18   ;;  %s28_s13 = sadd.s32 1, %s13324_s17 }
  0x3f   : > { %s25_s12 = ssub.s32 %s13328_s18, %s13483_s11  ;;  %p35_p6 = scmp.ne.s32.totalorder %s13324_s17, %s13320_s16 }
  0x40   : > { %p26_p13 = scmp.eq.s32.totalorder %s25_s12, 0  ;;  %p36_p10 = scmp.eq.s32.totalorder %s13328_s18, 0 }
  0x41   : > { %p15955_p5 = scmp.eq.s32.totalorder %s13391_s19, 1  ;;  %p12851_p9 = scmp.lt.s32.totalorder %s13328_s18, 2 }
  0x42   : > { %s13492_s14 = scalar_select %p26_p13, %s13324_s17, %s28_s13  }
  0x43   : > { %p37_p3 = por %p36_p10, %p35_p6  ;;  %p13496_p7 = por %p15955_p5, %p35_p6 }
  0x44   : > { %s183_s20 = sand.u32 1, %s13324_s17   ;;  %s11792_s28 = sshll.u32 %s13328_s18, 11 }
  0x45   : > { %s15956_s26 = scalar_select %p13496_p7, 1, 0 }
  0x46   : > { %s11538_s24 = sshll.u32 %s183_s20, 7  ;;  %s13506_s30 = scalar_lea.hbm %s15859_s0, %s11792_s28 }
  0x47   : > { %s187_s5 = scalar_lea.vmem [#allocation2], %s11538_s24  ;;  %p13510_p11 = pnand %p12851_p9, %p37_p3 }
  0x48   : > { %s194_s6 = sshll.u32 %s187_s5, 4  ;;  %s13514_s9 = scalar_lea.sflag [#allocation3], %s183_s20  ;;  %s13508_s6 = int_to_ptr.vmem [resolvable:$true] %s194_s6 }
  0x49   : > { %s13228_s10 = scalar_lea.hbm %s13506_s30, 2048  ;;  %p13230_p0 = pneg %p13510_p11 }
  0x4a   : > { %p13229_p12 = scmp.ne.s32.totalorder %s13506_s30, %s13228_s10  ;;  %s13233_s24 = scalar_lea.hbm %s15859_s0, 4096 }
  0x4b   : > { %p13234_p13 = scmp.lt.u32.totalorder %s13506_s30, %s15859_s0  ;;  %p13235_p6 = scmp.lt.u32.totalorder %s13233_s24, %s13228_s10 }
  0x4c   : > { %p13231_p2 = pnand %p13230_p0, %p13229_p12  ;;  %p13237_p3 = scmp.lt.u32.totalorder %s13228_s10, %s13506_s30 }
  0x4d   : > { %p13236_p10 = por %p13235_p6, %p13234_p13 }
  0x4e   : > { %p13232_p1 = pneg %p13231_p2 }
  0x4f   : > { %p13238_p5 = por %p13237_p3, %p13236_p10 }
  0x51   : > { %p13239_p9 = pnand %p13238_p5, %p13232_p1 }
  0x53   : > { %13242 = shalt.err (!%p13239_p9)
}
  0x54   : > { %s13243_s20 = scalar_lea.vmem %s13508_s6, 2048  ;;  %s13336_s29 = smov [#allocation2]  }
  0x55   : > { %p13244_p12 = scmp.ne.s32.totalorder %s13508_s6, %s13243_s20  ;;  %s13248_s5 = sshll.u32 %s13336_s29, 4  ;;  %s13249_s5 = int_to_ptr.vmem [resolvable:$false] %s13248_s5 }
  0x56   : > { %s13250_s12 = scalar_lea.vmem %s13249_s5, 4096  ;;  %p13251_p4 = scmp.lt.s32.totalorder %s13508_s6, %s13249_s5 }
  0x57   : > { %p13246_p2 = pnand %p13244_p12, %p13230_p0  ;;  %p13252_p13 = scmp.lt.s32.totalorder %s13250_s12, %s13243_s20 }
  0x59   : > { %p13247_p7 = pneg %p13246_p2  ;;  %p13253_p6 = por %p13252_p13, %p13251_p4 }
  0x5b   : > { %p13254_p10 = pnand %p13253_p6, %p13247_p7 }
  0x5d   : > { %13257 = shalt.err (!%p13254_p10)
}
  0x5e   : > { %12844 = dma.hbm_to_vmem [thread:$0]  (!%p13510_p11), %s13506_s30, 2048, %s13508_s6, %s13514_s9, %s13334_s7, %s13334_s7, %s13335_s8  }
  0x5f   : > { %206 = sbr.rel (%p13410_p8) target bundleno = 2693 (0xa85), region = 36 }
  0x66   : > { %s13548_s10 = sand.u32 1, %s13320_s16   ;;  %p15958_p4 = scmp.ne.s32.totalorder %s15951_s21, 0 }
  0x67   : > { %s11542_s13 = sshll.u32 %s13548_s10, 7  ;;  %s209_s24 = scalar_lea.sflag [#allocation3], %s13548_s10 }
  0x68   : > { %s13554_s25 = scalar_lea.vmem [#allocation2], %s11542_s13 }
  0x69   : > { %13303 = dma.done.wait (%p15958_p4), %s209_s24, 2048  }
  0x6a   : > { %13305 = vsyncadd (%p15958_p4), %s209_s24, 4294965248  ;;  %p15959_p7 = scmp.eq.s32.totalorder %s13391_s19, 0 }
  0x6c   : > { %13307 = dma.done.wait (%p15959_p7), [#allocation6], 2048   ;;  %p15960_p8 = pmov %p15959_p7 }
  0x6d   : > { %v15867_v0 = vmov 0.0   ;;  %v264_v1 = vld [vmem:[#allocation5 + $0x8] sm:$0xff]  ;;  %v267_v2 = vld [vmem:[#allocation5 + $0x20] sm:$0xff]  ;;  %v266_v5 = vld [vmem:[#allocation5 + $0x18] sm:$0xff]  ;;  %vm275_vm0 = vcmask 261120   ;;  %vm13338_vm1 = vmmov 0  }
  0x6e   : > { %13309 = vsyncadd (%p15960_p8), [#allocation6], 4294965248  ;;  %388 = vmatprep.mubr.f32.mxu0 %v15867_v0  ;;  %460 = vmatprep.mubr.f32.mxu1 %v15867_v0  ;;  %v263_v3 = vld [vmem:[#allocation5] sm:$0xff]  ;;  %v12794_v4 = vpack.c.bf16 %v267_v2, %v264_v1  ;;  %v270_v6 = vld [vmem:[#allocation5 + $0x38] sm:$0xff]  ;;  %s13339_s21 = smov 96   ;;  %vm1846_vm2 = vcmask 64512  }
  0x6f   : > { %v273_v7 = vld [vmem:[#allocation5 + $0x50] sm:$0xff]  ;;  %v12796_v8 = vpack.c.bf16 %v266_v5, %v263_v3  ;;  %v272_v11 = vld [vmem:[#allocation5 + $0x48] sm:$0xff]  ;;  %v247_v13 = vld [vmem:[%s13554_s25] sm:$0xff]  ;;  %s13340_s23 = smov 64   ;;  %s13341_s7 = smov 32  }
  0x70   : > { %v12798_v9 = vpack.c.bf16 %v273_v7, %v270_v6  ;;  %v269_v10 = vld [vmem:[#allocation5 + $0x30] sm:$0xff]  ;;  %12795 = vmatprep.subr.bf16.mxu0 %v12794_v4  ;;  %12818 = vmatprep.subr.bf16.mxu1 %v12794_v4  ;;  %v13568_v14 = vld [vmem:[%s13554_s25 + $0x60] sm:$0xff]  ;;  %v268_v16 = vld [vmem:[#allocation5 + $0x28] sm:$0xff]  ;;  %s15747_s6 = scalar_lea.vmem [#allocation8], %s11542_s13  ;;  %s11793_s9 = sshll.u32 %s13391_s19, 11 }
  0x71   : > { %12797 = vmatpush1.bf16.msra.mxu0 %v12796_v8  ;;  %12820 = vmatpush1.bf16.msra.mxu1 %v12796_v8  ;;  %v12800_v12 = vpack.c.bf16 %v272_v11, %v269_v10  ;;  %v265_v15 = vld [vmem:[#allocation5 + $0x10] sm:$0xff]  ;;  %v271_v18 = vld [vmem:[#allocation5 + $0x40] sm:$0xff]  ;;  %v274_v19 = vld [vmem:[#allocation5 + $0x58] sm:$0xff]  ;;  %s11441_s28 = sshll.u32 %s15747_s6, 4  ;;  %s15808_s29 = scalar_lea.hbm %s15863_s4, %s11793_s9  ;;  %s15810_s28 = int_to_ptr.vmem [resolvable:$true] %s11441_s28 }
  0x72   : > { %12799 = vmatprep.subr.bf16.mxu0 %v12798_v9  ;;  %12819 = vmatprep.subr.bf16.mxu1 %v12798_v9  ;;  %v12802_v17 = vpack.c.bf16 %v268_v16, %v265_v15  ;;  %v248_v20 = vld [vmem:[%s13554_s25 + $0x8] sm:$0xff]  ;;  %v12806_v22 = vpack.c.bf16 %v274_v19, %v271_v18  ;;  %v249_v23 = vld [vmem:[%s13554_s25 + $0x10] sm:$0xff]  ;;  %v250_v25 = vld [vmem:[%s13554_s25 + $0x18] sm:$0xff]  ;;  %s11428_s19 = scalar_lea.sflag [#allocation4], %s13548_s10  ;;  %s13258_s5 = scalar_lea.vmem %s15810_s28, 2048 }
  0x73   : > { %v260_v21 = vld [vmem:[%s13554_s25 + $0x68] sm:$0xff]  ;;  %v261_v24 = vld [vmem:[%s13554_s25 + $0x70] sm:$0xff]  ;;  %v262_v26 = vld [vmem:[%s13554_s25 + $0x78] sm:$0xff]  ;;  %p13259_p11 = scmp.ne.s32.totalorder %s15810_s28, %s13258_s5  ;;  %p16142_p0 = scmp.ne.s32.totalorder %s15956_s26, 0 }
  0x74   : > { %v251_v27 = vld [vmem:[%s13554_s25 + $0x20] sm:$0xff]  ;;  %v252_v28 = vld [vmem:[%s13554_s25 + $0x28] sm:$0xff]  ;;  %v253_v29 = vld [vmem:[%s13554_s25 + $0x30] sm:$0xff]  ;;  %s13342_s12 = smov [#allocation8]  }
  0x75   : > { %12801 = vmatpush1.bf16.msra.mxu0 %v12800_v12  ;;  %12821 = vmatpush1.bf16.msra.mxu1 %v12800_v12  ;;  %v254_v30 = vld [vmem:[%s13554_s25 + $0x38] sm:$0xff]  ;;  %v255_v31 = vld [vmem:[%s13554_s25 + $0x40] sm:$0xff]  ;;  %v256_v32 = vld [vmem:[%s13554_s25 + $0x48] sm:$0xff]  ;;  %p13260_p1 = pnand %p13259_p11, %p16142_p0  ;;  %s13262_s13 = sshll.u32 %s13342_s12, 4  ;;  %s13263_s13 = int_to_ptr.vmem [resolvable:$false] %s13262_s13 }
  0x76   : > { %12162 = vmatprep.subr.mxu0 %v15867_v0  ;;  %12803 = vmatprep.subr.bf16.mxu1 %v12802_v17  ;;  %v257_v33 = vld [vmem:[%s13554_s25 + $0x50] sm:$0xff]  ;;  %v258_v34 = vld [vmem:[%s13554_s25 + $0x58] sm:$0xff]  ;;  %s13264_s24 = scalar_lea.vmem %s13263_s13, 4096  ;;  %p13265_p5 = scmp.lt.s32.totalorder %s15810_s28, %s13263_s13 }
  0x77   : > { %p13261_p3 = pneg %p13260_p1  ;;  %p13266_p9 = scmp.lt.s32.totalorder %s13264_s24, %s13258_s5 }
  0x78   : > { %11546 = vmatmul.mubr.msk.f32.vlgmr.msra.gmra.mrb[0].mxu0 %vm275_vm0, %v247_v13  ;;  %11558 = vmatmul.mubr.msk.f32.vlgmr.msra.gmra.mrb[0].mxu1 %vm275_vm0, %v13568_v14 }
  0x79   : > { %394 = vmatprep.mubr.f32.mxu0 %v15867_v0  ;;  %466 = vmatprep.mubr.f32.mxu1 %v15867_v0  ;;  %p13267_p12 = por %p13266_p9, %p13265_p5 }
  0x7a   : > { %12805 = vmatpush3.bf16.msra.mxu1 %v12802_v17 }
  0x7b   : > { %12807 = vmatprep.subr.bf16.mxu1 %v12806_v22  ;;  %p13268_p2 = pnand %p13267_p12, %p13261_p3 }
  0x7c   : > { %11547 = vmatmul.mubr.msk.f32.gmra.mrb[2].mxu0 %vm275_vm0, %v248_v20  ;;  %11559 = vmatmul.mubr.msk.f32.gmra.mrb[2].mxu1 %vm275_vm0, %v260_v21 }
  0x7d   : > { %400 = vmatprep.mubr.f32.mxu0 %v15867_v0  ;;  %472 = vmatprep.mubr.f32.mxu1 %v15867_v0 }
  0x7e   : > { %12809 = vmatpush3.bf16.msra.mxu1 %v12806_v22 }
  0x7f   : > { %12122 = vmatprep.subr.mxu1 %v15867_v0 }
  0x80   : > { %11548 = vmatmul.mubr.msk.f32.gmra.mrb[4].mxu0 %vm275_vm0, %v249_v23  ;;  %11560 = vmatmul.mubr.msk.f32.gmra.mrb[4].mxu1 %vm275_vm0, %v261_v24 }
  0x81   : > { %406 = vmatprep.mubr.f32.mxu0 %v15867_v0  ;;  %478 = vmatprep.mubr.f32.mxu1 %v15867_v0 }
  0x84   : > { %11549 = vmatmul.mubr.msk.f32.gmra.mrb[6].mxu0 %vm275_vm0, %v250_v25  ;;  %11561 = vmatmul.mubr.msk.f32.gmra.mrb[6].mxu1 %vm275_vm0, %v262_v26 }
  0x85   : > { %412 = vmatprep.mubr.f32.mxu0 %v15867_v0  ;;  %12098 = vmatprep.mubr.msk.f32.mxu1 %vm275_vm0, %v247_v13 }
  0x88   : > { %11550 = vmatmul.mubr.msk.f32.gmra.mrb[8].mxu0 %vm275_vm0, %v251_v27  ;;  %12099 = vmatmul.mubr.msk.f32.vlgmr.msra.gmra.mrb[8].mxu1 %vm275_vm0, %v248_v20 }
  0x89   : > { %418 = vmatprep.mubr.f32.mxu0 %v15867_v0  ;;  %12101 = vmatprep.mubr.msk.f32.mxu1 %vm275_vm0, %v249_v23 }
  0x8c   : > { %11551 = vmatmul.mubr.msk.f32.gmra.mrb[10].mxu0 %vm275_vm0, %v252_v28  ;;  %12102 = vmatmul.mubr.msk.f32.gmra.mrb[10].mxu1 %vm275_vm0, %v250_v25 }
  0x8d   : > { %424 = vmatprep.mubr.f32.mxu0 %v15867_v0  ;;  %12104 = vmatprep.mubr.msk.f32.mxu1 %vm275_vm0, %v251_v27 }
  0x90   : > { %11552 = vmatmul.mubr.msk.f32.gmra.mrb[12].mxu0 %vm275_vm0, %v253_v29  ;;  %12105 = vmatmul.mubr.msk.f32.gmra.mrb[12].mxu1 %vm275_vm0, %v252_v28 }
  0x91   : > { %430 = vmatprep.mubr.f32.mxu0 %v15867_v0  ;;  %12107 = vmatprep.mubr.msk.f32.mxu1 %vm275_vm0, %v253_v29 }
  0x94   : > { %11553 = vmatmul.mubr.msk.f32.gmra.mrb[14].mxu0 %vm275_vm0, %v254_v30  ;;  %12108 = vmatmul.mubr.msk.f32.gmra.mrb[14].mxu1 %vm275_vm0, %v254_v30 }
  0x95   : > { %436 = vmatprep.mubr.f32.mxu0 %v15867_v0  ;;  %12110 = vmatprep.mubr.msk.f32.mxu1 %vm275_vm0, %v255_v31 }
  0x98   : > { %11554 = vmatmul.mubr.msk.f32.gmra.mrb[16].mxu0 %vm275_vm0, %v255_v31  ;;  %12111 = vmatmul.mubr.msk.f32.gmra.mrb[16].mxu1 %vm275_vm0, %v256_v32 }
  0x99   : > { %442 = vmatprep.mubr.f32.mxu0 %v15867_v0  ;;  %12113 = vmatprep.mubr.msk.f32.mxu1 %vm275_vm0, %v257_v33 }
  0x9c   : > { %11555 = vmatmul.mubr.msk.f32.gmra.mrb[18].mxu0 %vm275_vm0, %v256_v32  ;;  %12114 = vmatmul.mubr.msk.f32.gmra.mrb[18].mxu1 %vm275_vm0, %v258_v34 }
  0x9d   : > { %448 = vmatprep.mubr.f32.mxu0 %v15867_v0  ;;  %12116 = vmatprep.mubr.msk.f32.mxu1 %vm275_vm0, %v13568_v14 }
  0xa0   : > { %11556 = vmatmul.mubr.msk.f32.gmra.mrb[20].mxu0 %vm275_vm0, %v257_v33  ;;  %12117 = vmatmul.mubr.msk.f32.gmra.mrb[20].mxu1 %vm275_vm0, %v260_v21 }
  0xa1   : > { %454 = vmatprep.mubr.f32.mxu0 %v15867_v0  ;;  %12119 = vmatprep.mubr.msk.f32.mxu1 %vm275_vm0, %v261_v24 }
  0xa4   : > { %11557 = vmatmul.mubr.msk.f32.gmra.mrb[22].mxu0 %vm275_vm0, %v258_v34  ;;  %12120 = vmatmul.mubr.msk.f32.gmra.mrb[22].mxu1 %vm275_vm0, %v262_v26 }
  0xa5   : > { %12124 = vmatprep.mubr.msk.f32.mxu1 %vm13338_vm1, %v15867_v0  ;;  %12164 = vmatprep.mubr.msk.f32.mxu0 %vm13338_vm1, %v15867_v0 }
 0x14b   : > { %v13638_v35 = vpop.f32.mrb[0].mxu0  ;;  %v13640_v36 = vpop.f32.mrb[0].mxu1 }
 0x14c   : > { %15961 = vst [vmem:[#allocation12_spill] sm:$0xff] %v13640_v36  ;;  %2025 = vrot.lane.b32.xlu0 %v13638_v35, %s13339_s21  ;;  %v13644_v37 = vpop.f32.mrb[1].mxu0  ;;  %12123 = vmatpush3.xpose.msk.msra.mxu1 %vm275_vm0, %v13638_v35  ;;  %v13648_v38 = vpop.f32.mrb[1].mxu1 }
 0x14d   : > { %15962 = vst [vmem:[#allocation13_spill] sm:$0xff] %v13648_v38  ;;  %2023 = vrot.lane.b32.xlu1 %v13644_v37, %s13339_s21  ;;  %12127 = vmatprep.subr.mxu1 %v15867_v0 }
 0x14f   : > { %v13653_v39 = vpop.f32.mrb[2].mxu0  ;;  %12125 = vmatmul.mubr.msk.f32.vlgmr.msra.gmra.mrb[24].mxu1 %vm275_vm0, %v13644_v37  ;;  %v13657_v40 = vpop.f32.mrb[2].mxu1 }
 0x150   : > { %15963 = vst [vmem:[#allocation14_spill] sm:$0xff] %v13657_v40  ;;  %2961 = vrot.lane.b32.xlu0 %v13640_v36, %s13339_s21  ;;  %12128 = vmatpush3.xpose.msk.msra.mxu1 %vm275_vm0, %v13653_v39  ;;  %v13663_v41 = vpop.f32.mrb[3].mxu0  ;;  %v13665_v42 = vpop.f32.mrb[3].mxu1 }
 0x151   : > { %15964 = vst [vmem:[#allocation15_spill] sm:$0xff] %v13665_v42  ;;  %3039 = vrot.lane.b32.xlu1 %v13657_v40, %s13339_s21  ;;  %12129 = vmatprep.mubr.msk.f32.mxu1 %vm13338_vm1, %v15867_v0 }
 0x152   : > { %12132 = vmatprep.subr.mxu1 %v15867_v0 }
 0x153   : > { %v13672_v43 = vpop.f32.mrb[4].mxu0  ;;  %12130 = vmatmul.mubr.msk.f32.vlgmr.msra.gmra.mrb[26].mxu1 %vm275_vm0, %v13663_v41  ;;  %v13676_v44 = vpop.f32.mrb[4].mxu1 }
 0x154   : > { %15965 = vst [vmem:[#allocation16_spill] sm:$0xff] %v13676_v44  ;;  %2959 = vrot.lane.b32.xlu0 %v13648_v38, %s13339_s21  ;;  %12133 = vmatpush3.xpose.msk.msra.mxu1 %vm275_vm0, %v13672_v43  ;;  %v13682_v45 = vpop.f32.mrb[5].mxu0  ;;  %v13684_v46 = vpop.f32.mrb[5].mxu1 }
 0x155   : > { %15966 = vst [vmem:[#allocation17_spill] sm:$0xff] %v13684_v46  ;;  %2101 = vrot.lane.b32.xlu1 %v13663_v41, %s13339_s21  ;;  %12134 = vmatprep.mubr.msk.f32.mxu1 %vm13338_vm1, %v15867_v0 }
 0x156   : > { %12137 = vmatprep.subr.mxu1 %v15867_v0 }
 0x157   : > { %v13691_v47 = vpop.f32.mrb[6].mxu0  ;;  %12135 = vmatmul.mubr.msk.f32.vlgmr.msra.gmra.mrb[28].mxu1 %vm275_vm0, %v13682_v45  ;;  %v13695_v48 = vpop.f32.mrb[6].mxu1 }
 0x158   : > { %15967 = vst [vmem:[#allocation18_spill] sm:$0xff] %v13695_v48  ;;  %2103 = vrot.lane.b32.xlu0 %v13653_v39, %s13339_s21  ;;  %12138 = vmatpush3.xpose.msk.msra.mxu1 %vm275_vm0, %v13691_v47  ;;  %v13701_v49 = vpop.f32.mrb[7].mxu0  ;;  %v13703_v50 = vpop.f32.mrb[7].mxu1 }
 0x159   : > { %15968 = vst [vmem:[#allocation19_spill] sm:$0xff] %v13703_v50  ;;  %3037 = vrot.lane.b32.xlu1 %v13665_v42, %s13339_s21  ;;  %12139 = vmatprep.mubr.msk.f32.mxu1 %vm13338_vm1, %v15867_v0 }
 0x15a   : > { %12142 = vmatprep.subr.mxu1 %v15867_v0 }
 0x15b   : > { %v13710_v51 = vpop.f32.mrb[8].mxu0  ;;  %12140 = vmatmul.mubr.msk.f32.vlgmr.msra.gmra.mrb[30].mxu1 %vm275_vm0, %v13701_v49  ;;  %v13750_v57 = vpop.f32.mrb[8].mxu1 }
 0x15c   : > { %2181 = vrot.lane.b32.xlu0 %v13672_v43, %s13339_s21  ;;  %12143 = vmatpush3.xpose.msk.msra.mxu1 %vm275_vm0, %v13710_v51  ;;  %v13718_v52 = vpop.f32.mrb[9].mxu0  ;;  %15971 = vst [vmem:[#allocation22_spill] sm:$0xff] %v13750_v57  ;;  %v13757_v58 = vpop.f32.mrb[9].mxu1 }
 0x15d   : > { %2259 = vrot.lane.b32.xlu1 %v13691_v47, %s13339_s21  ;;  %12144 = vmatprep.mubr.msk.f32.mxu1 %vm13338_vm1, %v15867_v0  ;;  %15972 = vst [vmem:[#allocation23_spill] sm:$0xff] %v13757_v58 }
 0x15e   : > { %12147 = vmatprep.subr.mxu1 %v15867_v0 }
 0x15f   : > { %v13725_v53 = vpop.f32.mrb[10].mxu0  ;;  %12145 = vmatmul.mubr.msk.f32.vlgmr.msra.gmra.mrb[32].mxu1 %vm275_vm0, %v13718_v52  ;;  %v13769_v61 = vpop.f32.mrb[10].mxu1 }
 0x160   : > { %2179 = vrot.lane.b32.xlu0 %v13682_v45, %s13339_s21  ;;  %12148 = vmatpush3.xpose.msk.msra.mxu1 %vm275_vm0, %v13725_v53  ;;  %v13733_v54 = vpop.f32.mrb[11].mxu0  ;;  %15975 = vst [vmem:[#allocation26_spill] sm:$0xff] %v13769_v61  ;;  %v13776_v62 = vpop.f32.mrb[11].mxu1 }
 0x161   : > { %2257 = vrot.lane.b32.xlu1 %v13701_v49, %s13339_s21  ;;  %12149 = vmatprep.mubr.msk.f32.mxu1 %vm13338_vm1, %v15867_v0  ;;  %15976 = vst [vmem:[#allocation27_spill] sm:$0xff] %v13776_v62 }
 0x162   : > { %12152 = vmatprep.subr.mxu1 %v15867_v0 }
 0x163   : > { %v13740_v55 = vpop.f32.mrb[12].mxu0  ;;  %12150 = vmatmul.mubr.msk.f32.vlgmr.msra.gmra.mrb[34].mxu1 %vm275_vm0, %v13733_v54  ;;  %v13788_v2 = vpop.f32.mrb[12].mxu1 }
 0x164   : > { %15969 = vst [vmem:[#allocation20_spill] sm:$0xff] %v13740_v55  ;;  %2337 = vrot.lane.b32.xlu0 %v13710_v51, %s13339_s21  ;;  %12153 = vmatpush3.xpose.msk.msra.mxu1 %vm275_vm0, %v13740_v55  ;;  %v13748_v56 = vpop.f32.mrb[13].mxu0  ;;  %15979 = vst [vmem:[#allocation30_spill] sm:$0xff] %v13788_v2  ;;  %v13795_v3 = vpop.f32.mrb[13].mxu1 }
 0x165   : > { %15970 = vst [vmem:[#allocation21_spill] sm:$0xff] %v13748_v56  ;;  %2415 = vrot.lane.b32.xlu1 %v13725_v53, %s13339_s21  ;;  %12154 = vmatprep.mubr.msk.f32.mxu1 %vm13338_vm1, %v15867_v0  ;;  %15980 = vst [vmem:[#allocation31_spill] sm:$0xff] %v13795_v3 }
 0x166   : > { %12157 = vmatprep.subr.mxu1 %v15867_v0 }
 0x167   : > { %v13759_v59 = vpop.f32.mrb[14].mxu0  ;;  %12155 = vmatmul.mubr.msk.f32.vlgmr.msra.gmra.mrb[36].mxu1 %vm275_vm0, %v13748_v56  ;;  %v13811_v6 = vpop.f32.mrb[14].mxu1 }
 0x168   : > { %15973 = vst [vmem:[#allocation24_spill] sm:$0xff] %v13759_v59  ;;  %2335 = vrot.lane.b32.xlu0 %v13718_v52, %s13339_s21  ;;  %12158 = vmatpush3.xpose.msk.msra.mxu1 %vm275_vm0, %v13759_v59  ;;  %v13767_v60 = vpop.f32.mrb[15].mxu0  ;;  %15983 = vst [vmem:[#allocation34_spill] sm:$0xff] %v13811_v6  ;;  %v13818_v8 = vpop.f32.mrb[15].mxu1 }
 0x169   : > { %15974 = vst [vmem:[#allocation25_spill] sm:$0xff] %v13767_v60  ;;  %2413 = vrot.lane.b32.xlu1 %v13733_v54, %s13339_s21  ;;  %12159 = vmatprep.mubr.msk.f32.mxu1 %vm13338_vm1, %v15867_v0  ;;  %15985 = vst [vmem:[#allocation36_spill] sm:$0xff] %v13818_v8 }
 0x16a   : > { %12167 = vmatprep.subr.mxu1 %v15867_v0 }
 0x16b   : > { %v13778_v63 = vpop.f32.mrb[16].mxu0  ;;  %12160 = vmatmul.mubr.msk.f32.vlgmr.msra.gmra.mrb[38].mxu1 %vm275_vm0, %v13767_v60  ;;  %v13831_v10 = vpop.f32.mrb[16].mxu1 }
 0x16c   : > { %15977 = vst [vmem:[#allocation28_spill] sm:$0xff] %v13778_v63  ;;  %2493 = vrot.lane.b32.xlu0 %v13740_v55, %s13339_s21  ;;  %12163 = vmatpush3.xpose.msk.msra.mxu0 %vm275_vm0, %v13778_v63  ;;  %v13786_v1 = vpop.f32.mrb[17].mxu0  ;;  %15987 = vst [vmem:[#allocation38_spill] sm:$0xff] %v13831_v10  ;;  %v13837_v12 = vpop.f32.mrb[17].mxu1 }
 0x16d   : > { %15978 = vst [vmem:[#allocation29_spill] sm:$0xff] %v13786_v1  ;;  %2571 = vrot.lane.b32.xlu1 %v13759_v59, %s13339_s21  ;;  %12169 = vmatprep.mubr.msk.f32.mxu1 %vm13338_vm1, %v15867_v0  ;;  %15989 = vst [vmem:[#allocation40_spill] sm:$0xff] %v13837_v12 }
 0x16e   : > { %12172 = vmatprep.subr.mxu0 %v15867_v0 }
 0x16f   : > { %v13797_v4 = vpop.f32.mrb[18].mxu0  ;;  %12165 = vmatmul.mubr.msk.f32.vlgmr.msra.gmra.mrb[24].mxu0 %vm275_vm0, %v13786_v1  ;;  %v13849_v14 = vpop.f32.mrb[18].mxu1 }
 0x170   : > { %15981 = vst [vmem:[#allocation32_spill] sm:$0xff] %v13797_v4  ;;  %2491 = vrot.lane.b32.xlu0 %v13748_v56, %s13339_s21  ;;  %12168 = vmatpush3.xpose.msk.msra.mxu1 %vm275_vm0, %v13797_v4  ;;  %v13805_v5 = vpop.f32.mrb[19].mxu0  ;;  %15991 = vst [vmem:[#allocation42_spill] sm:$0xff] %v13849_v14  ;;  %v13854_v15 = vpop.f32.mrb[19].mxu1 }
 0x171   : > { %15982 = vst [vmem:[#allocation33_spill] sm:$0xff] %v13805_v5  ;;  %2569 = vrot.lane.b32.xlu1 %v13767_v60, %s13339_s21  ;;  %12174 = vmatprep.mubr.msk.f32.mxu0 %vm13338_vm1, %v15867_v0  ;;  %15992 = vst [vmem:[#allocation43_spill] sm:$0xff] %v13854_v15 }
 0x172   : > { %12177 = vmatprep.subr.mxu1 %v15867_v0 }
 0x173   : > { %v13814_v7 = vpop.f32.mrb[20].mxu0  ;;  %12170 = vmatmul.mubr.msk.f32.vlgmr.msra.gmra.mrb[40].mxu1 %vm275_vm0, %v13805_v5  ;;  %v13859_v16 = vpop.f32.mrb[20].mxu1 }
 0x174   : > { %15984 = vst [vmem:[#allocation35_spill] sm:$0xff] %v13814_v7  ;;  %2649 = vrot.lane.b32.xlu0 %v13778_v63, %s13339_s21  ;;  %12173 = vmatpush3.xpose.msk.msra.mxu0 %vm275_vm0, %v13814_v7  ;;  %v13824_v9 = vpop.f32.mrb[21].mxu0  ;;  %15993 = vst [vmem:[#allocation44_spill] sm:$0xff] %v13859_v16  ;;  %v13865_v17 = vpop.f32.mrb[21].mxu1 }
 0x175   : > { %15986 = vst [vmem:[#allocation37_spill] sm:$0xff] %v13824_v9  ;;  %2727 = vrot.lane.b32.xlu1 %v13797_v4, %s13339_s21  ;;  %12182 = vmatprep.subr.mxu0 %v15867_v0  ;;  %15994 = vst [vmem:[#allocation45_spill] sm:$0xff] %v13865_v17 }
 0x176   : > { %12179 = vmatprep.mubr.msk.f32.mxu1 %vm13338_vm1, %v15867_v0 }
 0x177   : > { %v13833_v11 = vpop.f32.mrb[22].mxu0  ;;  %12175 = vmatmul.mubr.msk.f32.vlgmr.msra.gmra.mrb[26].mxu0 %vm275_vm0, %v13824_v9  ;;  %v13871_v18 = vpop.f32.mrb[22].mxu1 }
 0x178   : > { %15988 = vst [vmem:[#allocation39_spill] sm:$0xff] %v13833_v11  ;;  %2647 = vrot.lane.b32.xlu0 %v13786_v1, %s13339_s21  ;;  %12178 = vmatpush3.xpose.msk.msra.mxu1 %vm275_vm0, %v13833_v11  ;;  %v13843_v13 = vpop.f32.mrb[23].mxu0  ;;  %15995 = vst [vmem:[#allocation46_spill] sm:$0xff] %v13871_v18  ;;  %v13877_v19 = vpop.f32.mrb[23].mxu1 }
 0x179   : > { %15990 = vst [vmem:[#allocation41_spill] sm:$0xff] %v13843_v13  ;;  %12183 = vmatpush3.xpose.msk.msra.mxu0 %vm275_vm0, %v13640_v36  ;;  %2725 = vrot.lane.b32.xlu1 %v13805_v5, %s13339_s21  ;;  %15996 = vst [vmem:[#allocation47_spill] sm:$0xff] %v13877_v19 }
 0x17a   : > { %12184 = vmatprep.mubr.msk.f32.mxu0 %vm13338_vm1, %v15867_v0  ;;  %12187 = vmatprep.subr.mxu1 %v15867_v0 }
 0x17b   : > { %12180 = vmatmul.mubr.msk.f32.vlgmr.msra.gmra.mrb[42].mxu1 %vm275_vm0, %v13843_v13  ;;  %12192 = vmatprep.subr.mxu0 %v15867_v0 }
 0x17c   : > { %12185 = vmatmul.mubr.msk.f32.vlgmr.msra.gmra.mrb[28].mxu0 %vm275_vm0, %v13648_v38  ;;  %2805 = vrot.lane.b32.xlu0 %v13814_v7, %s13339_s21 }
 0x17d   : > { %12188 = vmatpush3.xpose.msk.msra.mxu1 %vm275_vm0, %v13657_v40  ;;  %12193 = vmatpush3.xpose.msk.msra.mxu0 %vm275_vm0, %v13676_v44 }
 0x17e   : > { %2883 = vrot.lane.b32.xlu1 %v13833_v11, %s13339_s21  ;;  %12189 = vmatprep.mubr.msk.f32.mxu1 %vm13338_vm1, %v15867_v0 }
 0x17f   : > { %12194 = vmatprep.mubr.msk.f32.mxu0 %vm13338_vm1, %v15867_v0  ;;  %12197 = vmatprep.subr.mxu1 %v15867_v0 }
 0x180   : > { %12190 = vmatmul.mubr.msk.f32.vlgmr.msra.gmra.mrb[44].mxu1 %vm275_vm0, %v13665_v42  ;;  %12195 = vmatmul.mubr.msk.f32.vlgmr.msra.gmra.mrb[30].mxu0 %vm275_vm0, %v13684_v46 }
 0x181   : > { %2803 = vrot.lane.b32.xlu0 %v13824_v9, %s13339_s21  ;;  %12198 = vmatpush3.xpose.msk.msra.mxu1 %vm275_vm0, %v13695_v48 }
 0x182   : > { %2881 = vrot.lane.b32.xlu1 %v13843_v13, %s13339_s21  ;;  %12199 = vmatprep.mubr.msk.f32.mxu1 %vm13338_vm1, %v15867_v0 }
 0x183   : > { %12202 = vmatprep.subr.mxu0 %v15867_v0  ;;  %12204 = vmatprep.mubr.msk.f32.mxu0 %vm13338_vm1, %v15867_v0 }
 0x184   : > { %12200 = vmatmul.mubr.msk.f32.vlgmr.msra.gmra.mrb[46].mxu1 %vm275_vm0, %v13703_v50  ;;  %12207 = vmatprep.subr.mxu1 %v15867_v0 }
 0x185   : > { %3117 = vrot.lane.b32.xlu0 %v13676_v44, %s13339_s21  ;;  %12209 = vmatprep.mubr.msk.f32.mxu1 %vm13338_vm1, %v15867_v0 }
 0x186   : > { %3195 = vrot.lane.b32.xlu1 %v13695_v48, %s13339_s21 }
 0x189   : > { %3115 = vrot.lane.b32.xlu0 %v13684_v46, %s13339_s21 }
 0x18a   : > { %3193 = vrot.lane.b32.xlu1 %v13703_v50, %s13339_s21 }
 0x18d   : > { %3525 = vrot.lane.b32.xlu0 %v13750_v57, %s13339_s21 }
 0x18e   : > { %3448 = vrot.lane.b32.xlu1 %v13757_v58, %s13339_s21 }
 0x191   : > { %3679 = vrot.lane.b32.xlu0 %v13769_v61, %s13339_s21 }
 0x192   : > { %3602 = vrot.lane.b32.xlu1 %v13776_v62, %s13339_s21 }
 0x195   : > { %3833 = vrot.lane.b32.xlu0 %v13788_v2, %s13339_s21 }
 0x196   : > { %3756 = vrot.lane.b32.xlu1 %v13795_v3, %s13339_s21 }
 0x199   : > { %3987 = vrot.lane.b32.xlu0 %v13811_v6, %s13339_s21 }
 0x19a   : > { %3910 = vrot.lane.b32.xlu1 %v13818_v8, %s13339_s21 }
 0x19d   : > { %4141 = vrot.lane.b32.xlu0 %v13831_v10, %s13339_s21 }
 0x19e   : > { %4064 = vrot.lane.b32.xlu1 %v13837_v12, %s13339_s21 }
 0x1a1   : > { %4295 = vrot.lane.b32.xlu0 %v13849_v14, %s13339_s21 }
 0x1a2   : > { %4218 = vrot.lane.b32.xlu1 %v13854_v15, %s13339_s21 }
 0x1a5   : > { %4449 = vrot.lane.b32.xlu0 %v13859_v16, %s13339_s21 }
 0x1a6   : > { %4372 = vrot.lane.b32.xlu1 %v13865_v17, %s13339_s21 }
 0x1be   : > { %v2026_v20 = vpop.permute.xlu0 %2025 }
 0x1bf   : > { %v2024_v21 = vpop.permute.xlu1 %2023  ;;  %12203 = vmatpush3.xpose.msk.msra.mxu0 %vm275_vm0, %v2026_v20 }
 0x1c0   : > { %12212 = vmatprep.subr.mxu0 %v15867_v0 }
 0x1c2   : > { %v13940_v22 = vpop.permute.xlu0 %2961  ;;  %12205 = vmatmul.mubr.msk.f32.vlgmr.msra.gmra.mrb[32].mxu0 %vm275_vm0, %v2024_v21 }
 0x1c3   : > { %v13943_v23 = vpop.permute.xlu1 %3039  ;;  %12214 = vmatprep.mubr.msk.f32.mxu0 %vm13338_vm1, %v15867_v0 }
 0x1c6   : > { %v13947_v24 = vpop.permute.xlu0 %2959 }
 0x1c7   : > { %v2102_v25 = vpop.permute.xlu1 %2101 }
 0x1ca   : > { %v2104_v26 = vpop.permute.xlu0 %2103 }
 0x1cb   : > { %v13949_v27 = vpop.permute.xlu1 %3037  ;;  %12208 = vmatpush3.xpose.msk.msra.mxu1 %vm275_vm0, %v2104_v26 }
 0x1cc   : > { %12217 = vmatprep.subr.mxu1 %v15867_v0 }
 0x1ce   : > { %v2182_v28 = vpop.permute.xlu0 %2181  ;;  %12210 = vmatmul.mubr.msk.f32.vlgmr.msra.gmra.mrb[48].mxu1 %vm275_vm0, %v2102_v25 }
 0x1cf   : > { %v2260_v29 = vpop.permute.xlu1 %2259  ;;  %12213 = vmatpush3.xpose.msk.msra.mxu0 %vm275_vm0, %v2182_v28  ;;  %12219 = vmatprep.mubr.msk.f32.mxu1 %vm13338_vm1, %v15867_v0 }
 0x1d0   : > { %12218 = vmatpush3.xpose.msk.msra.mxu1 %vm275_vm0, %v2260_v29  ;;  %12222 = vmatprep.subr.mxu0 %v15867_v0 }
 0x1d1   : > { %12227 = vmatprep.subr.mxu1 %v15867_v0 }
 0x1d2   : > { %v2180_v30 = vpop.permute.xlu0 %2179 }
 0x1d3   : > { %v2258_v31 = vpop.permute.xlu1 %2257  ;;  %12215 = vmatmul.mubr.msk.f32.vlgmr.msra.gmra.mrb[34].mxu0 %vm275_vm0, %v2180_v30 }
 0x1d4   : > { %12220 = vmatmul.mubr.msk.f32.vlgmr.msra.gmra.mrb[50].mxu1 %vm275_vm0, %v2258_v31  ;;  %12224 = vmatprep.mubr.msk.f32.mxu0 %vm13338_vm1, %v15867_v0 }
 0x1d5   : > { %12229 = vmatprep.mubr.msk.f32.mxu1 %vm13338_vm1, %v15867_v0 }
 0x1d6   : > { %v2338_v32 = vpop.permute.xlu0 %2337 }
 0x1d7   : > { %v2416_v33 = vpop.permute.xlu1 %2415  ;;  %12223 = vmatpush3.xpose.msk.msra.mxu0 %vm275_vm0, %v2338_v32 }
 0x1d8   : > { %12228 = vmatpush3.xpose.msk.msra.mxu1 %vm275_vm0, %v2416_v33  ;;  %12232 = vmatprep.subr.mxu0 %v15867_v0 }
 0x1d9   : > { %12237 = vmatprep.subr.mxu1 %v15867_v0 }
 0x1da   : > { %v2336_v34 = vpop.permute.xlu0 %2335 }
 0x1db   : > { %v2414_v20 = vpop.permute.xlu1 %2413  ;;  %12225 = vmatmul.mubr.msk.f32.vlgmr.msra.gmra.mrb[36].mxu0 %vm275_vm0, %v2336_v34 }
 0x1dc   : > { %12230 = vmatmul.mubr.msk.f32.vlgmr.msra.gmra.mrb[52].mxu1 %vm275_vm0, %v2414_v20  ;;  %12234 = vmatprep.mubr.msk.f32.mxu0 %vm13338_vm1, %v15867_v0 }
 0x1dd   : > { %12239 = vmatprep.mubr.msk.f32.mxu1 %vm13338_vm1, %v15867_v0 }
 0x1de   : > { %v2494_v21 = vpop.permute.xlu0 %2493 }
 0x1df   : > { %v2572_v25 = vpop.permute.xlu1 %2571  ;;  %12233 = vmatpush3.xpose.msk.msra.mxu0 %vm275_vm0, %v2494_v21 }
 0x1e0   : > { %12238 = vmatpush3.xpose.msk.msra.mxu1 %vm275_vm0, %v2572_v25  ;;  %12242 = vmatprep.subr.mxu0 %v15867_v0 }
 0x1e1   : > { %12247 = vmatprep.subr.mxu1 %v15867_v0 }
 0x1e2   : > { %v2492_v26 = vpop.permute.xlu0 %2491 }
 0x1e3   : > { %v2570_v28 = vpop.permute.xlu1 %2569  ;;  %12235 = vmatmul.mubr.msk.f32.vlgmr.msra.gmra.mrb[38].mxu0 %vm275_vm0, %v2492_v26 }
 0x1e4   : > { %12240 = vmatmul.mubr.msk.f32.vlgmr.msra.gmra.mrb[54].mxu1 %vm275_vm0, %v2570_v28  ;;  %12244 = vmatprep.mubr.msk.f32.mxu0 %vm13338_vm1, %v15867_v0 }
 0x1e5   : > { %12249 = vmatprep.mubr.msk.f32.mxu1 %vm13338_vm1, %v15867_v0 }
 0x1e6   : > { %v2650_v29 = vpop.permute.xlu0 %2649 }
 0x1e7   : > { %v2728_v30 = vpop.permute.xlu1 %2727  ;;  %12243 = vmatpush3.xpose.msk.msra.mxu0 %vm275_vm0, %v2650_v29 }
 0x1e8   : > { %12248 = vmatpush3.xpose.msk.msra.mxu1 %vm275_vm0, %v2728_v30  ;;  %12252 = vmatprep.subr.mxu0 %v15867_v0 }
 0x1e9   : > { %12257 = vmatprep.subr.mxu1 %v15867_v0 }
 0x1ea   : > { %v2648_v31 = vpop.permute.xlu0 %2647 }
 0x1eb   : > { %v2726_v32 = vpop.permute.xlu1 %2725  ;;  %12245 = vmatmul.mubr.msk.f32.vlgmr.msra.gmra.mrb[40].mxu0 %vm275_vm0, %v2648_v31 }
 0x1ec   : > { %12250 = vmatmul.mubr.msk.f32.vlgmr.msra.gmra.mrb[56].mxu1 %vm275_vm0, %v2726_v32  ;;  %12254 = vmatprep.mubr.msk.f32.mxu0 %vm13338_vm1, %v15867_v0 }
 0x1ed   : > { %12259 = vmatprep.mubr.msk.f32.mxu1 %vm13338_vm1, %v15867_v0 }
 0x1ee   : > { %v2806_v33 = vpop.permute.xlu0 %2805 }
 0x1ef   : > { %12253 = vmatpush3.xpose.msk.msra.mxu0 %vm275_vm0, %v2806_v33 }
 0x1f0   : > { %v2884_v34 = vpop.permute.xlu1 %2883  ;;  %12262 = vmatprep.subr.mxu0 %v15867_v0 }
 0x1f1   : > { %12258 = vmatpush3.xpose.msk.msra.mxu1 %vm275_vm0, %v2884_v34 }
 0x1f2   : > { %12267 = vmatprep.subr.mxu1 %v15867_v0 }
 0x1f3   : > { %v2804_v20 = vpop.permute.xlu0 %2803 }
 0x1f4   : > { %12255 = vmatmul.mubr.msk.f32.vlgmr.msra.gmra.mrb[42].mxu0 %vm275_vm0, %v2804_v20  ;;  %v2882_v21 = vpop.permute.xlu1 %2881 }
 0x1f5   : > { %12263 = vmatpush3.xpose.msk.msra.mxu0 %vm275_vm0, %v13940_v22  ;;  %12260 = vmatmul.mubr.msk.f32.vlgmr.msra.gmra.mrb[58].mxu1 %vm275_vm0, %v2882_v21 }
 0x1f6   : > { %12268 = vmatpush3.xpose.msk.msra.mxu1 %vm275_vm0, %v13943_v23  ;;  %12264 = vmatprep.mubr.msk.f32.mxu0 %vm13338_vm1, %v15867_v0 }
 0x1f7   : > { %12269 = vmatprep.mubr.msk.f32.mxu1 %vm13338_vm1, %v15867_v0  ;;  %v3118_v25 = vpop.permute.xlu0 %3117  ;;  %12272 = vmatprep.subr.mxu0 %v15867_v0 }
 0x1f8   : > { %12265 = vmatmul.mubr.msk.f32.vlgmr.msra.gmra.mrb[44].mxu0 %vm275_vm0, %v13947_v24  ;;  %v3196_v26 = vpop.permute.xlu1 %3195  ;;  %12277 = vmatprep.subr.mxu1 %v15867_v0 }
 0x1f9   : > { %12270 = vmatmul.mubr.msk.f32.vlgmr.msra.gmra.mrb[60].mxu1 %vm275_vm0, %v13949_v27  ;;  %12273 = vmatpush3.xpose.msk.msra.mxu0 %vm275_vm0, %v3118_v25 }
 0x1fa   : > { %12278 = vmatpush3.xpose.msk.msra.mxu1 %vm275_vm0, %v3196_v26  ;;  %12274 = vmatprep.mubr.msk.f32.mxu0 %vm13338_vm1, %v15867_v0 }
 0x1fb   : > { %v3116_v22 = vpop.permute.xlu0 %3115  ;;  %12279 = vmatprep.mubr.msk.f32.mxu1 %vm13338_vm1, %v15867_v0  ;;  %12282 = vmatprep.subr.mxu0 %v15867_v0 }
 0x1fc   : > { %12275 = vmatmul.mubr.msk.f32.vlgmr.msra.gmra.mrb[46].mxu0 %vm275_vm0, %v3116_v22  ;;  %v3194_v23 = vpop.permute.xlu1 %3193  ;;  %12287 = vmatprep.subr.mxu1 %v15867_v0 }
 0x1fd   : > { %12280 = vmatmul.mubr.msk.f32.vlgmr.msra.gmra.mrb[62].mxu1 %vm275_vm0, %v3194_v23  ;;  %12284 = vmatprep.mubr.msk.f32.mxu0 %vm13338_vm1, %v15867_v0 }
 0x1fe   : > { %12289 = vmatprep.mubr.msk.f32.mxu1 %vm13338_vm1, %v15867_v0 }
 0x1ff   : > { %v3526_v24 = vpop.permute.xlu0 %3525 }
 0x200   : > { %v3449_v27 = vpop.permute.xlu1 %3448  ;;  %12288 = vmatpush3.msra.mxu1 %v3526_v24 }
 0x201   : > { %12283 = vmatpush3.msra.mxu0 %v3449_v27  ;;  %12297 = vmatprep.subr.mxu1 %v15867_v0 }
 0x202   : > { %12292 = vmatprep.subr.mxu0 %v15867_v0 }
 0x203   : > { %v14098_v8 = vpop.permute.xlu0 %3679 }
 0x204   : > { %15998 = vst [vmem:[#allocation49_spill] sm:$0xff] %v14098_v8 }
 0x222   : > { %v14032_v28 = vpop.f32.mrb[24].mxu1 }
 0x223   : > { %v12126_v29 = vpop.f32.mrb[25].mxu1  ;;  %v1847_v30 = vsel %vm1846_vm2, %v14032_v28, -inf }
 0x224   : > { %1848 = vmax.xlane.f32.xlu1 %v1847_v30 }
 0x226   : > { %v14036_v31 = vpop.f32.mrb[26].mxu1 }
 0x227   : > { %v1850_v32 = vsel %vm1846_vm2, %v14036_v31, -inf  ;;  %v12131_v33 = vpop.f32.mrb[27].mxu1 }
 0x228   : > { %1851 = vmax.xlane.f32.xlu0 %v1850_v32 }
 0x22a   : > { %v14040_v34 = vpop.f32.mrb[28].mxu1 }
 0x22b   : > { %v1853_v20 = vsel %vm1846_vm2, %v14040_v34, -inf  ;;  %v12136_v21 = vpop.f32.mrb[29].mxu1 }
 0x22c   : > { %1854 = vmax.xlane.f32.xlu1 %v1853_v20 }
 0x22e   : > { %v14044_v25 = vpop.f32.mrb[30].mxu1 }
 0x22f   : > { %v1856_v26 = vsel %vm1846_vm2, %v14044_v25, -inf  ;;  %v12141_v22 = vpop.f32.mrb[31].mxu1 }
 0x230   : > { %1857 = vmax.xlane.f32.xlu0 %v1856_v26 }
 0x232   : > { %v14048_v23 = vpop.f32.mrb[32].mxu1 }
 0x233   : > { %v1859_v24 = vsel %vm1846_vm2, %v14048_v23, -inf  ;;  %v12146_v27 = vpop.f32.mrb[33].mxu1 }
 0x234   : > { %1860 = vmax.xlane.f32.xlu1 %v1859_v24 }
 0x236   : > { %v14052_v29 = vpop.f32.mrb[34].mxu1 }
 0x237   : > { %v1862_v30 = vsel %vm1846_vm2, %v14052_v29, -inf  ;;  %v12151_v32 = vpop.f32.mrb[35].mxu1 }
 0x238   : > { %1863 = vmax.xlane.f32.xlu0 %v1862_v30 }
 0x23a   : > { %v14056_v33 = vpop.f32.mrb[36].mxu1 }
 0x23b   : > { %v1865_v20 = vsel %vm1846_vm2, %v14056_v33, -inf  ;;  %v12156_v21 = vpop.f32.mrb[37].mxu1 }
 0x23c   : > { %1866 = vmax.xlane.f32.xlu1 %v1865_v20 }
 0x23e   : > { %v14060_v26 = vpop.f32.mrb[38].mxu1 }
 0x23f   : > { %v1868_v22 = vsel %vm1846_vm2, %v14060_v26, -inf  ;;  %v12161_v24 = vpop.f32.mrb[39].mxu1 }
 0x240   : > { %1869 = vmax.xlane.f32.xlu0 %v1868_v22 }
 0x242   : > { %v14064_v27 = vpop.f32.mrb[24].mxu0 }
 0x243   : > { %v1871_v32 = vsel %vm1846_vm2, %v14064_v27, -inf  ;;  %v12166_v30 = vpop.f32.mrb[25].mxu0 }
 0x244   : > { %1872 = vmax.xlane.f32.xlu1 %v1871_v32 }
 0x246   : > { %v14068_v0 = vpop.f32.mrb[40].mxu1 }
 0x247   : > { %v1874_v21 = vsel %vm1846_vm2, %v14068_v0, -inf  ;;  %v12171_v20 = vpop.f32.mrb[41].mxu1 }
 0x248   : > { %1875 = vmax.xlane.f32.xlu0 %v1874_v21 }
 0x24a   : > { %v14072_v16 = vpop.f32.mrb[26].mxu0 }
 0x24b   : > { %v1877_v24 = vsel %vm1846_vm2, %v14072_v16, -inf  ;;  %v12176_v22 = vpop.f32.mrb[27].mxu0 }
 0x24c   : > { %1878 = vmax.xlane.f32.xlu1 %v1877_v24 }
 0x24e   : > { %v14076_v14 = vpop.f32.mrb[42].mxu1 }
 0x24f   : > { %v14078_v17 = vpop.f32.mrb[28].mxu0  ;;  %v1880_v32 = vsel %vm1846_vm2, %v14076_v14, -inf  ;;  %v12181_v30 = vpop.f32.mrb[43].mxu1 }
 0x250   : > { %v12186_v10 = vpop.f32.mrb[29].mxu0  ;;  %1881 = vmax.xlane.f32.xlu0 %v1880_v32  ;;  %v1883_v21 = vsel %vm1846_vm2, %v14078_v17, -inf }
 0x251   : > { %1884 = vmax.xlane.f32.xlu1 %v1883_v21  ;;  %v14096_v21 = vpop.permute.xlu1 %3602 }
 0x252   : > { %15997 = vst [vmem:[#allocation48_spill] sm:$0xff] %v14096_v21 }
 0x253   : > { %v14084_v20 = vpop.f32.mrb[44].mxu1  ;;  %v14086_v15 = vpop.f32.mrb[30].mxu0 }
 0x254   : > { %v12191_v22 = vpop.f32.mrb[45].mxu1  ;;  %v1886_v24 = vsel %vm1846_vm2, %v14084_v20, -inf  ;;  %v1889_v6 = vsel %vm1846_vm2, %v14086_v15, -inf  ;;  %v12196_v12 = vpop.f32.mrb[31].mxu0 }
 0x255   : > { %1887 = vmax.xlane.f32.xlu0 %v1886_v24  ;;  %1890 = vmax.xlane.f32.xlu1 %v1889_v6  ;;  %v14104_v12 = vpop.permute.xlu1 %3756  ;;  %v14106_v6 = vpop.permute.xlu0 %3833 }
 0x256   : > { %15999 = vst [vmem:[#allocation50_spill] sm:$0xff] %v14104_v12  ;;  %16000 = vst [vmem:[#allocation51_spill] sm:$0xff] %v14106_v6 }
 0x257   : > { %v14092_v10 = vpop.f32.mrb[46].mxu1 }
 0x258   : > { %v1892_v32 = vsel %vm1846_vm2, %v14092_v10, -inf  ;;  %v12201_v30 = vpop.f32.mrb[47].mxu1 }
 0x259   : > { %1893 = vmax.xlane.f32.xlu0 %v1892_v32  ;;  %v14108_v24 = vpop.permute.xlu1 %3910  ;;  %v14110_v62 = vpop.permute.xlu0 %3987 }
 0x25a   : > { %16001 = vst [vmem:[#allocation52_spill] sm:$0xff] %v14108_v24  ;;  %16002 = vst [vmem:[#allocation53_spill] sm:$0xff] %v14110_v62 }
 0x25d   : > { %v14118_v21 = vpop.permute.xlu0 %4141 }
 0x25e   : > { %16004 = vst [vmem:[#allocation55_spill] sm:$0xff] %v14118_v21 }
 0x261   : > { %v14128_v57 = vpop.permute.xlu0 %4295 }
 0x262   : > { %16006 = vst [vmem:[#allocation57_spill] sm:$0xff] %v14128_v57 }
 0x295   : > { %v14100_v22 = vpop.f32.mrb[32].mxu0 }
 0x296   : > { %v12206_v3 = vpop.f32.mrb[33].mxu0  ;;  %v3271_v2 = vsel %vm1846_vm2, %v14100_v22, -inf }
 0x297   : > { %3272 = vmax.xlane.f32.xlu0 %v3271_v2  ;;  %v14116_v3 = vpop.permute.xlu1 %4064 }
 0x298   : > { %16003 = vst [vmem:[#allocation54_spill] sm:$0xff] %v14116_v3 }
 0x29b   : > { %v14126_v61 = vpop.permute.xlu1 %4218 }
 0x29c   : > { %16005 = vst [vmem:[#allocation56_spill] sm:$0xff] %v14126_v61 }
 0x29f   : > { %v14138_v46 = vpop.permute.xlu1 %4372 }
 0x2a0   : > { %16007 = vst [vmem:[#allocation58_spill] sm:$0xff] %v14138_v46 }
 0x2a1   : > { %v14112_v32 = vpop.f32.mrb[48].mxu1 }
 0x2a2   : > { %v3274_v30 = vsel %vm1846_vm2, %v14112_v32, -inf  ;;  %v12211_v8 = vpop.f32.mrb[49].mxu1 }
 0x2a3   : > { %3275 = vmax.xlane.f32.xlu1 %v3274_v30 }
 0x2a6   : > { %v14120_v2 = vpop.f32.mrb[34].mxu0 }
 0x2a7   : > { %v3277_v6 = vsel %vm1846_vm2, %v14120_v2, -inf  ;;  %v14124_v12 = vpop.f32.mrb[50].mxu1  ;;  %v12216_v24 = vpop.f32.mrb[35].mxu0 }
 0x2a8   : > { %3278 = vmax.xlane.f32.xlu0 %v3277_v6  ;;  %v12221_v62 = vpop.f32.mrb[51].mxu1  ;;  %v3280_v8 = vsel %vm1846_vm2, %v14124_v12, -inf  ;;  %v14142_v24 = vpop.permute.xlu0 %4449 }
 0x2a9   : > { %16008 = vst [vmem:[#allocation59_spill] sm:$0xff] %v14142_v24 }
 0x2ac   : > { %3281 = vmax.xlane.f32.xlu0 %v3280_v8 }
 0x2ae   : > { %v14132_v30 = vpop.f32.mrb[36].mxu0 }
 0x2af   : > { %v14134_v21 = vpop.f32.mrb[52].mxu1  ;;  %v3283_v3 = vsel %vm1846_vm2, %v14132_v30, -inf  ;;  %v12226_v58 = vpop.f32.mrb[37].mxu0 }
 0x2b0   : > { %3284 = vmax.xlane.f32.xlu1 %v3283_v3  ;;  %v3286_v62 = vsel %vm1846_vm2, %v14134_v21, -inf  ;;  %v12231_v6 = vpop.f32.mrb[53].mxu1 }
 0x2b1   : > { %3287 = vmax.xlane.f32.xlu0 %v3286_v62  ;;  %v1849_v57 = vpop.xlane.xlu1 %1848 }
 0x2b2   : > { %v1895_v50 = vsub.f32 %v14032_v28, %v1849_v57 }
 0x2b4   : > { %v1911_v62 = vmul.f32 1.442695, %v1895_v50 }
 0x2b5   : > { %v1852_v8 = vpop.xlane.xlu0 %1851 }
 0x2b6   : > { %v14144_v61 = vpop.f32.mrb[38].mxu0  ;;  %v1896_v3 = vsub.f32 %v14036_v31, %v1852_v8  ;;  %12900 = vpow2.f32 %v1911_v62 }
 0x2b7   : > { %v14147_v44 = vpop.f32.mrb[54].mxu1  ;;  %v3289_v58 = vsel %vm1846_vm2, %v14144_v61, -inf  ;;  %v12236_v46 = vpop.f32.mrb[39].mxu0 }
 0x2b8   : > { %3290 = vmax.xlane.f32.xlu1 %v3289_v58  ;;  %v3292_v6 = vsel %vm1846_vm2, %v14147_v44, -inf  ;;  %v12241_v24 = vpop.f32.mrb[55].mxu1  ;;  %v1913_v48 = vmul.f32 1.442695, %v1896_v3 }
 0x2b9   : > { %3293 = vmax.xlane.f32.xlu0 %v3292_v6 }
 0x2ba   : > { %12902 = vpow2.f32 %v1913_v48 }
 0x2be   : > { %v14154_v38 = vpop.f32.mrb[40].mxu0 }
 0x2bf   : > { %v14156_v57 = vpop.f32.mrb[56].mxu1  ;;  %v3295_v28 = vsel %vm1846_vm2, %v14154_v38, -inf  ;;  %v12246_v42 = vpop.f32.mrb[41].mxu0 }
 0x2c0   : > { %3296 = vmax.xlane.f32.xlu1 %v3295_v28  ;;  %v3298_v46 = vsel %vm1846_vm2, %v14156_v57, -inf  ;;  %v12251_v31 = vpop.f32.mrb[57].mxu1  ;;  %v14168_v3 = vpop.eup %12900 }
 0x2c1   : > { %3299 = vmax.xlane.f32.xlu0 %v3298_v46  ;;  %16009 = vst [vmem:[#allocation60_spill] sm:$0xff] %v14168_v3  ;;  %v1943_v31 = vsel %vm1846_vm2, %v14168_v3, 0.0 }
 0x2c4   : > { %v14172_v6 = vpop.eup %12902 }
 0x2c5   : > { %16010 = vst [vmem:[#allocation61_spill] sm:$0xff] %v14172_v6 }
 0x2c7   : > { %v14162_v24 = vpop.f32.mrb[42].mxu0 }
 0x2c8   : > { %v14164_v50 = vpop.f32.mrb[58].mxu1  ;;  %v3301_v8 = vsel %vm1846_vm2, %v14162_v24, -inf  ;;  %v12256_v58 = vpop.f32.mrb[43].mxu0 }
 0x2c9   : > { %3302 = vmax.xlane.f32.xlu1 %v3301_v8  ;;  %v3304_v42 = vsel %vm1846_vm2, %v14164_v50, -inf  ;;  %v12261_v48 = vpop.f32.mrb[59].mxu1  ;;  %v1946_v8 = vsel %vm1846_vm2, %v14172_v6, 0.0 }
 0x2ca   : > { %3305 = vmax.xlane.f32.xlu0 %v3304_v42 }
 0x2cb   : > { %v14174_v62 = vpop.f32.mrb[44].mxu0 }
 0x2cc   : > { %v12266_v28 = vpop.f32.mrb[45].mxu0  ;;  %v14176_v46 = vpop.f32.mrb[60].mxu1  ;;  %v3307_v48 = vsel %vm1846_vm2, %v14174_v62, -inf }
 0x2cd   : > { %v12271_v36 = vpop.f32.mrb[61].mxu1  ;;  %1944 = vadd.xlane.f32.xlu1 %v1943_v31  ;;  %v3310_v28 = vsel %vm1846_vm2, %v14176_v46, -inf }
 0x2ce   : > { %1947 = vadd.xlane.f32.xlu0 %v1946_v8  ;;  %v1858_v8 = vpop.xlane.xlu0 %1857 }
 0x2cf   : > { %v14182_v58 = vpop.f32.mrb[46].mxu0 }
 0x2d0   : > { %v14186_v42 = vpop.f32.mrb[62].mxu1  ;;  %v12276_v40 = vpop.f32.mrb[47].mxu0  ;;  %v3313_v31 = vsel %vm1846_vm2, %v14182_v58, -inf }
 0x2d1   : > { %3308 = vmax.xlane.f32.xlu1 %v3307_v48  ;;  %v12281_v9 = vpop.f32.mrb[63].mxu1  ;;  %v3316_v36 = vsel %vm1846_vm2, %v14186_v42, -inf  ;;  %v1855_v40 = vpop.xlane.xlu1 %1854 }
 0x2d2   : > { %3311 = vmax.xlane.f32.xlu0 %v3310_v28  ;;  %v1897_v9 = vsub.f32 %v14040_v34, %v1855_v40  ;;  %v1898_v28 = vsub.f32 %v14044_v25, %v1858_v8  ;;  %v1864_v6 = vpop.xlane.xlu0 %1863 }
 0x2d4   : > { %v1915_v13 = vmul.f32 1.442695, %v1897_v9 }
 0x2d5   : > { %3314 = vmax.xlane.f32.xlu1 %v3313_v31  ;;  %v1861_v48 = vpop.xlane.xlu1 %1860  ;;  %v1917_v31 = vmul.f32 1.442695, %v1898_v28 }
 0x2d6   : > { %3317 = vmax.xlane.f32.xlu0 %v3316_v36  ;;  %v1899_v7 = vsub.f32 %v14048_v23, %v1861_v48  ;;  %v1900_v36 = vsub.f32 %v14052_v29, %v1864_v6  ;;  %v1870_v11 = vpop.xlane.xlu0 %1869  ;;  %12904 = vpow2.f32 %v1915_v13 }
 0x2d7   : > { %12906 = vpow2.f32 %v1917_v31  ;;  %v1902_v34 = vsub.f32 %v14060_v26, %v1870_v11 }
 0x2d8   : > { %v1919_v1 = vmul.f32 1.442695, %v1899_v7  ;;  %v1921_v5 = vmul.f32 1.442695, %v1900_v36 }
 0x2d9   : > { %v1867_v3 = vpop.xlane.xlu1 %1866  ;;  %v1925_v23 = vmul.f32 1.442695, %v1902_v34 }
 0x2da   : > { %v1876_v40 = vpop.xlane.xlu0 %1875  ;;  %12908 = vpow2.f32 %v1919_v1 }
 0x2db   : > { %12910 = vpow2.f32 %v1921_v5  ;;  %v1904_v29 = vsub.f32 %v14068_v0, %v1876_v40 }
 0x2de   : > { %v1882_v6 = vpop.xlane.xlu0 %1881 }
 0x2e0   : > { %v14208_v26 = vpop.eup %12904 }
 0x2e1   : > { %v14210_v1 = vpop.eup %12906 }
 0x2e6   : > { %4526 = vrot.lane.b32.xlu1 %v13877_v19, %s13339_s21  ;;  %v1873_v19 = vpop.xlane.xlu1 %1872 }
 0x2e7   : > { %v1903_v9 = vsub.f32 %v14064_v27, %v1873_v19  ;;  %v1949_v19 = vsel %vm1846_vm2, %v14208_v26, 0.0  ;;  %v14215_v27 = vpop.eup %12908 }
 0x2e9   : > { %v1927_v13 = vmul.f32 1.442695, %v1903_v9 }
 0x2ea   : > { %v1879_v25 = vpop.xlane.xlu1 %1878 }
 0x2eb   : > { %v1905_v7 = vsub.f32 %v14072_v16, %v1879_v25  ;;  %v14219_v16 = vpop.eup %12910 }
 0x2ec   : > { %4603 = vrot.lane.b32.xlu0 %v13871_v18, %s13339_s21  ;;  %v1901_v18 = vsub.f32 %v14056_v33, %v1867_v3  ;;  %v1929_v33 = vmul.f32 1.442695, %v1904_v29  ;;  %v1906_v3 = vsub.f32 %v14076_v14, %v1882_v6  ;;  %v1952_v14 = vsel %vm1846_vm2, %v14210_v1, 0.0 }
 0x2ed   : > { %v1958_v31 = vsel %vm1846_vm2, %v14219_v16, 0.0 }
 0x2ee   : > { %v1923_v8 = vmul.f32 1.442695, %v1901_v18  ;;  %v1885_v11 = vpop.xlane.xlu1 %1884  ;;  %v1931_v18 = vmul.f32 1.442695, %v1905_v7  ;;  %v1933_v0 = vmul.f32 1.442695, %v1906_v3 }
 0x2ef   : > { %v1907_v5 = vsub.f32 %v14078_v17, %v1885_v11  ;;  %v1955_v17 = vsel %vm1846_vm2, %v14215_v27, 0.0 }
 0x2f0   : > { %12912 = vpow2.f32 %v1923_v8 }
 0x2f1   : > { %12914 = vpow2.f32 %v1925_v23  ;;  %v1935_v48 = vmul.f32 1.442695, %v1907_v5 }
 0x2f2   : > { %12916 = vpow2.f32 %v1927_v13 }
 0x2f3   : > { %12918 = vpow2.f32 %v1929_v33  ;;  %v14249_v33 = vpop.xlane.xlu0 %1887 }
 0x2f4   : > { %12920 = vpow2.f32 %v1931_v18 }
 0x2f5   : > { %12922 = vpow2.f32 %v1933_v0 }
 0x2f6   : > { %12924 = vpow2.f32 %v1935_v48 }
 0x2f7   : > { %v14255_v18 = vpop.xlane.xlu0 %1893 }
 0x2fa   : > { %v14223_v28 = vpop.eup %12912 }
 0x2fb   : > { %v14227_v36 = vpop.eup %12914  ;;  %v1961_v34 = vsel %vm1846_vm2, %v14223_v28, 0.0 }
 0x2fc   : > { %16011 = vst [vmem:[#allocation62_spill] sm:$0xff] %v14227_v36  ;;  %v14231_v40 = vpop.eup %12916  ;;  %v1964_v25 = vsel %vm1846_vm2, %v14227_v36, 0.0  ;;  %v16046_v36 = vld [vmem:[#allocation43_spill] sm:$0xff] }
 0x2fd   : > { %16012 = vst [vmem:[#allocation63_spill] sm:$0xff] %v14231_v40  ;;  %v14235_v8 = vpop.eup %12918  ;;  %v1967_v9 = vsel %vm1846_vm2, %v14231_v40, 0.0  ;;  %v16045_v40 = vld [vmem:[#allocation49_spill] sm:$0xff] }
 0x2fe   : > { %16013 = vst [vmem:[#allocation64_spill] sm:$0xff] %v14235_v8  ;;  %v14239_v23 = vpop.eup %12920  ;;  %v1970_v29 = vsel %vm1846_vm2, %v14235_v8, 0.0  ;;  %v16044_v8 = vld [vmem:[#allocation34_spill] sm:$0xff] }
 0x2ff   : > { %16014 = vst [vmem:[#allocation65_spill] sm:$0xff] %v14239_v23  ;;  %v14243_v6 = vpop.eup %12922  ;;  %v1973_v13 = vsel %vm1846_vm2, %v14239_v23, 0.0 }
 0x300   : > { %16015 = vst [vmem:[#allocation66_spill] sm:$0xff] %v14243_v6  ;;  %v14247_v7 = vpop.eup %12924  ;;  %v1976_v3 = vsel %vm1846_vm2, %v14243_v6, 0.0 }
 0x301   : > { %16016 = vst [vmem:[#allocation67_spill] sm:$0xff] %v14247_v7  ;;  %v1979_v11 = vsel %vm1846_vm2, %v14247_v7, 0.0  ;;  %v16040_v7 = vld [vmem:[#allocation30_spill] sm:$0xff] }
 0x30a   : > { %1950 = vadd.xlane.f32.xlu1 %v1949_v19 }
 0x30b   : > { %1953 = vadd.xlane.f32.xlu0 %v1952_v14  ;;  %v14258_v14 = vpop.xlane.xlu1 %1890 }
 0x30e   : > { %1956 = vadd.xlane.f32.xlu1 %v1955_v17 }
 0x30f   : > { %1959 = vadd.xlane.f32.xlu0 %v1958_v31 }
 0x312   : > { %1962 = vadd.xlane.f32.xlu1 %v1961_v34 }
 0x313   : > { %1965 = vadd.xlane.f32.xlu0 %v1964_v25 }
 0x316   : > { %1968 = vadd.xlane.f32.xlu1 %v1967_v9 }
 0x317   : > { %1971 = vadd.xlane.f32.xlu0 %v1970_v29 }
 0x31a   : > { %1974 = vadd.xlane.f32.xlu1 %v1973_v13 }
 0x31b   : > { %1977 = vadd.xlane.f32.xlu0 %v1976_v3 }
 0x31e   : > { %1980 = vadd.xlane.f32.xlu1 %v1979_v11 }
 0x324   : > { %v3273_v5 = vpop.xlane.xlu0 %3272 }
 0x325   : > { %v3319_v0 = vsub.f32 %v14100_v22, %v3273_v5 }
 0x327   : > { %v3335_v19 = vmul.f32 1.442695, %v3319_v0 }
 0x329   : > { %12926 = vpow2.f32 %v3335_v19 }
 0x330   : > { %v3276_v48 = vpop.xlane.xlu1 %3275 }
 0x331   : > { %v3320_v17 = vsub.f32 %v14112_v32, %v3276_v48 }
 0x333   : > { %v14261_v31 = vpop.eup %12926  ;;  %v3337_v34 = vmul.f32 1.442695, %v3320_v17 }
 0x334   : > { %v3367_v25 = vsel %vm1846_vm2, %v14261_v31, 0.0 }
 0x335   : > { %12928 = vpow2.f32 %v3337_v34  ;;  %v3279_v9 = vpop.xlane.xlu0 %3278  ;;  %3368 = vadd.xlane.f32.xlu1 %v3367_v25 }
 0x336   : > { %v3321_v29 = vsub.f32 %v14120_v2, %v3279_v9 }
 0x338   : > { %v3339_v13 = vmul.f32 1.442695, %v3321_v29 }
 0x339   : > { %v3282_v22 = vpop.xlane.xlu0 %3281 }
 0x33a   : > { %12930 = vpow2.f32 %v3339_v13  ;;  %v3322_v3 = vsub.f32 %v14124_v12, %v3282_v22 }
 0x33c   : > { %v3341_v11 = vmul.f32 1.442695, %v3322_v3 }
 0x33d   : > { %v3285_v5 = vpop.xlane.xlu1 %3284 }
 0x33e   : > { %12932 = vpow2.f32 %v3341_v11  ;;  %v3323_v32 = vsub.f32 %v14132_v30, %v3285_v5  ;;  %v3288_v0 = vpop.xlane.xlu0 %3287 }
 0x33f   : > { %v14268_v19 = vpop.eup %12928  ;;  %v3324_v48 = vsub.f32 %v14134_v21, %v3288_v0 }
 0x340   : > { %v3343_v17 = vmul.f32 1.442695, %v3323_v32  ;;  %v3370_v34 = vsel %vm1846_vm2, %v14268_v19, 0.0 }
 0x341   : > { %v3345_v2 = vmul.f32 1.442695, %v3324_v48  ;;  %3371 = vadd.xlane.f32.xlu0 %v3370_v34 }
 0x342   : > { %12934 = vpow2.f32 %v3343_v17 }
 0x343   : > { %12936 = vpow2.f32 %v3345_v2 }
 0x344   : > { %v14273_v25 = vpop.eup %12930 }
 0x345   : > { %v3291_v12 = vpop.xlane.xlu1 %3290  ;;  %v3373_v9 = vsel %vm1846_vm2, %v14273_v25, 0.0 }
 0x346   : > { %v3325_v30 = vsub.f32 %v14144_v61, %v3291_v12  ;;  %v3294_v29 = vpop.xlane.xlu0 %3293  ;;  %3374 = vadd.xlane.f32.xlu1 %v3373_v9 }
 0x347   : > { %v3326_v21 = vsub.f32 %v14147_v44, %v3294_v29 }
 0x348   : > { %v14279_v13 = vpop.eup %12932  ;;  %v3347_v22 = vmul.f32 1.442695, %v3325_v30 }
 0x349   : > { %v3349_v3 = vmul.f32 1.442695, %v3326_v21  ;;  %v3376_v11 = vsel %vm1846_vm2, %v14279_v13, 0.0 }
 0x34a   : > { %12938 = vpow2.f32 %v3347_v22  ;;  %3377 = vadd.xlane.f32.xlu0 %v3376_v11 }
 0x34b   : > { %12940 = vpow2.f32 %v3349_v3 }
 0x34c   : > { %v14283_v5 = vpop.eup %12934 }
 0x34d   : > { %v14285_v32 = vpop.eup %12936  ;;  %v3297_v0 = vpop.xlane.xlu1 %3296  ;;  %v3379_v61 = vsel %vm1846_vm2, %v14283_v5, 0.0 }
 0x34e   : > { %v3327_v44 = vsub.f32 %v14154_v38, %v3297_v0  ;;  %v3300_v48 = vpop.xlane.xlu0 %3299  ;;  %3380 = vadd.xlane.f32.xlu1 %v3379_v61  ;;  %v3382_v17 = vsel %vm1846_vm2, %v14285_v32, 0.0 }
 0x34f   : > { %v3328_v34 = vsub.f32 %v14156_v57, %v3300_v48  ;;  %3383 = vadd.xlane.f32.xlu0 %v3382_v17 }
 0x350   : > { %v3351_v2 = vmul.f32 1.442695, %v3327_v44 }
 0x351   : > { %v3353_v12 = vmul.f32 1.442695, %v3328_v34 }
 0x352   : > { %12942 = vpow2.f32 %v3351_v2 }
 0x353   : > { %12944 = vpow2.f32 %v3353_v12 }
 0x354   : > { %v14293_v9 = vpop.eup %12938 }
 0x355   : > { %v14295_v30 = vpop.eup %12940  ;;  %v3385_v29 = vsel %vm1846_vm2, %v14293_v9, 0.0 }
 0x356   : > { %v3303_v38 = vpop.xlane.xlu1 %3302  ;;  %3386 = vadd.xlane.f32.xlu1 %v3385_v29  ;;  %v3388_v21 = vsel %vm1846_vm2, %v14295_v30, 0.0 }
 0x357   : > { %v3329_v22 = vsub.f32 %v14162_v24, %v3303_v38  ;;  %v3306_v57 = vpop.xlane.xlu0 %3305  ;;  %3389 = vadd.xlane.f32.xlu0 %v3388_v21  ;;  %v1909_v38 = vsub.f32 %v14086_v15, %v14258_v14  ;;  %v1910_v14 = vsub.f32 %v14092_v10, %v14255_v18 }
 0x358   : > { %v3330_v3 = vsub.f32 %v14164_v50, %v3306_v57 }
 0x359   : > { %v3355_v11 = vmul.f32 1.442695, %v3329_v22  ;;  %v1908_v22 = vsub.f32 %v14084_v20, %v14249_v33 }
 0x35a   : > { %v3357_v0 = vmul.f32 1.442695, %v3330_v3  ;;  %v14303_v61 = vpop.xlane.xlu1 %1944 }
 0x35b   : > { %12946 = vpow2.f32 %v3355_v11  ;;  %v14305_v44 = vpop.xlane.xlu0 %1947  ;;  %v1937_v15 = vmul.f32 1.442695, %v1908_v22 }
 0x35c   : > { %v14307_v48 = vpop.eup %12942  ;;  %12948 = vpow2.f32 %v3357_v0 }
 0x35d   : > { %v14309_v17 = vpop.eup %12944  ;;  %v3391_v34 = vsel %vm1846_vm2, %v14307_v48, 0.0 }
 0x35e   : > { %v3309_v24 = vpop.xlane.xlu1 %3308  ;;  %3392 = vadd.xlane.f32.xlu1 %v3391_v34  ;;  %v3394_v50 = vsel %vm1846_vm2, %v14309_v17, 0.0 }
 0x35f   : > { %v3331_v2 = vsub.f32 %v14174_v62, %v3309_v24  ;;  %v3312_v12 = vpop.xlane.xlu0 %3311  ;;  %3395 = vadd.xlane.f32.xlu0 %v3394_v50  ;;  %v1939_v24 = vmul.f32 1.442695, %v1909_v38 }
 0x360   : > { %v3332_v29 = vsub.f32 %v14176_v46, %v3312_v12 }
 0x361   : > { %v3359_v21 = vmul.f32 1.442695, %v3331_v2 }
 0x362   : > { %v3361_v57 = vmul.f32 1.442695, %v3332_v29  ;;  %v3315_v3 = vpop.xlane.xlu1 %3314 }
 0x363   : > { %12950 = vpow2.f32 %v3359_v21  ;;  %v3333_v11 = vsub.f32 %v14182_v58, %v3315_v3  ;;  %v3318_v0 = vpop.xlane.xlu0 %3317 }
 0x364   : > { %12952 = vpow2.f32 %v3361_v57  ;;  %v3334_v62 = vsub.f32 %v14186_v42, %v3318_v0  ;;  %v1941_v42 = vmul.f32 1.442695, %v1910_v14 }
 0x365   : > { %v14323_v34 = vpop.eup %12946  ;;  %v3363_v46 = vmul.f32 1.442695, %v3333_v11 }
 0x366   : > { %v14325_v50 = vpop.eup %12948  ;;  %v3365_v20 = vmul.f32 1.442695, %v3334_v62  ;;  %v3397_v33 = vsel %vm1846_vm2, %v14323_v34, 0.0 }
 0x367   : > { %12954 = vpow2.f32 %v3363_v46  ;;  %3398 = vadd.xlane.f32.xlu1 %v3397_v33  ;;  %v3400_v58 = vsel %vm1846_vm2, %v14325_v50, 0.0  ;;  %v14377_v46 = vpop.permute.xlu1 %4526  ;;  %v14403_v33 = vpop.permute.xlu0 %4603 }
 0x368   : > { %12956 = vpow2.f32 %v3365_v20  ;;  %3401 = vadd.xlane.f32.xlu0 %v3400_v58  ;;  %v16020_v58 = vld [vmem:[#allocation33_spill] sm:$0xff] }
 0x369   : > { %12958 = vpow2.f32 %v1939_v24 }
 0x36a   : > { %12960 = vpow2.f32 %v1937_v15 }
 0x36b   : > { %12962 = vpow2.f32 %v1941_v42 }
 0x36d   : > { %v14333_v2 = vpop.eup %12950 }
 0x36e   : > { %v14335_v12 = vpop.eup %12952  ;;  %v3403_v10 = vsel %vm1846_vm2, %v14333_v2, 0.0 }
 0x36f   : > { %3404 = vadd.xlane.f32.xlu1 %v3403_v10  ;;  %v3406_v18 = vsel %vm1846_vm2, %v14335_v12, 0.0 }
 0x370   : > { %3407 = vadd.xlane.f32.xlu0 %v3406_v18  ;;  %v16021_v18 = vld [vmem:[#allocation29_spill] sm:$0xff] }
 0x371   : > { %v14341_v29 = vpop.eup %12954 }
 0x372   : > { %v14343_v38 = vpop.eup %12956  ;;  %v3409_v21 = vsel %vm1846_vm2, %v14341_v29, 0.0 }
 0x373   : > { %v14347_v22 = vpop.eup %12958  ;;  %3410 = vadd.xlane.f32.xlu1 %v3409_v21  ;;  %v3412_v57 = vsel %vm1846_vm2, %v14343_v38, 0.0  ;;  %v16022_v21 = vld [vmem:[#allocation39_spill] sm:$0xff] }
 0x374   : > { %16017 = vst [vmem:[#allocation68_spill] sm:$0xff] %v14347_v22  ;;  %v14351_v3 = vpop.eup %12960  ;;  %3413 = vadd.xlane.f32.xlu0 %v3412_v57  ;;  %v1985_v11 = vsel %vm1846_vm2, %v14347_v22, 0.0  ;;  %v16023_v57 = vld [vmem:[#allocation35_spill] sm:$0xff]  ;;  %v16038_v22 = vmov 0.0  }
 0x375   : > { %16018 = vst [vmem:[#allocation69_spill] sm:$0xff] %v14351_v3  ;;  %v1982_v0 = vsel %vm1846_vm2, %v14351_v3, 0.0  ;;  %v14357_v62 = vpop.eup %12962 }
 0x376   : > { %16019 = vst [vmem:[#allocation70_spill] sm:$0xff] %v14357_v62  ;;  %v1988_v24 = vsel %vm1846_vm2, %v14357_v62, 0.0 }
 0x377   : > { %1986 = vadd.xlane.f32.xlu1 %v1985_v11 }
 0x378   : > { %1983 = vadd.xlane.f32.xlu0 %v1982_v0 }
 0x37c   : > { %1989 = vadd.xlane.f32.xlu0 %v1988_v24  ;;  %v16024_v24 = vld [vmem:[#allocation41_spill] sm:$0xff] }
 0x388   : > { %5849 = vrot.lane.b32.xlu1 %v13638_v35, %s13340_s23 }
 0x38c   : > { %5847 = vrot.lane.b32.xlu1 %v13644_v37, %s13340_s23 }
 0x390   : > { %5925 = vrot.lane.b32.xlu1 %v13663_v41, %s13340_s23 }
 0x392   : > { %5927 = vrot.lane.b32.xlu0 %v13653_v39, %s13340_s23 }
 0x394   : > { %6083 = vrot.lane.b32.xlu1 %v13691_v47, %s13340_s23 }
 0x396   : > { %6005 = vrot.lane.b32.xlu0 %v13672_v43, %s13340_s23 }
 0x397   : > { %v14383_v15 = vpop.xlane.xlu1 %1950 }
 0x398   : > { %6081 = vrot.lane.b32.xlu1 %v13701_v49, %s13340_s23  ;;  %v14409_v42 = vpop.xlane.xlu0 %1953 }
 0x39a   : > { %6003 = vrot.lane.b32.xlu0 %v13682_v45, %s13340_s23 }
 0x39b   : > { %v14391_v14 = vpop.xlane.xlu1 %1956 }
 0x39c   : > { %6239 = vrot.lane.b32.xlu1 %v13725_v53, %s13340_s23  ;;  %v14419_v11 = vpop.xlane.xlu0 %1959 }
 0x39e   : > { %6161 = vrot.lane.b32.xlu0 %v13710_v51, %s13340_s23 }
 0x39f   : > { %v14399_v20 = vpop.xlane.xlu1 %1962 }
 0x3a0   : > { %6237 = vrot.lane.b32.xlu1 %v13733_v54, %s13340_s23 }
 0x3a2   : > { %6159 = vrot.lane.b32.xlu0 %v13718_v52, %s13340_s23 }
 0x3a3   : > { %v14411_v10 = vpop.xlane.xlu1 %1968 }
 0x3a4   : > { %6395 = vrot.lane.b32.xlu1 %v13759_v59, %s13340_s23  ;;  %v16035_v59 = vld [vmem:[#allocation22_spill] sm:$0xff] }
 0x3a6   : > { %6317 = vrot.lane.b32.xlu0 %v13740_v55, %s13340_s23  ;;  %v16032_v55 = vld [vmem:[#allocation19_spill] sm:$0xff] }
 0x3a7   : > { %v14421_v0 = vpop.xlane.xlu1 %1974 }
 0x3a8   : > { %6393 = vrot.lane.b32.xlu1 %v13767_v60, %s13340_s23 }
 0x3aa   : > { %6315 = vrot.lane.b32.xlu0 %v13748_v56, %s13340_s23  ;;  %v16029_v56 = vld [vmem:[#allocation13_spill] sm:$0xff] }
 0x3ac   : > { %6551 = vrot.lane.b32.xlu1 %v13797_v4, %s13340_s23  ;;  %v14431_v4 = vpop.xlane.xlu1 %1980 }
 0x3ae   : > { %6473 = vrot.lane.b32.xlu0 %v13778_v63, %s13340_s23  ;;  %v16025_v63 = vld [vmem:[#allocation37_spill] sm:$0xff] }
 0x3b0   : > { %6549 = vrot.lane.b32.xlu1 %v16020_v58, %s13340_s23  ;;  %v16026_v58 = vld [vmem:[#allocation14_spill] sm:$0xff] }
 0x3b2   : > { %6471 = vrot.lane.b32.xlu0 %v16021_v18, %s13340_s23  ;;  %v14429_v18 = vpop.xlane.xlu0 %1965 }
 0x3b4   : > { %6707 = vrot.lane.b32.xlu1 %v16022_v21, %s13340_s23  ;;  %v16027_v21 = vld [vmem:[#allocation12_spill] sm:$0xff] }
 0x3b6   : > { %6629 = vrot.lane.b32.xlu0 %v16023_v57, %s13340_s23  ;;  %v16028_v57 = vld [vmem:[#allocation15_spill] sm:$0xff]  ;;  %v14439_v60 = vpop.xlane.xlu0 %1971 }
 0x3b8   : > { %6705 = vrot.lane.b32.xlu1 %v16024_v24, %s13340_s23 }
 0x3ba   : > { %6627 = vrot.lane.b32.xlu0 %v16025_v63, %s13340_s23  ;;  %v16030_v63 = vld [vmem:[#allocation18_spill] sm:$0xff] }
 0x3bc   : > { %6863 = vrot.lane.b32.xlu1 %v16026_v58, %s13340_s23  ;;  %v16031_v58 = vld [vmem:[#allocation16_spill] sm:$0xff] }
 0x3be   : > { %6785 = vrot.lane.b32.xlu0 %v16027_v21, %s13340_s23  ;;  %v14447_v21 = vpop.xlane.xlu0 %1977 }
 0x3c0   : > { %6861 = vrot.lane.b32.xlu1 %v16028_v57, %s13340_s23  ;;  %v16033_v57 = vld [vmem:[#allocation17_spill] sm:$0xff] }
 0x3c2   : > { %6783 = vrot.lane.b32.xlu0 %v16029_v56, %s13340_s23  ;;  %v3369_v24 = vpop.xlane.xlu1 %3368  ;;  %v16034_v56 = vld [vmem:[#allocation23_spill] sm:$0xff] }
 0x3c3   : > { %12964 = vrcp.f32 %v3369_v24 }
 0x3c4   : > { %7019 = vrot.lane.b32.xlu1 %v16030_v63, %s13340_s23 }
 0x3c6   : > { %6941 = vrot.lane.b32.xlu0 %v16031_v58, %s13340_s23  ;;  %v16036_v58 = vld [vmem:[#allocation26_spill] sm:$0xff] }
 0x3c8   : > { %7017 = vrot.lane.b32.xlu1 %v16032_v55, %s13340_s23  ;;  %v16037_v55 = vld [vmem:[#allocation48_spill] sm:$0xff] }
 0x3ca   : > { %6939 = vrot.lane.b32.xlu0 %v16033_v57, %s13340_s23  ;;  %v16039_v57 = vld [vmem:[#allocation27_spill] sm:$0xff] }
 0x3cc   : > { %7271 = vrot.lane.b32.xlu1 %v16034_v56, %s13340_s23 }
 0x3cd   : > { %v12965_v24 = vpop.eup %12964 }
 0x3ce   : > { %7347 = vrot.lane.b32.xlu0 %v16035_v59, %s13340_s23  ;;  %v3372_v62 = vpop.xlane.xlu0 %3371  ;;  %v3431_v63 = vmul.f32 %v12965_v24, %v14261_v31  ;;  %v16041_v31 = vld [vmem:[#allocation31_spill] sm:$0xff]  ;;  %v16043_v24 = vld [vmem:[#allocation40_spill] sm:$0xff] }
 0x3cf   : > { %12966 = vrcp.f32 %v3372_v62 }
 0x3d0   : > { %7499 = vrot.lane.b32.xlu1 %v16036_v58, %s13340_s23  ;;  %12285 = vmatmul.mubr.msk.f32.vlgmr.msra.gmra.mrb[48].mxu0 %vm1846_vm2, %v3431_v63 }
 0x3d1   : > { %12293 = vmatpush3.msra.mxu0 %v16037_v55  ;;  %12294 = vmatprep.mubr.msk.f32.mxu0 %vm13338_vm1, %v16038_v22  ;;  %v16042_v55 = vld [vmem:[#allocation36_spill] sm:$0xff] }
 0x3d2   : > { %7423 = vrot.lane.b32.xlu0 %v16039_v57, %s13340_s23  ;;  %12302 = vmatprep.subr.mxu0 %v16038_v22 }
 0x3d3   : > { %v3375_v3 = vpop.xlane.xlu1 %3374 }
 0x3d4   : > { %7651 = vrot.lane.b32.xlu1 %v16040_v7, %s13340_s23  ;;  %12968 = vrcp.f32 %v3375_v3 }
 0x3d6   : > { %7575 = vrot.lane.b32.xlu0 %v16041_v31, %s13340_s23 }
 0x3d7   : > { %v3378_v62 = vpop.xlane.xlu0 %3377 }
 0x3d8   : > { %12970 = vrcp.f32 %v3378_v62  ;;  %7727 = vrot.lane.b32.xlu1 %v16042_v55, %s13340_s23 }
 0x3d9   : > { %v12967_v63 = vpop.eup %12966 }
 0x3da   : > { %7879 = vrot.lane.b32.xlu0 %v16043_v24, %s13340_s23  ;;  %v3432_v6 = vmul.f32 %v12967_v63, %v14268_v19  ;;  %v16047_v63 = vld [vmem:[#allocation38_spill] sm:$0xff] }
 0x3db   : > { %v3381_v23 = vpop.xlane.xlu1 %3380 }
 0x3dc   : > { %7803 = vrot.lane.b32.xlu1 %v16044_v8, %s13340_s23  ;;  %12972 = vrcp.f32 %v3381_v23  ;;  %12290 = vmatmul.mubr.msk.f32.vlgmr.msra.gmra.mrb[64].mxu1 %vm1846_vm2, %v3432_v6  ;;  %v3384_v3 = vpop.xlane.xlu0 %3383  ;;  %v16049_v6 = vld [vmem:[#allocation50_spill] sm:$0xff] }
 0x3dd   : > { %12298 = vmatpush3.msra.mxu1 %v16045_v40  ;;  %12974 = vrcp.f32 %v3384_v3  ;;  %12299 = vmatprep.mubr.msk.f32.mxu1 %vm13338_vm1, %v16038_v22  ;;  %v16048_v40 = vld [vmem:[#allocation45_spill] sm:$0xff] }
 0x3de   : > { %v12969_v62 = vpop.eup %12968  ;;  %8031 = vrot.lane.b32.xlu0 %v16046_v36, %s13340_s23  ;;  %12307 = vmatprep.subr.mxu1 %v16038_v22 }
 0x3df   : > { %v3433_v19 = vmul.f32 %v12969_v62, %v14273_v25  ;;  %v16050_v25 = vld [vmem:[#allocation42_spill] sm:$0xff] }
 0x3e0   : > { %7955 = vrot.lane.b32.xlu1 %v16047_v63, %s13340_s23 }
 0x3e1   : > { %12295 = vmatmul.mubr.msk.f32.vlgmr.msra.gmra.mrb[50].mxu0 %vm1846_vm2, %v3433_v19 }
 0x3e2   : > { %v12971_v23 = vpop.eup %12970  ;;  %8183 = vrot.lane.b32.xlu0 %v16048_v40, %s13340_s23  ;;  %12303 = vmatpush3.msra.mxu0 %v16049_v6  ;;  %v16051_v40 = vld [vmem:[#allocation47_spill] sm:$0xff] }
 0x3e3   : > { %v3387_v3 = vpop.xlane.xlu1 %3386  ;;  %v3434_v24 = vmul.f32 %v12971_v23, %v14279_v13  ;;  %12304 = vmatprep.mubr.msk.f32.mxu0 %vm13338_vm1, %v16038_v22  ;;  %12312 = vmatprep.subr.mxu0 %v16038_v22  ;;  %v16052_v6 = vld [vmem:[#allocation51_spill] sm:$0xff] }
 0x3e4   : > { %8107 = vrot.lane.b32.xlu1 %v16050_v25, %s13340_s23  ;;  %12976 = vrcp.f32 %v3387_v3  ;;  %v3390_v62 = vpop.xlane.xlu0 %3389  ;;  %v16053_v3 = vld [vmem:[#allocation44_spill] sm:$0xff] }
 0x3e5   : > { %12978 = vrcp.f32 %v3390_v62  ;;  %12300 = vmatmul.mubr.msk.f32.vlgmr.msra.gmra.mrb[66].mxu1 %vm1846_vm2, %v3434_v24  ;;  %v16054_v24 = vld [vmem:[#allocation52_spill] sm:$0xff] }
 0x3e6   : > { %v12973_v19 = vpop.eup %12972  ;;  %8335 = vrot.lane.b32.xlu0 %v16051_v40, %s13340_s23  ;;  %12308 = vmatpush3.msra.mxu1 %v16052_v6  ;;  %v16056_v6 = vld [vmem:[#allocation46_spill] sm:$0xff] }
 0x3e7   : > { %v12975_v13 = vpop.eup %12974  ;;  %v3435_v23 = vmul.f32 %v12973_v19, %v14283_v5  ;;  %12309 = vmatprep.mubr.msk.f32.mxu1 %vm13338_vm1, %v16038_v22  ;;  %12317 = vmatprep.subr.mxu1 %v16038_v22  ;;  %v16055_v19 = vld [vmem:[#allocation53_spill] sm:$0xff] }
 0x3e8   : > { %8259 = vrot.lane.b32.xlu1 %v16053_v3, %s13340_s23  ;;  %v3436_v62 = vmul.f32 %v12975_v13, %v14285_v32 }
 0x3e9   : > { %12305 = vmatmul.mubr.msk.f32.vlgmr.msra.gmra.mrb[52].mxu0 %vm1846_vm2, %v3435_v23 }
 0x3ea   : > { %8505 = vrot.lane.b32.xlu0 %v13638_v35, %s13341_s7  ;;  %12313 = vmatpush3.msra.mxu0 %v16054_v24  ;;  %v16057_v24 = vld [vmem:[#allocation54_spill] sm:$0xff] }
 0x3eb   : > { %12310 = vmatmul.mubr.msk.f32.vlgmr.msra.gmra.mrb[68].mxu1 %vm1846_vm2, %v3436_v62  ;;  %v3393_v5 = vpop.xlane.xlu1 %3392  ;;  %12314 = vmatprep.mubr.msk.f32.mxu0 %vm13338_vm1, %v16038_v22 }
 0x3ec   : > { %12318 = vmatpush3.msra.mxu1 %v16055_v19  ;;  %8411 = vrot.lane.b32.xlu1 %v16056_v6, %s13340_s23  ;;  %12980 = vrcp.f32 %v3393_v5  ;;  %v3396_v32 = vpop.xlane.xlu0 %3395  ;;  %v16059_v19 = vld [vmem:[#allocation56_spill] sm:$0xff] }
 0x3ed   : > { %12982 = vrcp.f32 %v3396_v32  ;;  %12322 = vmatprep.subr.mxu0 %v16038_v22  ;;  %12319 = vmatprep.mubr.msk.f32.mxu1 %vm13338_vm1, %v16038_v22 }
 0x3ee   : > { %v12977_v35 = vpop.eup %12976  ;;  %8503 = vrot.lane.b32.xlu0 %v13644_v37, %s13341_s7  ;;  %12327 = vmatprep.subr.mxu1 %v16038_v22  ;;  %v16058_v37 = vld [vmem:[#allocation55_spill] sm:$0xff] }
 0x3ef   : > { %v12979_v13 = vpop.eup %12978  ;;  %v3437_v23 = vmul.f32 %v12977_v35, %v14293_v9 }
 0x3f0   : > { %8583 = vrot.lane.b32.xlu1 %v13653_v39, %s13341_s7  ;;  %v3438_v62 = vmul.f32 %v12979_v13, %v14295_v30 }
 0x3f1   : > { %12315 = vmatmul.mubr.msk.f32.vlgmr.msra.gmra.mrb[54].mxu0 %vm1846_vm2, %v3437_v23  ;;  %v16062_v23 = vld [vmem:[#allocation59_spill] sm:$0xff] }
 0x3f2   : > { %8661 = vrot.lane.b32.xlu0 %v13672_v43, %s13341_s7  ;;  %12323 = vmatpush3.msra.mxu0 %v16057_v24 }
 0x3f3   : > { %12320 = vmatmul.mubr.msk.f32.vlgmr.msra.gmra.mrb[70].mxu1 %vm1846_vm2, %v3438_v62  ;;  %12324 = vmatprep.mubr.msk.f32.mxu0 %vm13338_vm1, %v16038_v22 }
 0x3f4   : > { %12328 = vmatpush3.msra.mxu1 %v16058_v37  ;;  %8581 = vrot.lane.b32.xlu1 %v13663_v41, %s13341_s7  ;;  %v3399_v39 = vpop.xlane.xlu1 %3398 }
 0x3f5   : > { %12984 = vrcp.f32 %v3399_v39  ;;  %v3402_v9 = vpop.xlane.xlu0 %3401  ;;  %12332 = vmatprep.subr.mxu0 %v16038_v22  ;;  %12329 = vmatprep.mubr.msk.f32.mxu1 %vm13338_vm1, %v16038_v22 }
 0x3f6   : > { %v12981_v43 = vpop.eup %12980  ;;  %12986 = vrcp.f32 %v3402_v9  ;;  %8659 = vrot.lane.b32.xlu0 %v13682_v45, %s13341_s7  ;;  %12337 = vmatprep.subr.mxu1 %v16038_v22  ;;  %v16060_v45 = vld [vmem:[#allocation57_spill] sm:$0xff] }
 0x3f7   : > { %v12983_v30 = vpop.eup %12982  ;;  %v3439_v5 = vmul.f32 %v12981_v43, %v14307_v48 }
 0x3f8   : > { %8739 = vrot.lane.b32.xlu1 %v13691_v47, %s13341_s7  ;;  %v3440_v41 = vmul.f32 %v12983_v30, %v14309_v17 }
 0x3f9   : > { %12325 = vmatmul.mubr.msk.f32.vlgmr.msra.gmra.mrb[56].mxu0 %vm1846_vm2, %v3439_v5 }
 0x3fa   : > { %8817 = vrot.lane.b32.xlu0 %v13710_v51, %s13341_s7  ;;  %12333 = vmatpush3.msra.mxu0 %v16059_v19 }
 0x3fb   : > { %12330 = vmatmul.mubr.msk.f32.vlgmr.msra.gmra.mrb[72].mxu1 %vm1846_vm2, %v3440_v41  ;;  %12334 = vmatprep.mubr.msk.f32.mxu0 %vm13338_vm1, %v16038_v22 }
 0x3fc   : > { %12338 = vmatpush3.msra.mxu1 %v16060_v45  ;;  %8737 = vrot.lane.b32.xlu1 %v13701_v49, %s13341_s7  ;;  %v3405_v47 = vpop.xlane.xlu1 %3404 }
 0x3fd   : > { %12988 = vrcp.f32 %v3405_v47  ;;  %v3408_v48 = vpop.xlane.xlu0 %3407  ;;  %12342 = vmatprep.subr.mxu0 %v16038_v22  ;;  %12339 = vmatprep.mubr.msk.f32.mxu1 %vm13338_vm1, %v16038_v22 }
 0x3fe   : > { %12990 = vrcp.f32 %v3408_v48  ;;  %8815 = vrot.lane.b32.xlu0 %v13718_v52, %s13341_s7  ;;  %12347 = vmatprep.subr.mxu1 %v16038_v22  ;;  %v16061_v52 = vld [vmem:[#allocation58_spill] sm:$0xff] }
 0x3ff   : > { %v12985_v51 = vpop.eup %12984 }
 0x400   : > { %v12987_v17 = vpop.eup %12986  ;;  %8895 = vrot.lane.b32.xlu1 %v13725_v53, %s13341_s7  ;;  %v3411_v49 = vpop.xlane.xlu1 %3410  ;;  %v3441_v32 = vmul.f32 %v12985_v51, %v14323_v34 }
 0x401   : > { %12992 = vrcp.f32 %v3411_v49  ;;  %v3414_v35 = vpop.xlane.xlu0 %3413  ;;  %v3442_v13 = vmul.f32 %v12987_v17, %v14325_v50 }
 0x402   : > { %12994 = vrcp.f32 %v3414_v35  ;;  %12335 = vmatmul.mubr.msk.f32.vlgmr.msra.gmra.mrb[58].mxu0 %vm1846_vm2, %v3441_v32  ;;  %v16066_v32 = vld [vmem:[#allocation40_spill] sm:$0xff]  ;;  %v16067_v35 = vld [vmem:[#allocation63_spill] sm:$0xff] }
 0x403   : > { %12996 = vrcp.f32 %v14303_v61  ;;  %12343 = vmatpush3.msra.mxu0 %v16061_v52  ;;  %12340 = vmatmul.mubr.msk.f32.vlgmr.msra.gmra.mrb[74].mxu1 %vm1846_vm2, %v3442_v13 }
 0x404   : > { %12998 = vrcp.f32 %v14305_v44  ;;  %12348 = vmatpush3.msra.mxu1 %v16062_v23  ;;  %8893 = vrot.lane.b32.xlu1 %v13733_v54, %s13341_s7  ;;  %v14575_v53 = vpop.xlane.xlu1 %1986 }
 0x405   : > { %v14577_v34 = vpop.xlane.xlu0 %1983  ;;  %12344 = vmatprep.mubr.msk.f32.mxu0 %vm13338_vm1, %v16038_v22  ;;  %12352 = vmatprep.subr.mxu0 %v16038_v22  ;;  %13000 = vrcp.f32 %v14383_v15 }
 0x406   : > { %12349 = vmatprep.mubr.msk.f32.mxu1 %vm13338_vm1, %v16038_v22  ;;  %12357 = vmatprep.subr.mxu1 %v16038_v22  ;;  %13002 = vrcp.f32 %v14409_v42 }
 0x407   : > { %v12989_v61 = vpop.eup %12988  ;;  %13004 = vrcp.f32 %v14391_v14 }
 0x408   : > { %v12991_v44 = vpop.eup %12990  ;;  %v14587_v54 = vpop.permute.xlu1 %5849  ;;  %v3443_v50 = vmul.f32 %v12989_v61, %v14333_v2  ;;  %13006 = vrcp.f32 %v14419_v11 }
 0x409   : > { %v14590_v62 = vpop.xlane.xlu0 %1989  ;;  %v3444_v24 = vmul.f32 %v12991_v44, %v14335_v12  ;;  %13008 = vrcp.f32 %v14399_v20  ;;  %v16064_v20 = vld [vmem:[#allocation61_spill] sm:$0xff] }
 0x40a   : > { %12345 = vmatmul.mubr.msk.f32.vlgmr.msra.gmra.mrb[60].mxu0 %vm1846_vm2, %v3443_v50  ;;  %13010 = vrcp.f32 %v14429_v18  ;;  %v16069_v50 = vld [vmem:[#allocation65_spill] sm:$0xff] }
 0x40b   : > { %v12993_v37 = vpop.eup %12992  ;;  %12353 = vmatpush3.msra.mxu0 %v14377_v46  ;;  %12350 = vmatmul.mubr.msk.f32.vlgmr.msra.gmra.mrb[76].mxu1 %vm1846_vm2, %v3444_v24  ;;  %13012 = vrcp.f32 %v14411_v10 }
 0x40c   : > { %v12995_v15 = vpop.eup %12994  ;;  %12358 = vmatpush3.msra.mxu1 %v14403_v33  ;;  %v14599_v42 = vpop.permute.xlu1 %5847  ;;  %12354 = vmatprep.mubr.msk.f32.mxu0 %vm13338_vm1, %v16038_v22  ;;  %v3445_v2 = vmul.f32 %v12993_v37, %v14341_v29  ;;  %13014 = vrcp.f32 %v14439_v60 }
 0x40d   : > { %v12997_v12 = vpop.eup %12996  ;;  %v14604_v39 = vpop.permute.xlu0 %5927  ;;  %12362 = vmatprep.subr.mxu0 %v16038_v22  ;;  %12359 = vmatprep.mubr.msk.f32.mxu1 %vm13338_vm1, %v16038_v22  ;;  %v3446_v46 = vmul.f32 %v12995_v15, %v14343_v38  ;;  %v16063_v38 = vld [vmem:[#allocation60_spill] sm:$0xff]  ;;  %13016 = vrcp.f32 %v14421_v0  ;;  %v16070_v15 = vld [vmem:[#allocation66_spill] sm:$0xff] }
 0x40e   : > { %v12999_v14 = vpop.eup %12998  ;;  %12355 = vmatmul.mubr.msk.f32.vlgmr.msra.gmra.mrb[62].mxu0 %vm1846_vm2, %v3445_v2  ;;  %12367 = vmatprep.subr.mxu1 %v16038_v22  ;;  %v2007_v33 = vmul.f32 %v12997_v12, %v16063_v38  ;;  %13018 = vrcp.f32 %v14447_v21  ;;  %v16072_v38 = vld [vmem:[#allocation67_spill] sm:$0xff] }
 0x40f   : > { %12363 = vmatpush3.msra.mxu0 %v16034_v56  ;;  %12360 = vmatmul.mubr.msk.f32.vlgmr.msra.gmra.mrb[78].mxu1 %vm1846_vm2, %v3446_v46  ;;  %v13001_v11 = vpop.eup %13000  ;;  %v2008_v43 = vmul.f32 %v12999_v14, %v16064_v20  ;;  %13020 = vrcp.f32 %v14431_v4  ;;  %v16065_v4 = vld [vmem:[#allocation62_spill] sm:$0xff]  ;;  %v16071_v46 = vld [vmem:[#allocation45_spill] sm:$0xff] }
 0x410   : > { %12368 = vmatpush3.msra.mxu1 %v16035_v59  ;;  %v14617_v29 = vpop.permute.xlu1 %5925  ;;  %12364 = vmatprep.mubr.msk.f32.mxu0 %vm13338_vm1, %v16038_v22  ;;  %v13003_v18 = vpop.eup %13002  ;;  %v2009_v5 = vmul.f32 %v13001_v11, %v14208_v26  ;;  %13022 = vrcp.f32 %v14577_v34 }
 0x411   : > { %v14622_v9 = vpop.permute.xlu0 %6005  ;;  %12372 = vmatprep.subr.mxu0 %v16038_v22  ;;  %12369 = vmatprep.mubr.msk.f32.mxu1 %vm13338_vm1, %v16038_v22  ;;  %v13005_v41 = vpop.eup %13004  ;;  %v2010_v10 = vmul.f32 %v13003_v18, %v14210_v1  ;;  %13024 = vrcp.f32 %v14575_v53  ;;  %v16068_v53 = vld [vmem:[#allocation64_spill] sm:$0xff] }
 0x412   : > { %12365 = vmatmul.mubr.msk.f32.vlgmr.msra.gmra.mrb[64].mxu0 %vm1846_vm2, %v2007_v33  ;;  %12377 = vmatprep.subr.mxu1 %v16038_v22  ;;  %v13007_v60 = vpop.eup %13006  ;;  %v2011_v1 = vmul.f32 %v13005_v41, %v14215_v27  ;;  %13026 = vrcp.f32 %v14590_v62 }
 0x413   : > { %12373 = vmatpush3.msra.mxu0 %v16039_v57  ;;  %12370 = vmatmul.mubr.msk.f32.vlgmr.msra.gmra.mrb[80].mxu1 %vm1846_vm2, %v2008_v43  ;;  %v13009_v45 = vpop.eup %13008  ;;  %v2012_v0 = vmul.f32 %v13007_v60, %v14219_v16  ;;  %v16073_v43 = vld [vmem:[#allocation69_spill] sm:$0xff] }
 0x414   : > { %12378 = vmatpush3.msra.mxu1 %v16036_v58  ;;  %v14635_v30 = vpop.permute.xlu1 %6083  ;;  %12374 = vmatprep.mubr.msk.f32.mxu0 %vm13338_vm1, %v16038_v22  ;;  %v13011_v21 = vpop.eup %13010  ;;  %v2013_v16 = vmul.f32 %v13009_v45, %v14223_v28  ;;  %v16075_v45 = vld [vmem:[#allocation70_spill] sm:$0xff] }
 0x415   : > { %v14640_v19 = vpop.permute.xlu0 %6003  ;;  %12382 = vmatprep.subr.mxu0 %v16038_v22  ;;  %12379 = vmatprep.mubr.msk.f32.mxu1 %vm13338_vm1, %v16038_v22  ;;  %v13013_v48 = vpop.eup %13012  ;;  %v2014_v17 = vmul.f32 %v13011_v21, %v16065_v4 }
 0x416   : > { %12375 = vmatmul.mubr.msk.f32.vlgmr.msra.gmra.mrb[66].mxu0 %vm1846_vm2, %v2009_v5  ;;  %12387 = vmatprep.subr.mxu1 %v16038_v22  ;;  %v13015_v49 = vpop.eup %13014  ;;  %v2015_v13 = vmul.f32 %v13013_v48, %v16067_v35 }
 0x417   : > { %12383 = vmatpush3.msra.mxu0 %v16041_v31  ;;  %12380 = vmatmul.mubr.msk.f32.vlgmr.msra.gmra.mrb[82].mxu1 %vm1846_vm2, %v2010_v10  ;;  %v13017_v52 = vpop.eup %13016  ;;  %v2016_v34 = vmul.f32 %v13015_v49, %v16068_v53  ;;  %v16074_v10 = vld [vmem:[#allocation68_spill] sm:$0xff] }
 0x418   : > { %12388 = vmatpush3.msra.mxu1 %v16040_v7  ;;  %v14653_v26 = vpop.permute.xlu1 %6081  ;;  %12384 = vmatprep.mubr.msk.f32.mxu0 %vm13338_vm1, %v16038_v22  ;;  %v13019_v61 = vpop.eup %13018  ;;  %v2017_v62 = vmul.f32 %v13017_v52, %v16069_v50 }
 0x419   : > { %v14658_v47 = vpop.permute.xlu0 %6161  ;;  %12392 = vmatprep.subr.mxu0 %v16038_v22  ;;  %12389 = vmatprep.mubr.msk.f32.mxu1 %vm13338_vm1, %v16038_v22  ;;  %v13021_v24 = vpop.eup %13020  ;;  %v2018_v2 = vmul.f32 %v13019_v61, %v16070_v15 }
 0x41a   : > { %12385 = vmatmul.mubr.msk.f32.vlgmr.msra.gmra.mrb[68].mxu0 %vm1846_vm2, %v2011_v1  ;;  %12397 = vmatprep.subr.mxu1 %v16038_v22  ;;  %v13023_v12 = vpop.eup %13022  ;;  %v2019_v33 = vmul.f32 %v13021_v24, %v16072_v38 }
 0x41b   : > { %12393 = vmatpush3.msra.mxu0 %v16042_v55  ;;  %12390 = vmatmul.mubr.msk.f32.vlgmr.msra.gmra.mrb[84].mxu1 %vm1846_vm2, %v2012_v0  ;;  %v13025_v11 = vpop.eup %13024  ;;  %v2020_v18 = vmul.f32 %v13023_v12, %v16073_v43 }
 0x41c   : > { %12398 = vmatpush3.msra.mxu1 %v16044_v8  ;;  %v14671_v27 = vpop.permute.xlu1 %6239  ;;  %12394 = vmatprep.mubr.msk.f32.mxu0 %vm13338_vm1, %v16038_v22  ;;  %v13027_v5 = vpop.eup %13026  ;;  %v2021_v60 = vmul.f32 %v13025_v11, %v16074_v10 }
 0x41d   : > { %v14676_v51 = vpop.permute.xlu0 %6159  ;;  %12402 = vmatprep.subr.mxu0 %v16038_v22  ;;  %12399 = vmatprep.mubr.msk.f32.mxu1 %vm13338_vm1, %v16038_v22  ;;  %v2022_v0 = vmul.f32 %v13027_v5, %v16075_v45 }
 0x41e   : > { %12395 = vmatmul.mubr.msk.f32.vlgmr.msra.gmra.mrb[70].mxu0 %vm1846_vm2, %v2013_v16  ;;  %12407 = vmatprep.subr.mxu1 %v16038_v22 }
 0x41f   : > { %12403 = vmatpush3.msra.mxu0 %v16066_v32  ;;  %12400 = vmatmul.mubr.msk.f32.vlgmr.msra.gmra.mrb[86].mxu1 %vm1846_vm2, %v2014_v17 }
 0x420   : > { %12408 = vmatpush3.msra.mxu1 %v16047_v63  ;;  %v14689_v28 = vpop.permute.xlu1 %6237  ;;  %12404 = vmatprep.mubr.msk.f32.mxu0 %vm13338_vm1, %v16038_v22 }
 0x421   : > { %v14694_v23 = vpop.permute.xlu0 %6317  ;;  %12412 = vmatprep.subr.mxu0 %v16038_v22  ;;  %12409 = vmatprep.mubr.msk.f32.mxu1 %vm13338_vm1, %v16038_v22 }
 0x422   : > { %12405 = vmatmul.mubr.msk.f32.vlgmr.msra.gmra.mrb[72].mxu0 %vm1846_vm2, %v2015_v13  ;;  %12417 = vmatprep.subr.mxu1 %v16038_v22 }
 0x423   : > { %12413 = vmatpush3.msra.mxu0 %v16046_v36  ;;  %12410 = vmatmul.mubr.msk.f32.vlgmr.msra.gmra.mrb[88].mxu1 %vm1846_vm2, %v2016_v34 }
 0x424   : > { %12418 = vmatpush3.msra.mxu1 %v16050_v25  ;;  %v14705_v44 = vpop.permute.xlu1 %6395  ;;  %12414 = vmatprep.mubr.msk.f32.mxu0 %vm13338_vm1, %v16038_v22 }
 0x425   : > { %v14710_v37 = vpop.permute.xlu0 %6315  ;;  %12422 = vmatprep.subr.mxu0 %v16038_v22  ;;  %12419 = vmatprep.mubr.msk.f32.mxu1 %vm13338_vm1, %v16038_v22 }
 0x426   : > { %12415 = vmatmul.mubr.msk.f32.vlgmr.msra.gmra.mrb[74].mxu0 %vm1846_vm2, %v2017_v62  ;;  %12427 = vmatprep.subr.mxu1 %v16038_v22 }
 0x427   : > { %12423 = vmatpush3.msra.mxu0 %v16071_v46  ;;  %12420 = vmatmul.mubr.msk.f32.vlgmr.msra.gmra.mrb[90].mxu1 %vm1846_vm2, %v2018_v2 }
 0x428   : > { %12428 = vmatpush3.msra.mxu1 %v16053_v3  ;;  %v14721_v14 = vpop.permute.xlu1 %6393  ;;  %12424 = vmatprep.mubr.msk.f32.mxu0 %vm13338_vm1, %v16038_v22 }
 0x429   : > { %v6474_v20 = vpop.permute.xlu0 %6473  ;;  %12432 = vmatprep.subr.mxu0 %v16038_v22  ;;  %12429 = vmatprep.mubr.msk.f32.mxu1 %vm13338_vm1, %v16038_v22 }
 0x42a   : > { %12425 = vmatmul.mubr.msk.f32.vlgmr.msra.gmra.mrb[76].mxu0 %vm1846_vm2, %v2019_v33  ;;  %12437 = vmatprep.subr.mxu1 %v16038_v22 }
 0x42b   : > { %12433 = vmatpush3.msra.mxu0 %v16051_v40  ;;  %12430 = vmatmul.mubr.msk.f32.vlgmr.msra.gmra.mrb[92].mxu1 %vm1846_vm2, %v2020_v18 }
 0x42c   : > { %12438 = vmatpush3.msra.mxu1 %v16056_v6  ;;  %v6552_v41 = vpop.permute.xlu1 %6551  ;;  %12434 = vmatprep.mubr.msk.f32.mxu0 %vm13338_vm1, %v16038_v22 }
 0x42d   : > { %v6472_v1 = vpop.permute.xlu0 %6471  ;;  %12439 = vmatprep.mubr.msk.f32.mxu1 %vm13338_vm1, %v16038_v22  ;;  %12442 = vmatprep.subr.mxu0 %v16038_v22 }
 0x42e   : > { %12435 = vmatmul.mubr.msk.f32.vlgmr.msra.gmra.mrb[78].mxu0 %vm1846_vm2, %v2021_v60  ;;  %12447 = vmatprep.subr.mxu1 %v16038_v22 }
 0x42f   : > { %12440 = vmatmul.mubr.msk.f32.vlgmr.msra.gmra.mrb[94].mxu1 %vm1846_vm2, %v2022_v0  ;;  %12444 = vmatprep.mubr.msk.f32.mxu0 %vm13338_vm1, %v16038_v22 }
 0x430   : > { %v6550_v21 = vpop.permute.xlu1 %6549  ;;  %12449 = vmatprep.mubr.msk.f32.mxu1 %vm13338_vm1, %v16038_v22 }
 0x431   : > { %v6630_v16 = vpop.permute.xlu0 %6629 }
 0x432   : > { %12443 = vmatpush3.xpose.msk.msra.mxu0 %vm275_vm0, %v14587_v54 }
 0x433   : > { %12448 = vmatpush3.xpose.msk.msra.mxu1 %vm275_vm0, %v14604_v39  ;;  %12452 = vmatprep.subr.mxu0 %v16038_v22 }
 0x434   : > { %v6708_v48 = vpop.permute.xlu1 %6707  ;;  %12457 = vmatprep.subr.mxu1 %v16038_v22 }
 0x435   : > { %12445 = vmatmul.mubr.msk.f32.vlgmr.msra.gmra.mrb[80].mxu0 %vm275_vm0, %v14599_v42  ;;  %v6628_v4 = vpop.permute.xlu0 %6627 }
 0x436   : > { %12450 = vmatmul.mubr.msk.f32.vlgmr.msra.gmra.mrb[96].mxu1 %vm275_vm0, %v14617_v29  ;;  %12453 = vmatpush3.xpose.msk.msra.mxu0 %vm275_vm0, %v14622_v9 }
 0x437   : > { %12458 = vmatpush3.xpose.msk.msra.mxu1 %vm275_vm0, %v14635_v30  ;;  %12454 = vmatprep.mubr.msk.f32.mxu0 %vm13338_vm1, %v16038_v22 }
 0x438   : > { %12459 = vmatprep.mubr.msk.f32.mxu1 %vm13338_vm1, %v16038_v22  ;;  %12462 = vmatprep.subr.mxu0 %v16038_v22  ;;  %v6706_v54 = vpop.permute.xlu1 %6705 }
 0x439   : > { %12455 = vmatmul.mubr.msk.f32.vlgmr.msra.gmra.mrb[82].mxu0 %vm275_vm0, %v14640_v19  ;;  %12467 = vmatprep.subr.mxu1 %v16038_v22  ;;  %v6786_v42 = vpop.permute.xlu0 %6785 }
 0x43a   : > { %12460 = vmatmul.mubr.msk.f32.vlgmr.msra.gmra.mrb[98].mxu1 %vm275_vm0, %v14653_v26  ;;  %12463 = vmatpush3.xpose.msk.msra.mxu0 %vm275_vm0, %v14658_v47 }
 0x43b   : > { %12468 = vmatpush3.xpose.msk.msra.mxu1 %vm275_vm0, %v14671_v27  ;;  %12464 = vmatprep.mubr.msk.f32.mxu0 %vm13338_vm1, %v16038_v22 }
 0x43c   : > { %12469 = vmatprep.mubr.msk.f32.mxu1 %vm13338_vm1, %v16038_v22  ;;  %12472 = vmatprep.subr.mxu0 %v16038_v22  ;;  %v6864_v39 = vpop.permute.xlu1 %6863 }
 0x43d   : > { %12465 = vmatmul.mubr.msk.f32.vlgmr.msra.gmra.mrb[84].mxu0 %vm275_vm0, %v14676_v51  ;;  %12477 = vmatprep.subr.mxu1 %v16038_v22  ;;  %v6784_v29 = vpop.permute.xlu0 %6783 }
 0x43e   : > { %12470 = vmatmul.mubr.msk.f32.vlgmr.msra.gmra.mrb[100].mxu1 %vm275_vm0, %v14689_v28  ;;  %12473 = vmatpush3.xpose.msk.msra.mxu0 %vm275_vm0, %v14694_v23 }
 0x43f   : > { %12478 = vmatpush3.xpose.msk.msra.mxu1 %vm275_vm0, %v14705_v44  ;;  %12474 = vmatprep.mubr.msk.f32.mxu0 %vm13338_vm1, %v16038_v22 }
 0x440   : > { %12479 = vmatprep.mubr.msk.f32.mxu1 %vm13338_vm1, %v16038_v22  ;;  %12482 = vmatprep.subr.mxu0 %v16038_v22  ;;  %v6862_v9 = vpop.permute.xlu1 %6861 }
 0x441   : > { %12475 = vmatmul.mubr.msk.f32.vlgmr.msra.gmra.mrb[86].mxu0 %vm275_vm0, %v14710_v37  ;;  %12487 = vmatprep.subr.mxu1 %v16038_v22  ;;  %v6942_v19 = vpop.permute.xlu0 %6941 }
 0x442   : > { %12480 = vmatmul.mubr.msk.f32.vlgmr.msra.gmra.mrb[102].mxu1 %vm275_vm0, %v14721_v14  ;;  %12483 = vmatpush3.xpose.msk.msra.mxu0 %vm275_vm0, %v6474_v20 }
 0x443   : > { %12488 = vmatpush3.xpose.msk.msra.mxu1 %vm275_vm0, %v6552_v41  ;;  %12484 = vmatprep.mubr.msk.f32.mxu0 %vm13338_vm1, %v16038_v22 }
 0x444   : > { %12489 = vmatprep.mubr.msk.f32.mxu1 %vm13338_vm1, %v16038_v22  ;;  %12492 = vmatprep.subr.mxu0 %v16038_v22  ;;  %v7020_v30 = vpop.permute.xlu1 %7019 }
 0x445   : > { %12485 = vmatmul.mubr.msk.f32.vlgmr.msra.gmra.mrb[88].mxu0 %vm275_vm0, %v6472_v1  ;;  %12497 = vmatprep.subr.mxu1 %v16038_v22  ;;  %v6940_v47 = vpop.permute.xlu0 %6939 }
 0x446   : > { %12490 = vmatmul.mubr.msk.f32.vlgmr.msra.gmra.mrb[104].mxu1 %vm275_vm0, %v6550_v21  ;;  %12493 = vmatpush3.xpose.msk.msra.mxu0 %vm275_vm0, %v6630_v16 }
 0x447   : > { %12498 = vmatpush3.xpose.msk.msra.mxu1 %vm275_vm0, %v6708_v48  ;;  %12494 = vmatprep.mubr.msk.f32.mxu0 %vm13338_vm1, %v16038_v22 }
 0x448   : > { %12499 = vmatprep.mubr.msk.f32.mxu1 %vm13338_vm1, %v16038_v22  ;;  %12502 = vmatprep.subr.mxu0 %v16038_v22  ;;  %v7018_v26 = vpop.permute.xlu1 %7017 }
 0x449   : > { %12495 = vmatmul.mubr.msk.f32.vlgmr.msra.gmra.mrb[90].mxu0 %vm275_vm0, %v6628_v4  ;;  %12507 = vmatprep.subr.mxu1 %v16038_v22  ;;  %v7348_v51 = vpop.permute.xlu0 %7347 }
 0x44a   : > { %12500 = vmatmul.mubr.msk.f32.vlgmr.msra.gmra.mrb[106].mxu1 %vm275_vm0, %v6706_v54  ;;  %12503 = vmatpush3.xpose.msk.msra.mxu0 %vm275_vm0, %v6786_v42 }
 0x44b   : > { %12508 = vmatpush3.xpose.msk.msra.mxu1 %vm275_vm0, %v6864_v39  ;;  %12504 = vmatprep.mubr.msk.f32.mxu0 %vm13338_vm1, %v16038_v22 }
 0x44c   : > { %12509 = vmatprep.mubr.msk.f32.mxu1 %vm13338_vm1, %v16038_v22  ;;  %12512 = vmatprep.subr.mxu0 %v16038_v22  ;;  %v7272_v27 = vpop.permute.xlu1 %7271 }
 0x44d   : > { %12505 = vmatmul.mubr.msk.f32.vlgmr.msra.gmra.mrb[92].mxu0 %vm275_vm0, %v6784_v29  ;;  %12517 = vmatprep.subr.mxu1 %v16038_v22 }
 0x44e   : > { %12510 = vmatmul.mubr.msk.f32.vlgmr.msra.gmra.mrb[108].mxu1 %vm275_vm0, %v6862_v9  ;;  %12513 = vmatpush3.xpose.msk.msra.mxu0 %vm275_vm0, %v6942_v19 }
 0x44f   : > { %12518 = vmatpush3.xpose.msk.msra.mxu1 %vm275_vm0, %v7020_v30  ;;  %12514 = vmatprep.mubr.msk.f32.mxu0 %vm13338_vm1, %v16038_v22 }
 0x450   : > { %12519 = vmatprep.mubr.msk.f32.mxu1 %vm13338_vm1, %v16038_v22  ;;  %12522 = vmatprep.subr.mxu0 %v16038_v22 }
 0x451   : > { %12515 = vmatmul.mubr.msk.f32.vlgmr.msra.gmra.mrb[94].mxu0 %vm275_vm0, %v6940_v47  ;;  %12527 = vmatprep.subr.mxu1 %v16038_v22 }
 0x452   : > { %12520 = vmatmul.mubr.msk.f32.vlgmr.msra.gmra.mrb[110].mxu1 %vm275_vm0, %v7018_v26  ;;  %12523 = vmatpush3.msra.mxu0 %v7272_v27 }
 0x453   : > { %12528 = vmatpush3.msra.mxu1 %v7348_v51  ;;  %12524 = vmatprep.mubr.msk.f32.mxu0 %vm13338_vm1, %v16038_v22 }
 0x454   : > { %12532 = vmatprep.subr.mxu0 %v16038_v22  ;;  %12529 = vmatprep.mubr.msk.f32.mxu1 %vm13338_vm1, %v16038_v22 }
 0x455   : > { %12537 = vmatprep.subr.mxu1 %v16038_v22 }
 0x4a3   : > { %v3520_v17 = vpop.f32.mrb[48].mxu0 }
 0x4a4   : > { %v12286_v49 = vpop.f32.mrb[49].mxu0 }
 0x4af   : > { %v3597_v28 = vpop.f32.mrb[64].mxu1 }
 0x4b0   : > { %v12291_v35 = vpop.f32.mrb[65].mxu1 }
 0x4b4   : > { %v3674_v13 = vpop.f32.mrb[50].mxu0 }
 0x4b5   : > { %v12296_v52 = vpop.f32.mrb[51].mxu0 }
 0x4b8   : > { %v3751_v23 = vpop.f32.mrb[66].mxu1 }
 0x4b9   : > { %v12301_v53 = vpop.f32.mrb[67].mxu1 }
 0x4bc   : > { %v3828_v34 = vpop.f32.mrb[52].mxu0 }
 0x4bd   : > { %v12306_v61 = vpop.f32.mrb[53].mxu0 }
 0x4be   : > { %v3905_v44 = vpop.f32.mrb[68].mxu1 }
 0x4bf   : > { %v12311_v50 = vpop.f32.mrb[69].mxu1 }
 0x4c4   : > { %v3982_v62 = vpop.f32.mrb[54].mxu0 }
 0x4c5   : > { %v12316_v24 = vpop.f32.mrb[55].mxu0 }
 0x4c6   : > { %v4059_v37 = vpop.f32.mrb[70].mxu1 }
 0x4c7   : > { %v12321_v15 = vpop.f32.mrb[71].mxu1 }
 0x4cc   : > { %v4136_v2 = vpop.f32.mrb[56].mxu0 }
 0x4cd   : > { %v12326_v12 = vpop.f32.mrb[57].mxu0 }
 0x4ce   : > { %v4213_v14 = vpop.f32.mrb[72].mxu1 }
 0x4cf   : > { %v12331_v38 = vpop.f32.mrb[73].mxu1 }
 0x4d5   : > { %v4290_v33 = vpop.f32.mrb[58].mxu0 }
 0x4d6   : > { %v12336_v11 = vpop.f32.mrb[59].mxu0  ;;  %v4367_v20 = vpop.f32.mrb[74].mxu1 }
 0x4d7   : > { %v12341_v43 = vpop.f32.mrb[75].mxu1 }
 0x4dd   : > { %v4444_v18 = vpop.f32.mrb[60].mxu0 }
 0x4de   : > { %v12346_v5 = vpop.f32.mrb[61].mxu0  ;;  %v4521_v41 = vpop.f32.mrb[76].mxu1 }
 0x4df   : > { %v12351_v10 = vpop.f32.mrb[77].mxu1 }
 0x4e1   : > { %v4598_v60 = vpop.f32.mrb[62].mxu0 }
 0x4e2   : > { %v12356_v1 = vpop.f32.mrb[63].mxu0  ;;  %v4675_v45 = vpop.f32.mrb[78].mxu1 }
 0x4e3   : > { %v12361_v0 = vpop.f32.mrb[79].mxu1 }
 0x4e5   : > { %v4748_v21 = vpop.f32.mrb[64].mxu0 }
 0x4e6   : > { %v14847_v16 = vadd.f32 %v4748_v21, %v3520_v17  ;;  %v12366_v48 = vpop.f32.mrb[65].mxu0  ;;  %v4821_v4 = vpop.f32.mrb[80].mxu1 }
 0x4e7   : > { %v14849_v54 = vadd.f32 %v4821_v4, %v3597_v28  ;;  %v12371_v42 = vpop.f32.mrb[81].mxu1 }
 0x4e8   : > { %16076 = vst [vmem:[#allocation23_spill] sm:$0xff] %v14847_v16 }
 0x4e9   : > { %16077 = vst [vmem:[#allocation22_spill] sm:$0xff] %v14849_v54  ;;  %v4894_v39 = vpop.f32.mrb[66].mxu0 }
 0x4ea   : > { %v14851_v29 = vadd.f32 %v4894_v39, %v3674_v13  ;;  %v12376_v9 = vpop.f32.mrb[67].mxu0  ;;  %v4967_v30 = vpop.f32.mrb[82].mxu1 }
 0x4eb   : > { %v14853_v19 = vadd.f32 %v4967_v30, %v3751_v23  ;;  %v12381_v26 = vpop.f32.mrb[83].mxu1 }
 0x4ec   : > { %16078 = vst [vmem:[#allocation26_spill] sm:$0xff] %v14851_v29 }
 0x4ed   : > { %16079 = vst [vmem:[#allocation48_spill] sm:$0xff] %v14853_v19  ;;  %v5040_v47 = vpop.f32.mrb[68].mxu0 }
 0x4ee   : > { %v14855_v27 = vadd.f32 %v5040_v47, %v3828_v34  ;;  %v12386_v51 = vpop.f32.mrb[69].mxu0  ;;  %v5113_v49 = vpop.f32.mrb[84].mxu1 }
 0x4ef   : > { %v14857_v17 = vadd.f32 %v5113_v49, %v3905_v44  ;;  %v12391_v35 = vpop.f32.mrb[85].mxu1 }
 0x4f0   : > { %16080 = vst [vmem:[#allocation27_spill] sm:$0xff] %v14855_v27 }
 0x4f1   : > { %16081 = vst [vmem:[#allocation30_spill] sm:$0xff] %v14857_v17  ;;  %v5186_v52 = vpop.f32.mrb[70].mxu0 }
 0x4f2   : > { %v14859_v28 = vadd.f32 %v5186_v52, %v3982_v62  ;;  %v12396_v53 = vpop.f32.mrb[71].mxu0  ;;  %v5259_v61 = vpop.f32.mrb[86].mxu1 }
 0x4f3   : > { %v14861_v13 = vadd.f32 %v5259_v61, %v4059_v37  ;;  %v12401_v50 = vpop.f32.mrb[87].mxu1 }
 0x4f4   : > { %16082 = vst [vmem:[#allocation31_spill] sm:$0xff] %v14859_v28 }
 0x4f5   : > { %16083 = vst [vmem:[#allocation36_spill] sm:$0xff] %v14861_v13  ;;  %v5332_v24 = vpop.f32.mrb[72].mxu0 }
 0x4f6   : > { %v14863_v23 = vadd.f32 %v5332_v24, %v4136_v2  ;;  %v12406_v15 = vpop.f32.mrb[73].mxu0  ;;  %v5405_v12 = vpop.f32.mrb[88].mxu1 }
 0x4f7   : > { %v14865_v34 = vadd.f32 %v5405_v12, %v4213_v14  ;;  %v12411_v38 = vpop.f32.mrb[89].mxu1 }
 0x4f8   : > { %16084 = vst [vmem:[#allocation34_spill] sm:$0xff] %v14863_v23 }
 0x4f9   : > { %16085 = vst [vmem:[#allocation49_spill] sm:$0xff] %v14865_v34  ;;  %v5478_v11 = vpop.f32.mrb[74].mxu0 }
 0x4fa   : > { %v14867_v44 = vadd.f32 %v5478_v11, %v4290_v33  ;;  %v12416_v43 = vpop.f32.mrb[75].mxu0  ;;  %v5551_v5 = vpop.f32.mrb[90].mxu1 }
 0x4fb   : > { %v14869_v62 = vadd.f32 %v5551_v5, %v4367_v20  ;;  %v12421_v10 = vpop.f32.mrb[91].mxu1 }
 0x4fc   : > { %16086 = vst [vmem:[#allocation38_spill] sm:$0xff] %v14867_v44 }
 0x4fd   : > { %16087 = vst [vmem:[#allocation50_spill] sm:$0xff] %v14869_v62  ;;  %v5624_v1 = vpop.f32.mrb[76].mxu0 }
 0x4fe   : > { %v14871_v37 = vadd.f32 %v5624_v1, %v4444_v18  ;;  %v12426_v0 = vpop.f32.mrb[77].mxu0  ;;  %v5697_v21 = vpop.f32.mrb[92].mxu1 }
 0x4ff   : > { %v14873_v2 = vadd.f32 %v5697_v21, %v4521_v41  ;;  %v12431_v48 = vpop.f32.mrb[93].mxu1 }
 0x500   : > { %16088 = vst [vmem:[#allocation51_spill] sm:$0xff] %v14871_v37 }
 0x501   : > { %16089 = vst [vmem:[#allocation52_spill] sm:$0xff] %v14873_v2  ;;  %v5770_v4 = vpop.f32.mrb[78].mxu0 }
 0x502   : > { %v14875_v14 = vadd.f32 %v5770_v4, %v4598_v60  ;;  %v12436_v42 = vpop.f32.mrb[79].mxu0  ;;  %v5843_v39 = vpop.f32.mrb[94].mxu1 }
 0x503   : > { %v14877_v33 = vadd.f32 %v5843_v39, %v4675_v45  ;;  %v12441_v9 = vpop.f32.mrb[95].mxu1 }
 0x504   : > { %16090 = vst [vmem:[#allocation53_spill] sm:$0xff] %v14875_v14 }
 0x505   : > { %16091 = vst [vmem:[#allocation54_spill] sm:$0xff] %v14877_v33 }
 0x508   : > { %v14879_v30 = vpop.f32.mrb[80].mxu0 }
 0x509   : > { %v12446_v20 = vpop.f32.mrb[81].mxu0  ;;  %v14881_v26 = vpop.f32.mrb[96].mxu1  ;;  %v7095_v18 = vsel %vm1846_vm2, %v14879_v30, -inf }
 0x50a   : > { %v12451_v47 = vpop.f32.mrb[97].mxu1  ;;  %7096 = vmax.xlane.f32.xlu0 %v7095_v18  ;;  %v7098_v41 = vsel %vm1846_vm2, %v14881_v26, -inf }
 0x50b   : > { %7099 = vmax.xlane.f32.xlu1 %v7098_v41 }
 0x50c   : > { %v14887_v60 = vpop.f32.mrb[82].mxu0 }
 0x50d   : > { %v12456_v51 = vpop.f32.mrb[83].mxu0  ;;  %v14889_v45 = vpop.f32.mrb[98].mxu1  ;;  %v7101_v49 = vsel %vm1846_vm2, %v14887_v60, -inf }
 0x50e   : > { %v12461_v35 = vpop.f32.mrb[99].mxu1  ;;  %7102 = vmax.xlane.f32.xlu0 %v7101_v49  ;;  %v7104_v50 = vsel %vm1846_vm2, %v14889_v45, -inf }
 0x510   : > { %v14893_v52 = vpop.f32.mrb[84].mxu0 }
 0x511   : > { %v12466_v53 = vpop.f32.mrb[85].mxu0  ;;  %v14895_v61 = vpop.f32.mrb[100].mxu1  ;;  %v7107_v24 = vsel %vm1846_vm2, %v14893_v52, -inf }
 0x512   : > { %v12471_v15 = vpop.f32.mrb[101].mxu1  ;;  %7105 = vmax.xlane.f32.xlu0 %v7104_v50  ;;  %7108 = vmax.xlane.f32.xlu1 %v7107_v24  ;;  %v7110_v43 = vsel %vm1846_vm2, %v14895_v61, -inf }
 0x514   : > { %v14901_v12 = vpop.f32.mrb[86].mxu0 }
 0x515   : > { %v12476_v38 = vpop.f32.mrb[87].mxu0  ;;  %v14903_v11 = vpop.f32.mrb[102].mxu1  ;;  %v7113_v5 = vsel %vm1846_vm2, %v14901_v12, -inf }
 0x516   : > { %v12481_v10 = vpop.f32.mrb[103].mxu1  ;;  %7111 = vmax.xlane.f32.xlu0 %v7110_v43  ;;  %7114 = vmax.xlane.f32.xlu1 %v7113_v5  ;;  %v7116_v48 = vsel %vm1846_vm2, %v14903_v11, -inf }
 0x518   : > { %v14909_v1 = vpop.f32.mrb[88].mxu0 }
 0x519   : > { %v12486_v0 = vpop.f32.mrb[89].mxu0  ;;  %v14911_v21 = vpop.f32.mrb[104].mxu1  ;;  %v7119_v4 = vsel %vm1846_vm2, %v14909_v1, -inf }
 0x51a   : > { %v12491_v42 = vpop.f32.mrb[105].mxu1  ;;  %7117 = vmax.xlane.f32.xlu0 %v7116_v48  ;;  %7120 = vmax.xlane.f32.xlu1 %v7119_v4  ;;  %v7122_v18 = vsel %vm1846_vm2, %v14911_v21, -inf  ;;  %v16092_v4 = vld [vmem:[#allocation24_spill] sm:$0xff] }
 0x51b   : > { %v16093_v42 = vld [vmem:[#allocation20_spill] sm:$0xff] }
 0x51c   : > { %v14917_v39 = vpop.f32.mrb[90].mxu0 }
 0x51d   : > { %v12496_v9 = vpop.f32.mrb[91].mxu0  ;;  %v14919_v20 = vpop.f32.mrb[106].mxu1  ;;  %v7125_v47 = vsel %vm1846_vm2, %v14917_v39, -inf }
 0x51e   : > { %v12501_v41 = vpop.f32.mrb[107].mxu1  ;;  %7123 = vmax.xlane.f32.xlu0 %v7122_v18  ;;  %7126 = vmax.xlane.f32.xlu1 %v7125_v47  ;;  %v7128_v53 = vsel %vm1846_vm2, %v14919_v20, -inf  ;;  %v14947_v9 = vpop.permute.xlu1 %7499 }
 0x51f   : > { %v14951_v47 = vpop.permute.xlu0 %7423 }
 0x520   : > { %v14925_v51 = vpop.f32.mrb[92].mxu0 }
 0x521   : > { %v12506_v49 = vpop.f32.mrb[93].mxu0  ;;  %v14927_v35 = vpop.f32.mrb[108].mxu1  ;;  %v7131_v50 = vsel %vm1846_vm2, %v14925_v51, -inf }
 0x522   : > { %v12511_v24 = vpop.f32.mrb[109].mxu1  ;;  %7129 = vmax.xlane.f32.xlu0 %v7128_v53  ;;  %7132 = vmax.xlane.f32.xlu1 %v7131_v50  ;;  %v7134_v5 = vsel %vm1846_vm2, %v14927_v35, -inf  ;;  %v14949_v18 = vpop.permute.xlu1 %7651 }
 0x523   : > { %v14955_v49 = vpop.permute.xlu0 %7575 }
 0x524   : > { %v14933_v15 = vpop.f32.mrb[94].mxu0 }
 0x525   : > { %v12516_v38 = vpop.f32.mrb[95].mxu0  ;;  %v14935_v43 = vpop.f32.mrb[110].mxu1  ;;  %v7137_v10 = vsel %vm1846_vm2, %v14933_v15, -inf }
 0x526   : > { %v12521_v0 = vpop.f32.mrb[111].mxu1  ;;  %7135 = vmax.xlane.f32.xlu0 %v7134_v5  ;;  %7138 = vmax.xlane.f32.xlu1 %v7137_v10  ;;  %v7140_v48 = vsel %vm1846_vm2, %v14935_v43, -inf  ;;  %v14953_v41 = vpop.permute.xlu1 %7727 }
 0x527   : > { %v14959_v50 = vpop.permute.xlu0 %7879 }
 0x52a   : > { %7141 = vmax.xlane.f32.xlu0 %v7140_v48  ;;  %v14957_v53 = vpop.permute.xlu1 %7803 }
 0x52b   : > { %v14963_v38 = vpop.permute.xlu0 %8031 }
 0x52e   : > { %v14961_v24 = vpop.permute.xlu1 %7955 }
 0x52f   : > { %v14967_v10 = vpop.permute.xlu0 %8183 }
 0x532   : > { %v14965_v5 = vpop.permute.xlu1 %8107 }
 0x533   : > { %v14971_v48 = vpop.permute.xlu0 %8335 }
 0x536   : > { %v14969_v0 = vpop.permute.xlu1 %8259 }
 0x537   : > { %9051 = vrot.lane.b32.xlu1 %v16092_v4, %s13341_s7 }
 0x53a   : > { %v14973_v4 = vpop.permute.xlu1 %8411 }
 0x53e   : > { %v14977_v40 = vpop.permute.xlu1 %8583 }
 0x540   : > { %8973 = vrot.lane.b32.xlu0 %v16093_v42, %s13341_s7  ;;  %v14975_v42 = vpop.permute.xlu0 %8505 }
 0x542   : > { %v14981_v46 = vpop.permute.xlu1 %8581 }
 0x544   : > { %v14979_v6 = vpop.permute.xlu0 %8503 }
 0x546   : > { %v14985_v3 = vpop.permute.xlu1 %8739 }
 0x548   : > { %v14983_v36 = vpop.permute.xlu0 %8661 }
 0x54a   : > { %v14989_v33 = vpop.permute.xlu1 %8737 }
 0x54b   : > { %16094 = vst [vmem:[#allocation55_spill] sm:$0xff] %v14989_v33 }
 0x54c   : > { %v14987_v25 = vpop.permute.xlu0 %8659 }
 0x54e   : > { %v14993_v2 = vpop.permute.xlu1 %8895 }
 0x54f   : > { %16095 = vst [vmem:[#allocation56_spill] sm:$0xff] %v14993_v2 }
 0x550   : > { %v14991_v14 = vpop.permute.xlu0 %8817 }
 0x552   : > { %v14997_v62 = vpop.permute.xlu1 %8893 }
 0x553   : > { %16097 = vst [vmem:[#allocation58_spill] sm:$0xff] %v14997_v62 }
 0x554   : > { %v14995_v37 = vpop.permute.xlu0 %8815 }
 0x555   : > { %16096 = vst [vmem:[#allocation57_spill] sm:$0xff] %v14995_v37 }
 0x597   : > { %v7097_v44 = vpop.xlane.xlu0 %7096 }
 0x598   : > { %v7143_v34 = vsub.f32 %v14879_v30, %v7097_v44  ;;  %v7100_v23 = vpop.xlane.xlu1 %7099 }
 0x599   : > { %v7144_v13 = vsub.f32 %v14881_v26, %v7100_v23 }
 0x59a   : > { %v7159_v28 = vmul.f32 1.442695, %v7143_v34 }
 0x59b   : > { %v7161_v17 = vmul.f32 1.442695, %v7144_v13  ;;  %v7103_v27 = vpop.xlane.xlu0 %7102 }
 0x59c   : > { %13028 = vpow2.f32 %v7159_v28  ;;  %v7145_v19 = vsub.f32 %v14887_v60, %v7103_v27 }
 0x59d   : > { %13030 = vpow2.f32 %v7161_v17 }
 0x59e   : > { %v7163_v29 = vmul.f32 1.442695, %v7145_v19 }
 0x59f   : > { %v7106_v54 = vpop.xlane.xlu0 %7105  ;;  %v7109_v16 = vpop.xlane.xlu1 %7108 }
 0x5a0   : > { %13032 = vpow2.f32 %v7163_v29  ;;  %v7146_v2 = vsub.f32 %v14889_v45, %v7106_v54  ;;  %v7147_v62 = vsub.f32 %v14893_v52, %v7109_v16 }
 0x5a2   : > { %v7165_v37 = vmul.f32 1.442695, %v7146_v2  ;;  %v7167_v44 = vmul.f32 1.442695, %v7147_v62 }
 0x5a3   : > { %v7112_v30 = vpop.xlane.xlu0 %7111  ;;  %v7115_v33 = vpop.xlane.xlu1 %7114 }
 0x5a4   : > { %13034 = vpow2.f32 %v7165_v37  ;;  %v7148_v13 = vsub.f32 %v14895_v61, %v7112_v30  ;;  %v7149_v28 = vsub.f32 %v14901_v12, %v7115_v33 }
 0x5a5   : > { %13036 = vpow2.f32 %v7167_v44 }
 0x5a6   : > { %v15006_v27 = vpop.eup %13028  ;;  %v7169_v19 = vmul.f32 1.442695, %v7148_v13  ;;  %v7171_v17 = vmul.f32 1.442695, %v7149_v28 }
 0x5a7   : > { %v15008_v23 = vpop.eup %13030  ;;  %v7118_v29 = vpop.xlane.xlu0 %7117  ;;  %v7191_v16 = vsel %vm1846_vm2, %v15006_v27, 0.0 }
 0x5a8   : > { %v7121_v54 = vpop.xlane.xlu1 %7120  ;;  %13038 = vpow2.f32 %v7169_v19  ;;  %v7150_v34 = vsub.f32 %v14903_v11, %v7118_v29  ;;  %7192 = vadd.xlane.f32.xlu1 %v7191_v16  ;;  %v7194_v37 = vsel %vm1846_vm2, %v15008_v23, 0.0 }
 0x5a9   : > { %v7151_v62 = vsub.f32 %v14909_v1, %v7121_v54  ;;  %13040 = vpow2.f32 %v7171_v17  ;;  %7195 = vadd.xlane.f32.xlu0 %v7194_v37 }
 0x5aa   : > { %v15016_v2 = vpop.eup %13032  ;;  %v7173_v33 = vmul.f32 1.442695, %v7150_v34 }
 0x5ab   : > { %v7175_v26 = vmul.f32 1.442695, %v7151_v62  ;;  %v7124_v60 = vpop.xlane.xlu0 %7123  ;;  %v7197_v52 = vsel %vm1846_vm2, %v15016_v2, 0.0 }
 0x5ac   : > { %v7127_v45 = vpop.xlane.xlu1 %7126  ;;  %13042 = vpow2.f32 %v7173_v33  ;;  %v7152_v61 = vsub.f32 %v14911_v21, %v7124_v60  ;;  %7198 = vadd.xlane.f32.xlu1 %v7197_v52 }
 0x5ad   : > { %v7153_v12 = vsub.f32 %v14917_v39, %v7127_v45  ;;  %13044 = vpow2.f32 %v7175_v26 }
 0x5ae   : > { %v15022_v11 = vpop.eup %13034  ;;  %v7177_v1 = vmul.f32 1.442695, %v7152_v61 }
 0x5af   : > { %v7179_v44 = vmul.f32 1.442695, %v7153_v12  ;;  %v15024_v30 = vpop.eup %13036  ;;  %v7130_v13 = vpop.xlane.xlu0 %7129  ;;  %v7200_v19 = vsel %vm1846_vm2, %v15022_v11, 0.0 }
 0x5b0   : > { %v7133_v28 = vpop.xlane.xlu1 %7132  ;;  %13046 = vpow2.f32 %v7177_v1  ;;  %v7154_v17 = vsub.f32 %v14919_v20, %v7130_v13  ;;  %7201 = vadd.xlane.f32.xlu0 %v7200_v19  ;;  %v7203_v39 = vsel %vm1846_vm2, %v15024_v30, 0.0 }
 0x5b1   : > { %v7155_v21 = vsub.f32 %v14925_v51, %v7133_v28  ;;  %13048 = vpow2.f32 %v7179_v44  ;;  %7204 = vadd.xlane.f32.xlu1 %v7203_v39  ;;  %v16098_v39 = vld [vmem:[#allocation25_spill] sm:$0xff] }
 0x5b2   : > { %v15032_v29 = vpop.eup %13038  ;;  %v7181_v54 = vmul.f32 1.442695, %v7154_v17 }
 0x5b3   : > { %v7183_v16 = vmul.f32 1.442695, %v7155_v21  ;;  %v15034_v34 = vpop.eup %13040  ;;  %v7136_v62 = vpop.xlane.xlu0 %7135  ;;  %v7206_v37 = vsel %vm1846_vm2, %v15032_v29, 0.0 }
 0x5b4   : > { %13050 = vpow2.f32 %v7181_v54  ;;  %v7156_v20 = vsub.f32 %v14927_v35, %v7136_v62  ;;  %7207 = vadd.xlane.f32.xlu0 %v7206_v37  ;;  %v7209_v51 = vsel %vm1846_vm2, %v15034_v34, 0.0  ;;  %v16099_v54 = vld [vmem:[#allocation21_spill] sm:$0xff] }
 0x5b5   : > { %13052 = vpow2.f32 %v7183_v16  ;;  %7210 = vadd.xlane.f32.xlu1 %v7209_v51  ;;  %v7139_v16 = vpop.xlane.xlu1 %7138 }
 0x5b6   : > { %v15041_v33 = vpop.eup %13042  ;;  %v7185_v26 = vmul.f32 1.442695, %v7156_v20  ;;  %v7157_v62 = vsub.f32 %v14933_v15, %v7139_v16  ;;  %v16100_v15 = vld [vmem:[#allocation32_spill] sm:$0xff]  ;;  %v16107_v16 = vld [vmem:[#allocation35_spill] sm:$0xff] }
 0x5b7   : > { %v15043_v60 = vpop.eup %13044  ;;  %v7212_v45 = vsel %vm1846_vm2, %v15041_v33, 0.0  ;;  %v7142_v37 = vpop.xlane.xlu0 %7141 }
 0x5b8   : > { %13054 = vpow2.f32 %v7185_v26  ;;  %7213 = vadd.xlane.f32.xlu0 %v7212_v45  ;;  %v7215_v52 = vsel %vm1846_vm2, %v15043_v60, 0.0  ;;  %v7158_v20 = vsub.f32 %v14935_v43, %v7142_v37  ;;  %v7187_v51 = vmul.f32 1.442695, %v7157_v62  ;;  %v16101_v43 = vld [vmem:[#allocation33_spill] sm:$0xff]  ;;  %v16108_v62 = vld [vmem:[#allocation15_spill] sm:$0xff] }
 0x5b9   : > { %7216 = vadd.xlane.f32.xlu1 %v7215_v52  ;;  %v16109_v37 = vld [vmem:[#allocation37_spill] sm:$0xff] }
 0x5ba   : > { %v15049_v35 = vpop.eup %13046  ;;  %v7189_v26 = vmul.f32 1.442695, %v7158_v20  ;;  %13056 = vpow2.f32 %v7187_v51  ;;  %v16110_v20 = vld [vmem:[#allocation18_spill] sm:$0xff]  ;;  %v16111_v51 = vld [vmem:[#allocation12_spill] sm:$0xff] }
 0x5bb   : > { %v15051_v61 = vpop.eup %13048  ;;  %v7218_v12 = vsel %vm1846_vm2, %v15049_v35, 0.0 }
 0x5bc   : > { %7219 = vadd.xlane.f32.xlu0 %v7218_v12  ;;  %v7221_v1 = vsel %vm1846_vm2, %v15051_v61, 0.0  ;;  %13058 = vpow2.f32 %v7189_v26  ;;  %v16112_v26 = vld [vmem:[#allocation19_spill] sm:$0xff] }
 0x5bd   : > { %7222 = vadd.xlane.f32.xlu1 %v7221_v1 }
 0x5be   : > { %v15057_v44 = vpop.eup %13050 }
 0x5bf   : > { %v15059_v13 = vpop.eup %13052  ;;  %v7224_v28 = vsel %vm1846_vm2, %v15057_v44, 0.0 }
 0x5c0   : > { %7225 = vadd.xlane.f32.xlu0 %v7224_v28  ;;  %v7227_v19 = vsel %vm1846_vm2, %v15059_v13, 0.0  ;;  %v16102_v28 = vld [vmem:[#allocation39_spill] sm:$0xff] }
 0x5c1   : > { %7228 = vadd.xlane.f32.xlu1 %v7227_v19  ;;  %v16103_v19 = vld [vmem:[#allocation28_spill] sm:$0xff] }
 0x5c2   : > { %v15065_v17 = vpop.eup %13054 }
 0x5c3   : > { %v7230_v21 = vsel %vm1846_vm2, %v15065_v17, 0.0 }
 0x5c4   : > { %7231 = vadd.xlane.f32.xlu0 %v7230_v21  ;;  %v15075_v45 = vpop.eup %13056  ;;  %v16104_v21 = vld [vmem:[#allocation41_spill] sm:$0xff] }
 0x5c5   : > { %v7233_v12 = vsel %vm1846_vm2, %v15075_v45, 0.0 }
 0x5c6   : > { %v15077_v52 = vpop.eup %13058 }
 0x5c7   : > { %v7236_v1 = vsel %vm1846_vm2, %v15077_v52, 0.0 }
 0x5d2   : > { %9049 = vrot.lane.b32.xlu1 %v16098_v39, %s13341_s7  ;;  %v16105_v39 = vld [vmem:[#allocation29_spill] sm:$0xff] }
 0x5da   : > { %8971 = vrot.lane.b32.xlu0 %v16099_v54, %s13341_s7  ;;  %v16106_v54 = vld [vmem:[#allocation14_spill] sm:$0xff] }
 0x5f6   : > { %7234 = vadd.xlane.f32.xlu1 %v7233_v12  ;;  %v16113_v12 = vld [vmem:[#allocation13_spill] sm:$0xff] }
 0x5f9   : > { %7237 = vadd.xlane.f32.xlu0 %v7236_v1  ;;  %v16114_v1 = vld [vmem:[#allocation16_spill] sm:$0xff] }
 0x607   : > { %9207 = vrot.lane.b32.xlu1 %v16100_v15, %s13341_s7  ;;  %v16115_v15 = vld [vmem:[#allocation17_spill] sm:$0xff] }
 0x60b   : > { %9205 = vrot.lane.b32.xlu1 %v16101_v43, %s13341_s7  ;;  %v15123_v43 = vpop.permute.xlu1 %9051 }
 0x60f   : > { %9363 = vrot.lane.b32.xlu1 %v16102_v28, %s13341_s7  ;;  %9129 = vrot.lane.b32.xlu0 %v16103_v19, %s13341_s7  ;;  %v15125_v28 = vpop.permute.xlu0 %8973 }
 0x613   : > { %9361 = vrot.lane.b32.xlu1 %v16104_v21, %s13341_s7  ;;  %9127 = vrot.lane.b32.xlu0 %v16105_v39, %s13341_s7 }
 0x617   : > { %9519 = vrot.lane.b32.xlu1 %v16106_v54, %s13341_s7  ;;  %9285 = vrot.lane.b32.xlu0 %v16107_v16, %s13341_s7 }
 0x61b   : > { %9517 = vrot.lane.b32.xlu1 %v16108_v62, %s13341_s7  ;;  %9283 = vrot.lane.b32.xlu0 %v16109_v37, %s13341_s7 }
 0x61f   : > { %9675 = vrot.lane.b32.xlu1 %v16110_v20, %s13341_s7  ;;  %9441 = vrot.lane.b32.xlu0 %v16111_v51, %s13341_s7 }
 0x623   : > { %9673 = vrot.lane.b32.xlu1 %v16112_v26, %s13341_s7  ;;  %9439 = vrot.lane.b32.xlu0 %v16113_v12, %s13341_s7 }
 0x627   : > { %9927 = vrot.lane.b32.xlu1 %v16034_v56, %s13341_s7  ;;  %9597 = vrot.lane.b32.xlu0 %v16114_v1, %s13341_s7 }
 0x62b   : > { %10079 = vrot.lane.b32.xlu1 %v16039_v57, %s13341_s7  ;;  %9595 = vrot.lane.b32.xlu0 %v16115_v15, %s13341_s7 }
 0x62f   : > { %10231 = vrot.lane.b32.xlu1 %v16041_v31, %s13341_s7  ;;  %10003 = vrot.lane.b32.xlu0 %v16035_v59, %s13341_s7 }
 0x633   : > { %10307 = vrot.lane.b32.xlu1 %v16040_v7, %s13341_s7  ;;  %10155 = vrot.lane.b32.xlu0 %v16036_v58, %s13341_s7 }
 0x635   : > { %v7193_v56 = vpop.xlane.xlu1 %7192 }
 0x636   : > { %13060 = vrcp.f32 %v7193_v56  ;;  %v7196_v57 = vpop.xlane.xlu0 %7195 }
 0x637   : > { %13062 = vrcp.f32 %v7196_v57  ;;  %10459 = vrot.lane.b32.xlu1 %v16044_v8, %s13341_s7  ;;  %10383 = vrot.lane.b32.xlu0 %v16042_v55, %s13341_s7 }
 0x639   : > { %v7199_v59 = vpop.xlane.xlu1 %7198 }
 0x63a   : > { %13064 = vrcp.f32 %v7199_v59 }
 0x63b   : > { %10611 = vrot.lane.b32.xlu1 %v16047_v63, %s13341_s7  ;;  %10535 = vrot.lane.b32.xlu0 %v16066_v32, %s13341_s7 }
 0x63d   : > { %v7202_v7 = vpop.xlane.xlu0 %7201 }
 0x63e   : > { %13066 = vrcp.f32 %v7202_v7  ;;  %v7205_v58 = vpop.xlane.xlu1 %7204 }
 0x63f   : > { %13068 = vrcp.f32 %v7205_v58 }
 0x640   : > { %v13061_v31 = vpop.eup %13060 }
 0x641   : > { %v13063_v19 = vpop.eup %13062  ;;  %v7255_v21 = vmul.f32 %v13061_v31, %v15006_v27  ;;  %v7208_v8 = vpop.xlane.xlu0 %7207 }
 0x642   : > { %v7256_v39 = vmul.f32 %v13063_v19, %v15008_v23  ;;  %13070 = vrcp.f32 %v7208_v8  ;;  %v7211_v55 = vpop.xlane.xlu1 %7210 }
 0x643   : > { %13072 = vrcp.f32 %v7211_v55  ;;  %12525 = vmatmul.mubr.msk.f32.vlgmr.msra.gmra.mrb[96].mxu0 %vm1846_vm2, %v7255_v21  ;;  %v16120_v55 = vld [vmem:[#allocation23_spill] sm:$0xff] }
 0x644   : > { %v13065_v63 = vpop.eup %13064  ;;  %12533 = vmatpush3.msra.mxu0 %v14951_v47  ;;  %12530 = vmatmul.mubr.msk.f32.vlgmr.msra.gmra.mrb[112].mxu1 %vm1846_vm2, %v7256_v39 }
 0x645   : > { %v7257_v32 = vmul.f32 %v13065_v63, %v15016_v2  ;;  %12538 = vmatpush3.msra.mxu1 %v14947_v9  ;;  %v7214_v54 = vpop.xlane.xlu0 %7213  ;;  %12534 = vmatprep.mubr.msk.f32.mxu0 %vm13338_vm1, %v16038_v22 }
 0x646   : > { %13074 = vrcp.f32 %v7214_v54  ;;  %v7217_v27 = vpop.xlane.xlu1 %7216  ;;  %12542 = vmatprep.subr.mxu0 %v16038_v22  ;;  %12539 = vmatprep.mubr.msk.f32.mxu1 %vm13338_vm1, %v16038_v22 }
 0x647   : > { %13076 = vrcp.f32 %v7217_v27  ;;  %12535 = vmatmul.mubr.msk.f32.vlgmr.msra.gmra.mrb[98].mxu0 %vm1846_vm2, %v7257_v32  ;;  %12547 = vmatprep.subr.mxu1 %v16038_v22  ;;  %v16121_v27 = vld [vmem:[#allocation22_spill] sm:$0xff] }
 0x648   : > { %v13067_v47 = vpop.eup %13066  ;;  %12543 = vmatpush3.msra.mxu0 %v14955_v49  ;;  %12544 = vmatprep.mubr.msk.f32.mxu0 %vm13338_vm1, %v16038_v22 }
 0x649   : > { %v13069_v9 = vpop.eup %13068  ;;  %v7258_v23 = vmul.f32 %v13067_v47, %v15022_v11  ;;  %v7220_v2 = vpop.xlane.xlu0 %7219  ;;  %12552 = vmatprep.subr.mxu0 %v16038_v22 }
 0x64a   : > { %v7259_v16 = vmul.f32 %v13069_v9, %v15024_v30  ;;  %13078 = vrcp.f32 %v7220_v2  ;;  %v7223_v62 = vpop.xlane.xlu1 %7222  ;;  %v16122_v2 = vld [vmem:[#allocation26_spill] sm:$0xff] }
 0x64b   : > { %13080 = vrcp.f32 %v7223_v62  ;;  %12540 = vmatmul.mubr.msk.f32.vlgmr.msra.gmra.mrb[114].mxu1 %vm1846_vm2, %v7258_v23 }
 0x64c   : > { %v13071_v37 = vpop.eup %13070  ;;  %12545 = vmatmul.mubr.msk.f32.vlgmr.msra.gmra.mrb[100].mxu0 %vm1846_vm2, %v7259_v16  ;;  %12548 = vmatpush3.msra.mxu1 %v14949_v18 }
 0x64d   : > { %v13073_v49 = vpop.eup %13072  ;;  %v7260_v20 = vmul.f32 %v13071_v37, %v15032_v29  ;;  %12553 = vmatpush3.msra.mxu0 %v14953_v41  ;;  %v7226_v11 = vpop.xlane.xlu0 %7225  ;;  %12549 = vmatprep.mubr.msk.f32.mxu1 %vm13338_vm1, %v16038_v22 }
 0x64e   : > { %v7261_v30 = vmul.f32 %v13073_v49, %v15034_v34  ;;  %13082 = vrcp.f32 %v7226_v11  ;;  %v7229_v51 = vpop.xlane.xlu1 %7228  ;;  %12554 = vmatprep.mubr.msk.f32.mxu0 %vm13338_vm1, %v16038_v22  ;;  %12557 = vmatprep.subr.mxu1 %v16038_v22  ;;  %v16123_v49 = vld [vmem:[#allocation48_spill] sm:$0xff] }
 0x64f   : > { %13084 = vrcp.f32 %v7229_v51  ;;  %12562 = vmatprep.subr.mxu0 %v16038_v22  ;;  %12550 = vmatmul.mubr.msk.f32.vlgmr.msra.gmra.mrb[116].mxu1 %vm1846_vm2, %v7260_v20  ;;  %v16124_v51 = vld [vmem:[#allocation27_spill] sm:$0xff] }
 0x650   : > { %v13075_v18 = vpop.eup %13074  ;;  %12555 = vmatmul.mubr.msk.f32.vlgmr.msra.gmra.mrb[102].mxu0 %vm1846_vm2, %v7261_v30  ;;  %12558 = vmatpush3.msra.mxu1 %v14957_v53 }
 0x651   : > { %v13077_v41 = vpop.eup %13076  ;;  %v7262_v29 = vmul.f32 %v13075_v18, %v15041_v33  ;;  %12563 = vmatpush3.msra.mxu0 %v14959_v50  ;;  %v7232_v34 = vpop.xlane.xlu0 %7231  ;;  %12559 = vmatprep.mubr.msk.f32.mxu1 %vm13338_vm1, %v16038_v22 }
 0x652   : > { %v7263_v26 = vmul.f32 %v13077_v41, %v15043_v60  ;;  %13086 = vrcp.f32 %v7232_v34  ;;  %12564 = vmatprep.mubr.msk.f32.mxu0 %vm13338_vm1, %v16038_v22  ;;  %12567 = vmatprep.subr.mxu1 %v16038_v22  ;;  %v16125_v34 = vld [vmem:[#allocation30_spill] sm:$0xff] }
 0x653   : > { %12572 = vmatprep.subr.mxu0 %v16038_v22  ;;  %12560 = vmatmul.mubr.msk.f32.vlgmr.msra.gmra.mrb[118].mxu1 %vm1846_vm2, %v7262_v29 }
 0x654   : > { %v13079_v53 = vpop.eup %13078  ;;  %12565 = vmatmul.mubr.msk.f32.vlgmr.msra.gmra.mrb[104].mxu0 %vm1846_vm2, %v7263_v26  ;;  %12568 = vmatpush3.msra.mxu1 %v14961_v24 }
 0x655   : > { %v13081_v50 = vpop.eup %13080  ;;  %v7264_v33 = vmul.f32 %v13079_v53, %v15049_v35  ;;  %12573 = vmatpush3.msra.mxu0 %v14963_v38  ;;  %12569 = vmatprep.mubr.msk.f32.mxu1 %vm13338_vm1, %v16038_v22 }
 0x656   : > { %v7265_v60 = vmul.f32 %v13081_v50, %v15051_v61  ;;  %12574 = vmatprep.mubr.msk.f32.mxu0 %vm13338_vm1, %v16038_v22  ;;  %12577 = vmatprep.subr.mxu1 %v16038_v22 }
 0x657   : > { %12582 = vmatprep.subr.mxu0 %v16038_v22  ;;  %12570 = vmatmul.mubr.msk.f32.vlgmr.msra.gmra.mrb[120].mxu1 %vm1846_vm2, %v7264_v33  ;;  %v16126_v33 = vld [vmem:[#allocation31_spill] sm:$0xff] }
 0x658   : > { %v13083_v24 = vpop.eup %13082  ;;  %12575 = vmatmul.mubr.msk.f32.vlgmr.msra.gmra.mrb[106].mxu0 %vm1846_vm2, %v7265_v60  ;;  %12578 = vmatpush3.msra.mxu1 %v14965_v5 }
 0x659   : > { %v13085_v38 = vpop.eup %13084  ;;  %v7266_v35 = vmul.f32 %v13083_v24, %v15057_v44  ;;  %12583 = vmatpush3.msra.mxu0 %v14967_v10  ;;  %12579 = vmatprep.mubr.msk.f32.mxu1 %vm13338_vm1, %v16038_v22 }
 0x65a   : > { %v7267_v61 = vmul.f32 %v13085_v38, %v15059_v13  ;;  %12584 = vmatprep.mubr.msk.f32.mxu0 %vm13338_vm1, %v16038_v22  ;;  %12587 = vmatprep.subr.mxu1 %v16038_v22 }
 0x65b   : > { %12592 = vmatprep.subr.mxu0 %v16038_v22  ;;  %12580 = vmatmul.mubr.msk.f32.vlgmr.msra.gmra.mrb[122].mxu1 %vm1846_vm2, %v7266_v35  ;;  %v16127_v35 = vld [vmem:[#allocation36_spill] sm:$0xff] }
 0x65c   : > { %v13087_v5 = vpop.eup %13086  ;;  %12585 = vmatmul.mubr.msk.f32.vlgmr.msra.gmra.mrb[108].mxu0 %vm1846_vm2, %v7267_v61  ;;  %12588 = vmatpush3.msra.mxu1 %v14969_v0  ;;  %v9050_v0 = vpop.permute.xlu1 %9049 }
 0x65d   : > { %v7268_v10 = vmul.f32 %v13087_v5, %v15065_v17  ;;  %12593 = vmatpush3.msra.mxu0 %v14971_v48  ;;  %12589 = vmatprep.mubr.msk.f32.mxu1 %vm13338_vm1, %v16038_v22  ;;  %v8972_v48 = vpop.permute.xlu0 %8971 }
 0x65e   : > { %12597 = vmatprep.subr.mxu1 %v16038_v22  ;;  %12594 = vmatprep.mubr.msk.f32.mxu0 %vm13338_vm1, %v16038_v22 }
 0x65f   : > { %12590 = vmatmul.mubr.msk.f32.vlgmr.msra.gmra.mrb[124].mxu1 %vm1846_vm2, %v7268_v10  ;;  %12602 = vmatprep.subr.mxu0 %v16038_v22 }
 0x660   : > { %12598 = vmatpush3.msra.mxu1 %v14973_v4  ;;  %12599 = vmatprep.mubr.msk.f32.mxu1 %vm13338_vm1, %v16038_v22 }
 0x661   : > { %12607 = vmatprep.subr.mxu1 %v16038_v22 }
 0x683   : > { %v7235_v44 = vpop.xlane.xlu1 %7234 }
 0x684   : > { %13088 = vrcp.f32 %v7235_v44 }
 0x686   : > { %v7238_v13 = vpop.xlane.xlu0 %7237 }
 0x687   : > { %13090 = vrcp.f32 %v7238_v13  ;;  %v9208_v17 = vpop.permute.xlu1 %9207 }
 0x68a   : > { %v9130_v12 = vpop.permute.xlu0 %9129 }
 0x68b   : > { %v9206_v1 = vpop.permute.xlu1 %9205 }
 0x68e   : > { %v13089_v15 = vpop.eup %13088  ;;  %v9128_v56 = vpop.permute.xlu0 %9127 }
 0x68f   : > { %v7269_v57 = vmul.f32 %v13089_v15, %v15075_v45  ;;  %v9364_v59 = vpop.permute.xlu1 %9363 }
 0x691   : > { %v13091_v4 = vpop.eup %13090  ;;  %12595 = vmatmul.mubr.msk.f32.vlgmr.msra.gmra.mrb[110].mxu0 %vm1846_vm2, %v7269_v57 }
 0x692   : > { %v7270_v7 = vmul.f32 %v13091_v4, %v15077_v52  ;;  %12603 = vmatpush3.xpose.msk.msra.mxu0 %vm275_vm0, %v14975_v42  ;;  %v9286_v58 = vpop.permute.xlu0 %9285  ;;  %12604 = vmatprep.mubr.msk.f32.mxu0 %vm13338_vm1, %v16038_v22 }
 0x693   : > { %v9362_v31 = vpop.permute.xlu1 %9361  ;;  %12612 = vmatprep.subr.mxu0 %v16038_v22 }
 0x694   : > { %12600 = vmatmul.mubr.msk.f32.vlgmr.msra.gmra.mrb[126].mxu1 %vm1846_vm2, %v7270_v7  ;;  %v16131_v7 = vld [vmem:[#allocation50_spill] sm:$0xff] }
 0x695   : > { %12605 = vmatmul.mubr.msk.f32.vlgmr.msra.gmra.mrb[112].mxu0 %vm275_vm0, %v14979_v6  ;;  %12608 = vmatpush3.xpose.msk.msra.mxu1 %vm275_vm0, %v14977_v40  ;;  %v16116_v40 = vld [vmem:[#allocation55_spill] sm:$0xff] }
 0x696   : > { %12613 = vmatpush3.xpose.msk.msra.mxu0 %vm275_vm0, %v14983_v36  ;;  %v9284_v45 = vpop.permute.xlu0 %9283  ;;  %12609 = vmatprep.mubr.msk.f32.mxu1 %vm13338_vm1, %v16038_v22 }
 0x697   : > { %12614 = vmatprep.mubr.msk.f32.mxu0 %vm13338_vm1, %v16038_v22  ;;  %12617 = vmatprep.subr.mxu1 %v16038_v22  ;;  %v9520_v6 = vpop.permute.xlu1 %9519 }
 0x698   : > { %12622 = vmatprep.subr.mxu0 %v16038_v22  ;;  %12610 = vmatmul.mubr.msk.f32.vlgmr.msra.gmra.mrb[128].mxu1 %vm275_vm0, %v14981_v46 }
 0x699   : > { %12615 = vmatmul.mubr.msk.f32.vlgmr.msra.gmra.mrb[114].mxu0 %vm275_vm0, %v14987_v25  ;;  %12618 = vmatpush3.xpose.msk.msra.mxu1 %vm275_vm0, %v14985_v3  ;;  %v16117_v25 = vld [vmem:[#allocation57_spill] sm:$0xff]  ;;  %v16118_v3 = vld [vmem:[#allocation56_spill] sm:$0xff] }
 0x69a   : > { %12623 = vmatpush3.xpose.msk.msra.mxu0 %vm275_vm0, %v14991_v14  ;;  %12619 = vmatprep.mubr.msk.f32.mxu1 %vm13338_vm1, %v16038_v22  ;;  %v9442_v36 = vpop.permute.xlu0 %9441  ;;  %v16119_v14 = vld [vmem:[#allocation58_spill] sm:$0xff] }
 0x69b   : > { %12624 = vmatprep.mubr.msk.f32.mxu0 %vm13338_vm1, %v16038_v22  ;;  %12627 = vmatprep.subr.mxu1 %v16038_v22  ;;  %v9518_v46 = vpop.permute.xlu1 %9517 }
 0x69c   : > { %12632 = vmatprep.subr.mxu0 %v16038_v22  ;;  %12620 = vmatmul.mubr.msk.f32.vlgmr.msra.gmra.mrb[130].mxu1 %vm275_vm0, %v16116_v40 }
 0x69d   : > { %12625 = vmatmul.mubr.msk.f32.vlgmr.msra.gmra.mrb[116].mxu0 %vm275_vm0, %v16117_v25  ;;  %12628 = vmatpush3.xpose.msk.msra.mxu1 %vm275_vm0, %v16118_v3  ;;  %v16133_v3 = vld [vmem:[#allocation52_spill] sm:$0xff] }
 0x69e   : > { %12633 = vmatpush3.xpose.msk.msra.mxu0 %vm275_vm0, %v15125_v28  ;;  %12629 = vmatprep.mubr.msk.f32.mxu1 %vm13338_vm1, %v16038_v22  ;;  %v9440_v42 = vpop.permute.xlu0 %9439 }
 0x69f   : > { %12634 = vmatprep.mubr.msk.f32.mxu0 %vm13338_vm1, %v16038_v22  ;;  %12637 = vmatprep.subr.mxu1 %v16038_v22  ;;  %v9676_v52 = vpop.permute.xlu1 %9675 }
 0x6a0   : > { %12642 = vmatprep.subr.mxu0 %v16038_v22  ;;  %12630 = vmatmul.mubr.msk.f32.vlgmr.msra.gmra.mrb[132].mxu1 %vm275_vm0, %v16119_v14 }
 0x6a1   : > { %12635 = vmatmul.mubr.msk.f32.vlgmr.msra.gmra.mrb[118].mxu0 %vm275_vm0, %v8972_v48  ;;  %12638 = vmatpush3.xpose.msk.msra.mxu1 %vm275_vm0, %v15123_v43 }
 0x6a2   : > { %12643 = vmatpush3.xpose.msk.msra.mxu0 %vm275_vm0, %v9130_v12  ;;  %12639 = vmatprep.mubr.msk.f32.mxu1 %vm13338_vm1, %v16038_v22  ;;  %v9598_v43 = vpop.permute.xlu0 %9597 }
 0x6a3   : > { %12644 = vmatprep.mubr.msk.f32.mxu0 %vm13338_vm1, %v16038_v22  ;;  %12647 = vmatprep.subr.mxu1 %v16038_v22  ;;  %v9674_v28 = vpop.permute.xlu1 %9673 }
 0x6a4   : > { %12652 = vmatprep.subr.mxu0 %v16038_v22  ;;  %12640 = vmatmul.mubr.msk.f32.vlgmr.msra.gmra.mrb[134].mxu1 %vm275_vm0, %v9050_v0  ;;  %v16128_v0 = vld [vmem:[#allocation34_spill] sm:$0xff] }
 0x6a5   : > { %12645 = vmatmul.mubr.msk.f32.vlgmr.msra.gmra.mrb[120].mxu0 %vm275_vm0, %v9128_v56  ;;  %12648 = vmatpush3.xpose.msk.msra.mxu1 %vm275_vm0, %v9208_v17  ;;  %v16129_v17 = vld [vmem:[#allocation49_spill] sm:$0xff]  ;;  %v16130_v56 = vld [vmem:[#allocation38_spill] sm:$0xff] }
 0x6a6   : > { %12653 = vmatpush3.xpose.msk.msra.mxu0 %vm275_vm0, %v9286_v58  ;;  %12649 = vmatprep.mubr.msk.f32.mxu1 %vm13338_vm1, %v16038_v22  ;;  %v9596_v19 = vpop.permute.xlu0 %9595 }
 0x6a7   : > { %12654 = vmatprep.mubr.msk.f32.mxu0 %vm13338_vm1, %v16038_v22  ;;  %12657 = vmatprep.subr.mxu1 %v16038_v22  ;;  %v9928_v21 = vpop.permute.xlu1 %9927 }
 0x6a8   : > { %12662 = vmatprep.subr.mxu0 %v16038_v22  ;;  %12650 = vmatmul.mubr.msk.f32.vlgmr.msra.gmra.mrb[136].mxu1 %vm275_vm0, %v9206_v1 }
 0x6a9   : > { %12655 = vmatmul.mubr.msk.f32.vlgmr.msra.gmra.mrb[122].mxu0 %vm275_vm0, %v9284_v45  ;;  %12658 = vmatpush3.xpose.msk.msra.mxu1 %vm275_vm0, %v9364_v59 }
 0x6aa   : > { %12663 = vmatpush3.xpose.msk.msra.mxu0 %vm275_vm0, %v9442_v36  ;;  %12659 = vmatprep.mubr.msk.f32.mxu1 %vm13338_vm1, %v16038_v22  ;;  %v10004_v8 = vpop.permute.xlu0 %10003 }
 0x6ab   : > { %12664 = vmatprep.mubr.msk.f32.mxu0 %vm13338_vm1, %v16038_v22  ;;  %12667 = vmatprep.subr.mxu1 %v16038_v22 }
 0x6ac   : > { %12672 = vmatprep.subr.mxu0 %v16038_v22  ;;  %12660 = vmatmul.mubr.msk.f32.vlgmr.msra.gmra.mrb[138].mxu1 %vm275_vm0, %v9362_v31 }
 0x6ad   : > { %12665 = vmatmul.mubr.msk.f32.vlgmr.msra.gmra.mrb[124].mxu0 %vm275_vm0, %v9440_v42  ;;  %12668 = vmatpush3.xpose.msk.msra.mxu1 %vm275_vm0, %v9520_v6  ;;  %v16132_v6 = vld [vmem:[#allocation51_spill] sm:$0xff] }
 0x6ae   : > { %12673 = vmatpush3.xpose.msk.msra.mxu0 %vm275_vm0, %v9598_v43  ;;  %12669 = vmatprep.mubr.msk.f32.mxu1 %vm13338_vm1, %v16038_v22 }
 0x6af   : > { %12674 = vmatprep.mubr.msk.f32.mxu0 %vm13338_vm1, %v16038_v22  ;;  %12677 = vmatprep.subr.mxu1 %v16038_v22 }
 0x6b0   : > { %12682 = vmatprep.subr.mxu0 %v16038_v22  ;;  %12670 = vmatmul.mubr.msk.f32.vlgmr.msra.gmra.mrb[140].mxu1 %vm275_vm0, %v9518_v46 }
 0x6b1   : > { %12675 = vmatmul.mubr.msk.f32.vlgmr.msra.gmra.mrb[126].mxu0 %vm275_vm0, %v9596_v19  ;;  %12678 = vmatpush3.xpose.msk.msra.mxu1 %vm275_vm0, %v9676_v52  ;;  %v16134_v52 = vld [vmem:[#allocation53_spill] sm:$0xff] }
 0x6b2   : > { %12683 = vmatpush3.msra.mxu0 %v9928_v21  ;;  %12679 = vmatprep.mubr.msk.f32.mxu1 %vm13338_vm1, %v16038_v22  ;;  %v16135_v21 = vld [vmem:[#allocation54_spill] sm:$0xff] }
 0x6b3   : > { %12687 = vmatprep.subr.mxu1 %v16038_v22  ;;  %12684 = vmatprep.mubr.msk.f32.mxu0 %vm13338_vm1, %v16038_v22 }
 0x6b4   : > { %12680 = vmatmul.mubr.msk.f32.vlgmr.msra.gmra.mrb[142].mxu1 %vm275_vm0, %v9674_v28  ;;  %12692 = vmatprep.subr.mxu0 %v16038_v22 }
 0x6b5   : > { %12688 = vmatpush3.msra.mxu1 %v10004_v8  ;;  %12689 = vmatprep.mubr.msk.f32.mxu1 %vm13338_vm1, %v16038_v22 }
 0x6b6   : > { %12697 = vmatprep.subr.mxu1 %v16038_v22 }
 0x716   : > { %v7343_v39 = vpop.f32.mrb[96].mxu0 }
 0x717   : > { %v15328_v63 = vadd.f32 %v7343_v39, %v16120_v55  ;;  %v12526_v32 = vpop.f32.mrb[97].mxu0  ;;  %v7419_v54 = vpop.f32.mrb[112].mxu1 }
 0x718   : > { %v15331_v47 = vadd.f32 %v7419_v54, %v16121_v27  ;;  %v12531_v9 = vpop.f32.mrb[113].mxu1 }
 0x71a   : > { %v7495_v23 = vpop.f32.mrb[98].mxu0 }
 0x71b   : > { %v15334_v16 = vadd.f32 %v7495_v23, %v16122_v2  ;;  %v12536_v62 = vpop.f32.mrb[99].mxu0 }
 0x71e   : > { %v7571_v37 = vpop.f32.mrb[114].mxu1 }
 0x71f   : > { %v15337_v20 = vadd.f32 %v7571_v37, %v16123_v49  ;;  %v7647_v11 = vpop.f32.mrb[100].mxu0  ;;  %v12541_v30 = vpop.f32.mrb[115].mxu1 }
 0x720   : > { %v15340_v18 = vadd.f32 %v7647_v11, %v16124_v51  ;;  %v12546_v41 = vpop.f32.mrb[101].mxu0 }
 0x722   : > { %v7723_v29 = vpop.f32.mrb[116].mxu1 }
 0x723   : > { %v15343_v26 = vadd.f32 %v7723_v29, %v16125_v34  ;;  %v7799_v53 = vpop.f32.mrb[102].mxu0  ;;  %v12551_v50 = vpop.f32.mrb[117].mxu1 }
 0x724   : > { %v15346_v60 = vadd.f32 %v7799_v53, %v16126_v33  ;;  %v12556_v24 = vpop.f32.mrb[103].mxu0 }
 0x726   : > { %v7875_v38 = vpop.f32.mrb[118].mxu1 }
 0x727   : > { %v15349_v61 = vadd.f32 %v7875_v38, %v16127_v35  ;;  %v7951_v5 = vpop.f32.mrb[104].mxu0  ;;  %v12561_v10 = vpop.f32.mrb[119].mxu1 }
 0x728   : > { %v15352_v48 = vadd.f32 %v7951_v5, %v16128_v0  ;;  %v12566_v44 = vpop.f32.mrb[105].mxu0 }
 0x72a   : > { %v8027_v13 = vpop.f32.mrb[120].mxu1 }
 0x72b   : > { %v15355_v12 = vadd.f32 %v8027_v13, %v16129_v17  ;;  %v8103_v1 = vpop.f32.mrb[106].mxu0  ;;  %v12571_v15 = vpop.f32.mrb[121].mxu1 }
 0x72c   : > { %v15358_v57 = vadd.f32 %v8103_v1, %v16130_v56  ;;  %v12576_v59 = vpop.f32.mrb[107].mxu0 }
 0x72e   : > { %v8179_v4 = vpop.f32.mrb[122].mxu1 }
 0x72f   : > { %v15361_v58 = vadd.f32 %v8179_v4, %v16131_v7  ;;  %v8255_v31 = vpop.f32.mrb[108].mxu0  ;;  %v12581_v45 = vpop.f32.mrb[123].mxu1 }
 0x730   : > { %v15364_v36 = vadd.f32 %v8255_v31, %v16132_v6  ;;  %v12586_v40 = vpop.f32.mrb[109].mxu0 }
 0x732   : > { %v8331_v25 = vpop.f32.mrb[124].mxu1 }
 0x733   : > { %v15367_v46 = vadd.f32 %v8331_v25, %v16133_v3  ;;  %v12591_v14 = vpop.f32.mrb[125].mxu1 }
 0x764   : > { %v8407_v42 = vpop.f32.mrb[110].mxu0 }
 0x765   : > { %v15370_v43 = vadd.f32 %v8407_v42, %v16134_v52  ;;  %v12596_v28 = vpop.f32.mrb[111].mxu0 }
 0x767   : > { %v8483_v19 = vpop.f32.mrb[126].mxu1 }
 0x768   : > { %v15373_v8 = vadd.f32 %v8483_v19, %v16135_v21  ;;  %v15375_v39 = vpop.f32.mrb[112].mxu0  ;;  %v12601_v55 = vpop.f32.mrb[127].mxu1 }
 0x769   : > { %v12606_v32 = vpop.f32.mrb[113].mxu0  ;;  %v9751_v54 = vsel %vm1846_vm2, %v15375_v39, -inf }
 0x76a   : > { %9752 = vmax.xlane.f32.xlu0 %v9751_v54  ;;  %v16136_v54 = vld [vmem:[#allocation42_spill] sm:$0xff] }
 0x76b   : > { %v15379_v27 = vpop.f32.mrb[128].mxu1 }
 0x76c   : > { %v15381_v9 = vpop.f32.mrb[114].mxu0  ;;  %v12611_v23 = vpop.f32.mrb[129].mxu1  ;;  %v9754_v2 = vsel %vm1846_vm2, %v15379_v27, -inf }
 0x76d   : > { %v12616_v62 = vpop.f32.mrb[115].mxu0  ;;  %9755 = vmax.xlane.f32.xlu1 %v9754_v2  ;;  %v9757_v37 = vsel %vm1846_vm2, %v15381_v9, -inf  ;;  %v16137_v23 = vld [vmem:[#allocation44_spill] sm:$0xff]  ;;  %v16138_v2 = vld [vmem:[#allocation43_spill] sm:$0xff] }
 0x76e   : > { %9758 = vmax.xlane.f32.xlu0 %v9757_v37  ;;  %v16139_v62 = vld [vmem:[#allocation45_spill] sm:$0xff]  ;;  %v15447_v37 = vpop.permute.xlu1 %10079 }
 0x76f   : > { %v15387_v49 = vpop.f32.mrb[130].mxu1 }
 0x770   : > { %v15389_v11 = vpop.f32.mrb[116].mxu0  ;;  %v12621_v30 = vpop.f32.mrb[131].mxu1  ;;  %v9760_v51 = vsel %vm1846_vm2, %v15387_v49, -inf }
 0x771   : > { %v12626_v41 = vpop.f32.mrb[117].mxu0  ;;  %v9763_v29 = vsel %vm1846_vm2, %v15389_v11, -inf }
 0x772   : > { %9761 = vmax.xlane.f32.xlu0 %v9760_v51  ;;  %9764 = vmax.xlane.f32.xlu1 %v9763_v29  ;;  %v15449_v30 = vpop.permute.xlu1 %10231  ;;  %v15451_v51 = vpop.permute.xlu0 %10155 }
 0x773   : > { %v15395_v34 = vpop.f32.mrb[132].mxu1 }
 0x774   : > { %v15397_v53 = vpop.f32.mrb[118].mxu0  ;;  %v12631_v50 = vpop.f32.mrb[133].mxu1  ;;  %v9766_v33 = vsel %vm1846_vm2, %v15395_v34, -inf }
 0x775   : > { %v12636_v24 = vpop.f32.mrb[119].mxu0  ;;  %v9769_v38 = vsel %vm1846_vm2, %v15397_v53, -inf }
 0x776   : > { %9767 = vmax.xlane.f32.xlu0 %v9766_v33  ;;  %9770 = vmax.xlane.f32.xlu1 %v9769_v38  ;;  %v15453_v41 = vpop.permute.xlu1 %10307  ;;  %v15455_v29 = vpop.permute.xlu0 %10383 }
 0x777   : > { %v15403_v35 = vpop.f32.mrb[134].mxu1 }
 0x778   : > { %v15405_v5 = vpop.f32.mrb[120].mxu0  ;;  %v12641_v10 = vpop.f32.mrb[135].mxu1  ;;  %v9772_v0 = vsel %vm1846_vm2, %v15403_v35, -inf }
 0x779   : > { %v12646_v44 = vpop.f32.mrb[121].mxu0  ;;  %v9775_v13 = vsel %vm1846_vm2, %v15405_v5, -inf }
 0x77a   : > { %9773 = vmax.xlane.f32.xlu0 %v9772_v0  ;;  %9776 = vmax.xlane.f32.xlu1 %v9775_v13  ;;  %v15457_v50 = vpop.permute.xlu1 %10459  ;;  %v15459_v33 = vpop.permute.xlu0 %10535 }
 0x77b   : > { %v15411_v17 = vpop.f32.mrb[136].mxu1 }
 0x77c   : > { %v15413_v1 = vpop.f32.mrb[122].mxu0  ;;  %v12651_v15 = vpop.f32.mrb[137].mxu1  ;;  %v9778_v56 = vsel %vm1846_vm2, %v15411_v17, -inf }
 0x77d   : > { %v12656_v59 = vpop.f32.mrb[123].mxu0  ;;  %v9781_v4 = vsel %vm1846_vm2, %v15413_v1, -inf }
 0x77e   : > { %9779 = vmax.xlane.f32.xlu0 %v9778_v56  ;;  %9782 = vmax.xlane.f32.xlu1 %v9781_v4  ;;  %v15461_v24 = vpop.permute.xlu1 %10611 }
 0x77f   : > { %v15419_v7 = vpop.f32.mrb[138].mxu1 }
 0x780   : > { %v15421_v31 = vpop.f32.mrb[124].mxu0  ;;  %v12661_v45 = vpop.f32.mrb[139].mxu1  ;;  %v9784_v6 = vsel %vm1846_vm2, %v15419_v7, -inf }
 0x781   : > { %v12666_v40 = vpop.f32.mrb[125].mxu0  ;;  %v9787_v25 = vsel %vm1846_vm2, %v15421_v31, -inf }
 0x782   : > { %9785 = vmax.xlane.f32.xlu0 %v9784_v6  ;;  %9788 = vmax.xlane.f32.xlu1 %v9787_v25 }
 0x783   : > { %v15427_v3 = vpop.f32.mrb[140].mxu1 }
 0x784   : > { %v15429_v14 = vpop.f32.mrb[126].mxu0  ;;  %v12671_v42 = vpop.f32.mrb[141].mxu1  ;;  %v9790_v52 = vsel %vm1846_vm2, %v15427_v3, -inf }
 0x785   : > { %v12676_v28 = vpop.f32.mrb[127].mxu0  ;;  %v9793_v19 = vsel %vm1846_vm2, %v15429_v14, -inf }
 0x786   : > { %9791 = vmax.xlane.f32.xlu0 %v9790_v52  ;;  %9794 = vmax.xlane.f32.xlu1 %v9793_v19 }
 0x787   : > { %v15435_v21 = vpop.f32.mrb[142].mxu1 }
 0x788   : > { %v12681_v55 = vpop.f32.mrb[143].mxu1  ;;  %v9796_v32 = vsel %vm1846_vm2, %v15435_v21, -inf }
 0x78a   : > { %9797 = vmax.xlane.f32.xlu0 %v9796_v32 }
 0x797   : > { %10763 = vrot.lane.b32.xlu1 %v16136_v54, %s13341_s7 }
 0x79b   : > { %10915 = vrot.lane.b32.xlu1 %v16137_v23, %s13341_s7 }
 0x7a0   : > { %10687 = vrot.lane.b32.xlu0 %v16138_v2, %s13341_s7 }
 0x7a4   : > { %10839 = vrot.lane.b32.xlu0 %v16139_v62, %s13341_s7 }
 0x7f7   : > { %v9753_v38 = vpop.xlane.xlu0 %9752 }
 0x7f8   : > { %v9799_v10 = vsub.f32 %v15375_v39, %v9753_v38 }
 0x7fa   : > { %v9815_v0 = vmul.f32 1.442695, %v9799_v10  ;;  %v9756_v44 = vpop.xlane.xlu1 %9755 }
 0x7fb   : > { %v9800_v13 = vsub.f32 %v15379_v27, %v9756_v44  ;;  %v9759_v15 = vpop.xlane.xlu0 %9758 }
 0x7fc   : > { %13092 = vpow2.f32 %v9815_v0  ;;  %v9801_v56 = vsub.f32 %v15381_v9, %v9759_v15 }
 0x7fd   : > { %v9817_v59 = vmul.f32 1.442695, %v9800_v13 }
 0x7fe   : > { %v9819_v4 = vmul.f32 1.442695, %v9801_v56 }
 0x7ff   : > { %13094 = vpow2.f32 %v9817_v59  ;;  %v9762_v45 = vpop.xlane.xlu0 %9761  ;;  %v9765_v6 = vpop.xlane.xlu1 %9764 }
 0x800   : > { %13096 = vpow2.f32 %v9819_v4  ;;  %v9802_v40 = vsub.f32 %v15387_v49, %v9762_v45  ;;  %v9803_v25 = vsub.f32 %v15389_v11, %v9765_v6 }
 0x802   : > { %v9821_v42 = vmul.f32 1.442695, %v9802_v40  ;;  %v9823_v39 = vmul.f32 1.442695, %v9803_v25 }
 0x803   : > { %v9768_v52 = vpop.xlane.xlu0 %9767  ;;  %v9771_v28 = vpop.xlane.xlu1 %9770 }
 0x804   : > { %13098 = vpow2.f32 %v9821_v42  ;;  %v9804_v27 = vsub.f32 %v15395_v34, %v9768_v52  ;;  %v9805_v19 = vsub.f32 %v15397_v53, %v9771_v28 }
 0x805   : > { %13100 = vpow2.f32 %v9823_v39 }
 0x806   : > { %v15470_v9 = vpop.eup %13092  ;;  %v9825_v55 = vmul.f32 1.442695, %v9804_v27  ;;  %v9827_v32 = vmul.f32 1.442695, %v9805_v19 }
 0x807   : > { %v9774_v54 = vpop.xlane.xlu0 %9773  ;;  %v9777_v23 = vpop.xlane.xlu1 %9776  ;;  %v9847_v49 = vsel %vm1846_vm2, %v15470_v9, 0.0 }
 0x808   : > { %13102 = vpow2.f32 %v9825_v55  ;;  %v9806_v11 = vsub.f32 %v15403_v35, %v9774_v54  ;;  %v9807_v2 = vsub.f32 %v15405_v5, %v9777_v23  ;;  %9848 = vadd.xlane.f32.xlu1 %v9847_v49 }
 0x809   : > { %v15476_v62 = vpop.eup %13094  ;;  %13104 = vpow2.f32 %v9827_v32 }
 0x80a   : > { %v15478_v34 = vpop.eup %13096  ;;  %v9829_v53 = vmul.f32 1.442695, %v9806_v11  ;;  %v9831_v38 = vmul.f32 1.442695, %v9807_v2  ;;  %v9850_v10 = vsel %vm1846_vm2, %v15476_v62, 0.0 }
 0x80b   : > { %v9780_v0 = vpop.xlane.xlu0 %9779  ;;  %v9783_v44 = vpop.xlane.xlu1 %9782  ;;  %9851 = vadd.xlane.f32.xlu0 %v9850_v10  ;;  %v9853_v13 = vsel %vm1846_vm2, %v15478_v34, 0.0 }
 0x80c   : > { %13106 = vpow2.f32 %v9829_v53  ;;  %v9808_v35 = vsub.f32 %v15411_v17, %v9780_v0  ;;  %v9809_v5 = vsub.f32 %v15413_v1, %v9783_v44  ;;  %9854 = vadd.xlane.f32.xlu1 %v9853_v13 }
 0x80d   : > { %13108 = vpow2.f32 %v9831_v38 }
 0x80e   : > { %v15486_v15 = vpop.eup %13098  ;;  %v9833_v56 = vmul.f32 1.442695, %v9808_v35  ;;  %v9835_v59 = vmul.f32 1.442695, %v9809_v5 }
 0x80f   : > { %v15488_v4 = vpop.eup %13100  ;;  %v9786_v45 = vpop.xlane.xlu0 %9785  ;;  %v9856_v40 = vsel %vm1846_vm2, %v15486_v15, 0.0 }
 0x810   : > { %v9789_v6 = vpop.xlane.xlu1 %9788  ;;  %13110 = vpow2.f32 %v9833_v56  ;;  %v9810_v25 = vsub.f32 %v15419_v7, %v9786_v45  ;;  %9857 = vadd.xlane.f32.xlu0 %v9856_v40  ;;  %v9859_v1 = vsel %vm1846_vm2, %v15488_v4, 0.0 }
 0x811   : > { %v9811_v17 = vsub.f32 %v15421_v31, %v9789_v6  ;;  %13112 = vpow2.f32 %v9835_v59  ;;  %9860 = vadd.xlane.f32.xlu1 %v9859_v1  ;;  %v16140_v1 = vld [vmem:[#allocation46_spill] sm:$0xff] }
 0x812   : > { %v15496_v42 = vpop.eup %13102  ;;  %v9837_v39 = vmul.f32 1.442695, %v9810_v25 }
 0x813   : > { %v9839_v52 = vmul.f32 1.442695, %v9811_v17  ;;  %v15498_v28 = vpop.eup %13104  ;;  %v9792_v27 = vpop.xlane.xlu0 %9791  ;;  %v9862_v55 = vsel %vm1846_vm2, %v15496_v42, 0.0 }
 0x814   : > { %v9795_v19 = vpop.xlane.xlu1 %9794  ;;  %13114 = vpow2.f32 %v9837_v39  ;;  %v9812_v7 = vsub.f32 %v15427_v3, %v9792_v27  ;;  %9863 = vadd.xlane.f32.xlu0 %v9862_v55  ;;  %v9865_v32 = vsel %vm1846_vm2, %v15498_v28, 0.0  ;;  %v16141_v39 = vld [vmem:[#allocation47_spill] sm:$0xff] }
 0x815   : > { %v9813_v31 = vsub.f32 %v15429_v14, %v9795_v19  ;;  %13116 = vpow2.f32 %v9839_v52  ;;  %9866 = vadd.xlane.f32.xlu1 %v9865_v32 }
 0x816   : > { %v15506_v54 = vpop.eup %13106  ;;  %v9841_v23 = vmul.f32 1.442695, %v9812_v7 }
 0x817   : > { %v9843_v49 = vmul.f32 1.442695, %v9813_v31  ;;  %v15508_v11 = vpop.eup %13108  ;;  %v9798_v2 = vpop.xlane.xlu0 %9797  ;;  %v9868_v53 = vsel %vm1846_vm2, %v15506_v54, 0.0 }
 0x818   : > { %13118 = vpow2.f32 %v9841_v23  ;;  %v9814_v3 = vsub.f32 %v15435_v21, %v9798_v2  ;;  %9869 = vadd.xlane.f32.xlu0 %v9868_v53  ;;  %v9871_v14 = vsel %vm1846_vm2, %v15508_v11, 0.0  ;;  %v15547_v52 = vpop.permute.xlu1 %10763 }
 0x819   : > { %13120 = vpow2.f32 %v9843_v49  ;;  %9872 = vadd.xlane.f32.xlu1 %v9871_v14 }
 0x81a   : > { %v15515_v38 = vpop.eup %13110  ;;  %v9845_v10 = vmul.f32 1.442695, %v9814_v3 }
 0x81b   : > { %v15517_v0 = vpop.eup %13112  ;;  %v9874_v44 = vsel %vm1846_vm2, %v15515_v38, 0.0  ;;  %v15549_v27 = vpop.permute.xlu0 %10687 }
 0x81c   : > { %13122 = vpow2.f32 %v9845_v10  ;;  %9875 = vadd.xlane.f32.xlu0 %v9874_v44  ;;  %v9877_v13 = vsel %vm1846_vm2, %v15517_v0, 0.0  ;;  %v15551_v19 = vpop.permute.xlu1 %10915 }
 0x81d   : > { %9878 = vadd.xlane.f32.xlu1 %v9877_v13 }
 0x81e   : > { %v15523_v21 = vpop.eup %13114 }
 0x81f   : > { %v15525_v35 = vpop.eup %13116  ;;  %v9880_v5 = vsel %vm1846_vm2, %v15523_v21, 0.0  ;;  %v15553_v55 = vpop.permute.xlu0 %10839 }
 0x820   : > { %9881 = vadd.xlane.f32.xlu0 %v9880_v5  ;;  %v9883_v56 = vsel %vm1846_vm2, %v15525_v35, 0.0 }
 0x821   : > { %9884 = vadd.xlane.f32.xlu1 %v9883_v56 }
 0x822   : > { %v15531_v59 = vpop.eup %13118 }
 0x823   : > { %v15533_v45 = vpop.eup %13120  ;;  %v9886_v6 = vsel %vm1846_vm2, %v15531_v59, 0.0 }
 0x824   : > { %9887 = vadd.xlane.f32.xlu0 %v9886_v6  ;;  %v9889_v40 = vsel %vm1846_vm2, %v15533_v45, 0.0 }
 0x825   : > { %9890 = vadd.xlane.f32.xlu1 %v9889_v40 }
 0x826   : > { %v15539_v25 = vpop.eup %13122 }
 0x827   : > { %v9892_v17 = vsel %vm1846_vm2, %v15539_v25, 0.0 }
 0x828   : > { %9893 = vadd.xlane.f32.xlu0 %v9892_v17 }
 0x836   : > { %11067 = vrot.lane.b32.xlu1 %v16140_v1, %s13341_s7 }
 0x83e   : > { %10991 = vrot.lane.b32.xlu0 %v16141_v39, %s13341_s7 }
 0x895   : > { %v9849_v7 = vpop.xlane.xlu1 %9848 }
 0x896   : > { %13124 = vrcp.f32 %v9849_v7 }
 0x898   : > { %v9852_v31 = vpop.xlane.xlu0 %9851 }
 0x899   : > { %13126 = vrcp.f32 %v9852_v31  ;;  %v9855_v32 = vpop.xlane.xlu1 %9854 }
 0x89a   : > { %13128 = vrcp.f32 %v9855_v32 }
 0x89d   : > { %v9858_v23 = vpop.xlane.xlu0 %9857 }
 0x89e   : > { %13130 = vrcp.f32 %v9858_v23  ;;  %v9861_v49 = vpop.xlane.xlu1 %9860 }
 0x89f   : > { %13132 = vrcp.f32 %v9861_v49 }
 0x8a0   : > { %v13125_v2 = vpop.eup %13124 }
 0x8a1   : > { %v9911_v53 = vmul.f32 %v13125_v2, %v15470_v9  ;;  %v9864_v3 = vpop.xlane.xlu0 %9863 }
 0x8a2   : > { %13134 = vrcp.f32 %v9864_v3  ;;  %v9867_v14 = vpop.xlane.xlu1 %9866  ;;  %v11177_v3 = vld [vmem:[#allocation7 + $0x10] sm:$0xff] }
 0x8a3   : > { %v13127_v10 = vpop.eup %13126  ;;  %13136 = vrcp.f32 %v9867_v14  ;;  %12685 = vmatmul.mubr.msk.f32.vlgmr.msra.gmra.mrb[128].mxu0 %vm1846_vm2, %v9911_v53  ;;  %v11178_v14 = vld [vmem:[#allocation7 + $0x18] sm:$0xff] }
 0x8a4   : > { %v13129_v44 = vpop.eup %13128  ;;  %v9912_v13 = vmul.f32 %v13127_v10, %v15476_v62  ;;  %12693 = vmatpush3.msra.mxu0 %v15447_v37  ;;  %12694 = vmatprep.mubr.msk.f32.mxu0 %vm13338_vm1, %v16038_v22  ;;  %v12814_v10 = vpack.c.bf16 %v11178_v14, %v11177_v3 }
 0x8a5   : > { %v9913_v5 = vmul.f32 %v13129_v44, %v15478_v34  ;;  %v9870_v56 = vpop.xlane.xlu0 %9869  ;;  %12702 = vmatprep.subr.mxu0 %v16038_v22 }
 0x8a6   : > { %13138 = vrcp.f32 %v9870_v56  ;;  %v9873_v9 = vpop.xlane.xlu1 %9872  ;;  %12690 = vmatmul.mubr.msk.f32.vlgmr.msra.gmra.mrb[144].mxu1 %vm1846_vm2, %v9912_v13 }
 0x8a7   : > { %13140 = vrcp.f32 %v9873_v9  ;;  %12695 = vmatmul.mubr.msk.f32.vlgmr.msra.gmra.mrb[130].mxu0 %vm1846_vm2, %v9913_v5  ;;  %12698 = vmatpush3.msra.mxu1 %v15451_v51  ;;  %v15641_v5 = vld [vmem:[%s13554_s25] sm:$0xff] }
 0x8a8   : > { %v13131_v62 = vpop.eup %13130  ;;  %12703 = vmatpush3.msra.mxu0 %v15449_v30  ;;  %12699 = vmatprep.mubr.msk.f32.mxu1 %vm13338_vm1, %v16038_v22 }
 0x8a9   : > { %v13133_v37 = vpop.eup %13132  ;;  %v9914_v34 = vmul.f32 %v13131_v62, %v15486_v15  ;;  %v9876_v6 = vpop.xlane.xlu0 %9875  ;;  %12704 = vmatprep.mubr.msk.f32.mxu0 %vm13338_vm1, %v16038_v22  ;;  %12707 = vmatprep.subr.mxu1 %v16038_v22 }
 0x8aa   : > { %v9915_v40 = vmul.f32 %v13133_v37, %v15488_v4  ;;  %13142 = vrcp.f32 %v9876_v6  ;;  %v9879_v17 = vpop.xlane.xlu1 %9878  ;;  %12712 = vmatprep.subr.mxu0 %v16038_v22 }
 0x8ab   : > { %13144 = vrcp.f32 %v9879_v17  ;;  %12700 = vmatmul.mubr.msk.f32.vlgmr.msra.gmra.mrb[146].mxu1 %vm1846_vm2, %v9914_v34  ;;  %v15652_v17 = vld [vmem:[%s13554_s25 + $0x10] sm:$0xff] }
 0x8ac   : > { %v13135_v30 = vpop.eup %13134  ;;  %12705 = vmatmul.mubr.msk.f32.vlgmr.msra.gmra.mrb[132].mxu0 %vm1846_vm2, %v9915_v40  ;;  %12708 = vmatpush3.msra.mxu1 %v15453_v41  ;;  %v15648_v40 = vld [vmem:[%s13554_s25 + $0x8] sm:$0xff] }
 0x8ad   : > { %v13137_v51 = vpop.eup %13136  ;;  %v9916_v15 = vmul.f32 %v13135_v30, %v15496_v42  ;;  %12713 = vmatpush3.msra.mxu0 %v15455_v29  ;;  %v9882_v1 = vpop.xlane.xlu0 %9881  ;;  %12709 = vmatprep.mubr.msk.f32.mxu1 %vm13338_vm1, %v16038_v22 }
 0x8ae   : > { %v9917_v4 = vmul.f32 %v13137_v51, %v15498_v28  ;;  %13146 = vrcp.f32 %v9882_v1  ;;  %v9885_v39 = vpop.xlane.xlu1 %9884  ;;  %12714 = vmatprep.mubr.msk.f32.mxu0 %vm13338_vm1, %v16038_v22  ;;  %12717 = vmatprep.subr.mxu1 %v16038_v22 }
 0x8af   : > { %13148 = vrcp.f32 %v9885_v39  ;;  %12722 = vmatprep.subr.mxu0 %v16038_v22  ;;  %12710 = vmatmul.mubr.msk.f32.vlgmr.msra.gmra.mrb[148].mxu1 %vm1846_vm2, %v9916_v15  ;;  %v15660_v39 = vld [vmem:[%s13554_s25 + $0x18] sm:$0xff] }
 0x8b0   : > { %v13139_v41 = vpop.eup %13138  ;;  %12715 = vmatmul.mubr.msk.f32.vlgmr.msra.gmra.mrb[134].mxu0 %vm1846_vm2, %v9917_v4  ;;  %12718 = vmatpush3.msra.mxu1 %v15457_v50 }
 0x8b1   : > { %v13141_v29 = vpop.eup %13140  ;;  %v9918_v42 = vmul.f32 %v13139_v41, %v15506_v54  ;;  %12723 = vmatpush3.msra.mxu0 %v15459_v33  ;;  %v9888_v28 = vpop.xlane.xlu0 %9887  ;;  %12719 = vmatprep.mubr.msk.f32.mxu1 %vm13338_vm1, %v16038_v22 }
 0x8b2   : > { %v9919_v7 = vmul.f32 %v13141_v29, %v15508_v11  ;;  %13150 = vrcp.f32 %v9888_v28  ;;  %v9891_v31 = vpop.xlane.xlu1 %9890  ;;  %12724 = vmatprep.mubr.msk.f32.mxu0 %vm13338_vm1, %v16038_v22  ;;  %12727 = vmatprep.subr.mxu1 %v16038_v22  ;;  %v15664_v29 = vld [vmem:[%s13554_s25 + $0x20] sm:$0xff] }
 0x8b3   : > { %13152 = vrcp.f32 %v9891_v31  ;;  %12732 = vmatprep.subr.mxu0 %v16038_v22  ;;  %12720 = vmatmul.mubr.msk.f32.vlgmr.msra.gmra.mrb[150].mxu1 %vm1846_vm2, %v9918_v42 }
 0x8b4   : > { %v13143_v50 = vpop.eup %13142  ;;  %12725 = vmatmul.mubr.msk.f32.vlgmr.msra.gmra.mrb[136].mxu0 %vm1846_vm2, %v9919_v7  ;;  %12728 = vmatpush3.msra.mxu1 %v15461_v24 }
 0x8b5   : > { %v13145_v33 = vpop.eup %13144  ;;  %v9920_v54 = vmul.f32 %v13143_v50, %v15515_v38  ;;  %12733 = vmatpush3.msra.mxu0 %v15549_v27  ;;  %v9894_v11 = vpop.xlane.xlu0 %9893  ;;  %12729 = vmatprep.mubr.msk.f32.mxu1 %vm13338_vm1, %v16038_v22 }
 0x8b6   : > { %v9921_v32 = vmul.f32 %v13145_v33, %v15517_v0  ;;  %13154 = vrcp.f32 %v9894_v11  ;;  %12734 = vmatprep.mubr.msk.f32.mxu0 %vm13338_vm1, %v16038_v22  ;;  %12737 = vmatprep.subr.mxu1 %v16038_v22  ;;  %v11068_v49 = vpop.permute.xlu1 %11067  ;;  %v15672_v33 = vld [vmem:[%s13554_s25 + $0x28] sm:$0xff]  ;;  %v15676_v11 = vld [vmem:[%s13554_s25 + $0x30] sm:$0xff] }
 0x8b7   : > { %12742 = vmatprep.subr.mxu0 %v16038_v22  ;;  %12730 = vmatmul.mubr.msk.f32.vlgmr.msra.gmra.mrb[152].mxu1 %vm1846_vm2, %v9920_v54 }
 0x8b8   : > { %v13147_v24 = vpop.eup %13146  ;;  %12735 = vmatmul.mubr.msk.f32.vlgmr.msra.gmra.mrb[138].mxu0 %vm1846_vm2, %v9921_v32  ;;  %12738 = vmatpush3.msra.mxu1 %v15547_v52 }
 0x8b9   : > { %v13149_v38 = vpop.eup %13148  ;;  %v9922_v27 = vmul.f32 %v13147_v24, %v15523_v21  ;;  %12743 = vmatpush3.msra.mxu0 %v15553_v55  ;;  %12739 = vmatprep.mubr.msk.f32.mxu1 %vm13338_vm1, %v16038_v22  ;;  %v10992_v23 = vpop.permute.xlu0 %10991 }
 0x8ba   : > { %v9923_v0 = vmul.f32 %v13149_v38, %v15525_v35  ;;  %12744 = vmatprep.mubr.msk.f32.mxu0 %vm13338_vm1, %v16038_v22  ;;  %12747 = vmatprep.subr.mxu1 %v16038_v22 }
 0x8bb   : > { %12752 = vmatprep.subr.mxu0 %v16038_v22  ;;  %12740 = vmatmul.mubr.msk.f32.vlgmr.msra.gmra.mrb[154].mxu1 %vm1846_vm2, %v9922_v27 }
 0x8bc   : > { %v13151_v52 = vpop.eup %13150  ;;  %12745 = vmatmul.mubr.msk.f32.vlgmr.msra.gmra.mrb[140].mxu0 %vm1846_vm2, %v9923_v0  ;;  %12748 = vmatpush3.msra.mxu1 %v15551_v19  ;;  %v11176_v19 = vld [vmem:[#allocation7 + $0x8] sm:$0xff] }
 0x8bd   : > { %v13153_v21 = vpop.eup %13152  ;;  %v9924_v55 = vmul.f32 %v13151_v52, %v15531_v59  ;;  %12753 = vmatpush3.msra.mxu0 %v10992_v23  ;;  %12749 = vmatprep.mubr.msk.f32.mxu1 %vm13338_vm1, %v16038_v22  ;;  %v15684_v23 = vld [vmem:[%s13554_s25 + $0x38] sm:$0xff] }
 0x8be   : > { %v9925_v35 = vmul.f32 %v13153_v21, %v15533_v45  ;;  %12754 = vmatprep.mubr.msk.f32.mxu0 %vm13338_vm1, %v16038_v22  ;;  %12757 = vmatprep.subr.mxu1 %v16038_v22  ;;  %v11175_v45 = vld [vmem:[#allocation7] sm:$0xff] }
 0x8bf   : > { %12750 = vmatmul.mubr.msk.f32.vlgmr.msra.gmra.mrb[156].mxu1 %vm1846_vm2, %v9924_v55  ;;  %v12810_v53 = vpack.c.bf16 %v11176_v19, %v11175_v45  ;;  %v15688_v21 = vld [vmem:[%s13554_s25 + $0x40] sm:$0xff]  ;;  %v15696_v45 = vld [vmem:[%s13554_s25 + $0x48] sm:$0xff] }
 0x8c0   : > { %v13155_v2 = vpop.eup %13154  ;;  %12755 = vmatmul.mubr.msk.f32.vlgmr.msra.gmra.mrb[142].mxu0 %vm1846_vm2, %v9925_v35  ;;  %12758 = vmatpush3.msra.mxu1 %v11068_v49 }
 0x8c1   : > { %v9926_v59 = vmul.f32 %v13155_v2, %v15539_v25  ;;  %12759 = vmatprep.mubr.msk.f32.mxu1 %vm13338_vm1, %v16038_v22  ;;  %12811 = vmatprep.subr.bf16.mxu0 %v12810_v53 }
 0x8c2   : > { %12813 = vmatpush3.bf16.msra.mxu0 %v12810_v53  ;;  %v15700_v53 = vld [vmem:[%s13554_s25 + $0x50] sm:$0xff] }
 0x8c3   : > { %12760 = vmatmul.mubr.msk.f32.vlgmr.msra.gmra.mrb[158].mxu1 %vm1846_vm2, %v9926_v59  ;;  %12815 = vmatprep.subr.bf16.mxu0 %v12814_v10 }
 0x8c6   : > { %12817 = vmatpush3.bf16.msra.mxu0 %v12814_v10 }
 0x976   : > { %v9999_v44 = vpop.f32.mrb[128].mxu0 }
 0x977   : > { %v11143_v25 = vadd.f32 %v9999_v44, %v15328_v63  ;;  %v12686_v13 = vpop.f32.mrb[129].mxu0 }
 0x978   : > { %v15708_v13 = vld [vmem:[%s13554_s25 + $0x58] sm:$0xff] }
 0x979   : > { %v11159_v22 = vadd.f32 %v15641_v5, %v11143_v25  ;;  %v10075_v56 = vpop.f32.mrb[144].mxu1 }
 0x97a   : > { %v11144_v9 = vadd.f32 %v10075_v56, %v15331_v47  ;;  %v10151_v62 = vpop.f32.mrb[130].mxu0  ;;  %v12691_v37 = vpop.f32.mrb[145].mxu1  ;;  %v15712_v56 = vld [vmem:[%s13554_s25 + $0x60] sm:$0xff] }
 0x97b   : > { %v11145_v34 = vadd.f32 %v10151_v62, %v15334_v16  ;;  %v12696_v6 = vpop.f32.mrb[131].mxu0  ;;  %12770 = vmatprep.mubr.msk.f32.mxu0 %vm275_vm0, %v11159_v22 }
 0x97c   : > { %v11160_v63 = vadd.f32 %v15648_v40, %v11144_v9 }
 0x97d   : > { %v11161_v30 = vadd.f32 %v15652_v17, %v11145_v34 }
 0x97e   : > { %v10227_v51 = vpop.f32.mrb[146].mxu1  ;;  %12771 = vmatmul.mubr.msk.f32.vlgmr.msra.gmra.mrb[144].mxu0 %vm275_vm0, %v11160_v63  ;;  %v15720_v63 = vld [vmem:[%s13554_s25 + $0x68] sm:$0xff] }
 0x97f   : > { %v11146_v47 = vadd.f32 %v10227_v51, %v15337_v20  ;;  %v10303_v15 = vpop.f32.mrb[132].mxu0  ;;  %v12701_v1 = vpop.f32.mrb[147].mxu1  ;;  %12773 = vmatprep.mubr.msk.f32.mxu0 %vm275_vm0, %v11161_v30  ;;  %v15724_v51 = vld [vmem:[%s13554_s25 + $0x70] sm:$0xff] }
 0x980   : > { %v11147_v16 = vadd.f32 %v10303_v15, %v15340_v18  ;;  %v12706_v4 = vpop.f32.mrb[133].mxu0 }
 0x981   : > { %v11162_v41 = vadd.f32 %v15660_v39, %v11146_v47  ;;  %v15738_v4 = vld [vmem:[%s15862_s3] ss:$0 sm:$0xff] }
 0x982   : > { %v11163_v42 = vadd.f32 %v15664_v29, %v11147_v16  ;;  %v10379_v28 = vpop.f32.mrb[148].mxu1 }
 0x983   : > { %v11148_v20 = vadd.f32 %v10379_v28, %v15343_v26  ;;  %v10455_v7 = vpop.f32.mrb[134].mxu0  ;;  %v12711_v31 = vpop.f32.mrb[149].mxu1  ;;  %12774 = vmatmul.mubr.msk.f32.gmra.mrb[146].mxu0 %vm275_vm0, %v11162_v41 }
 0x984   : > { %v11149_v18 = vadd.f32 %v10455_v7, %v15346_v60  ;;  %v12716_v50 = vpop.f32.mrb[135].mxu0  ;;  %12776 = vmatprep.mubr.msk.f32.mxu0 %vm275_vm0, %v11163_v42 }
 0x985   : > { %v11164_v54 = vadd.f32 %v15672_v33, %v11148_v20 }
 0x986   : > { %v11165_v32 = vadd.f32 %v15676_v11, %v11149_v18  ;;  %v10531_v26 = vpop.f32.mrb[150].mxu1 }
 0x987   : > { %v11150_v24 = vadd.f32 %v10531_v26, %v15349_v61  ;;  %v10607_v38 = vpop.f32.mrb[136].mxu0  ;;  %v12721_v27 = vpop.f32.mrb[151].mxu1  ;;  %12777 = vmatmul.mubr.msk.f32.gmra.mrb[148].mxu0 %vm275_vm0, %v11164_v54 }
 0x988   : > { %v11151_v60 = vadd.f32 %v10607_v38, %v15352_v48  ;;  %v12726_v0 = vpop.f32.mrb[137].mxu0  ;;  %12779 = vmatprep.mubr.msk.f32.mxu0 %vm275_vm0, %v11165_v32 }
 0x989   : > { %v11166_v52 = vadd.f32 %v15684_v23, %v11150_v24 }
 0x98a   : > { %v11167_v55 = vadd.f32 %v15688_v21, %v11151_v60  ;;  %v10683_v61 = vpop.f32.mrb[152].mxu1 }
 0x98b   : > { %v11152_v35 = vadd.f32 %v10683_v61, %v15355_v12  ;;  %v10759_v49 = vpop.f32.mrb[138].mxu0  ;;  %v12731_v2 = vpop.f32.mrb[153].mxu1  ;;  %12780 = vmatmul.mubr.msk.f32.gmra.mrb[150].mxu0 %vm275_vm0, %v11166_v52 }
 0x98c   : > { %v11153_v48 = vadd.f32 %v10759_v49, %v15358_v57  ;;  %v12736_v59 = vpop.f32.mrb[139].mxu0  ;;  %12782 = vmatprep.mubr.msk.f32.mxu0 %vm275_vm0, %v11167_v55 }
 0x98d   : > { %v11168_v19 = vadd.f32 %v15696_v45, %v11152_v35 }
 0x98e   : > { %v11169_v3 = vadd.f32 %v15700_v53, %v11153_v48  ;;  %v10835_v12 = vpop.f32.mrb[154].mxu1 }
 0x98f   : > { %v11154_v14 = vadd.f32 %v10835_v12, %v15361_v58  ;;  %v10911_v10 = vpop.f32.mrb[140].mxu0  ;;  %v12741_v44 = vpop.f32.mrb[155].mxu1  ;;  %12783 = vmatmul.mubr.msk.f32.gmra.mrb[152].mxu0 %vm275_vm0, %v11168_v19 }
 0x990   : > { %v11155_v57 = vadd.f32 %v10911_v10, %v15364_v36  ;;  %v12746_v25 = vpop.f32.mrb[141].mxu0  ;;  %12785 = vmatprep.mubr.msk.f32.mxu0 %vm275_vm0, %v11169_v3 }
 0x991   : > { %v11170_v22 = vadd.f32 %v15708_v13, %v11154_v14 }
 0x992   : > { %v11171_v9 = vadd.f32 %v15712_v56, %v11155_v57  ;;  %v10987_v58 = vpop.f32.mrb[156].mxu1 }
 0x993   : > { %v11156_v62 = vadd.f32 %v10987_v58, %v15367_v46  ;;  %v11063_v37 = vpop.f32.mrb[142].mxu0  ;;  %v12751_v34 = vpop.f32.mrb[157].mxu1  ;;  %12786 = vmatmul.mubr.msk.f32.gmra.mrb[154].mxu0 %vm275_vm0, %v11170_v22 }
 0x994   : > { %v11157_v36 = vadd.f32 %v11063_v37, %v15370_v43  ;;  %v12756_v6 = vpop.f32.mrb[143].mxu0  ;;  %12788 = vmatprep.mubr.msk.f32.mxu0 %vm275_vm0, %v11171_v9  ;;  %v15731_v43 = vld [vmem:[%s13554_s25 + $0x78] sm:$0xff] }
 0x995   : > { %v11172_v30 = vadd.f32 %v15720_v63, %v11156_v62 }
 0x996   : > { %v11173_v47 = vadd.f32 %v15724_v51, %v11157_v36  ;;  %v11139_v15 = vpop.f32.mrb[158].mxu1 }
 0x997   : > { %v11158_v46 = vadd.f32 %v11139_v15, %v15373_v8  ;;  %v12761_v1 = vpop.f32.mrb[159].mxu1  ;;  %12789 = vmatmul.mubr.msk.f32.gmra.mrb[156].mxu0 %vm275_vm0, %v11172_v30 }
 0x998   : > { %12791 = vmatprep.mubr.msk.f32.mxu0 %vm275_vm0, %v11173_v47 }
 0x999   : > { %v11174_v16 = vadd.f32 %v15731_v43, %v11158_v46 }
 0x99b   : > { %12792 = vmatmul.mubr.msk.f32.gmra.mrb[158].mxu0 %vm275_vm0, %v11174_v16 }
 0xa51   : > { %v12772_v41 = vpop.f32.mrb[144].mxu0 }
 0xa52   : > { %v11306_v8 = vadd.f32 %v12772_v41, %v15738_v4  ;;  %v11300_v42 = vpop.f32.mrb[145].mxu0 }
 0xa53   : > { %v11301_v28 = vadd.f32 %v15738_v4, %v11300_v42 }
 0xa54   : > { %v11380_v20 = vmax.f32 %v11306_v8, 0.0 }
 0xa55   : > { %v11379_v7 = vmax.f32 %v11301_v28, 0.0 }
 0xa56   : > { %v11396_v31 = vadd.f32 %v15648_v40, %v11380_v20  ;;  %v12775_v18 = vpop.f32.mrb[146].mxu0 }
 0xa57   : > { %v11395_v50 = vadd.f32 %v15641_v5, %v11379_v7  ;;  %v11316_v54 = vadd.f32 %v12775_v18, %v15738_v4  ;;  %v11310_v32 = vpop.f32.mrb[147].mxu0 }
 0xa58   : > { %11412 = vst.msk [vmem:[%s15747_s6 + $0x8] sm:$0xff] %vm275_vm0, %v11396_v31  ;;  %v11311_v26 = vadd.f32 %v15738_v4, %v11310_v32 }
 0xa59   : > { %11411 = vst.msk [vmem:[%s15747_s6] sm:$0xff] %vm275_vm0, %v11395_v50  ;;  %v11382_v40 = vmax.f32 %v11316_v54, 0.0 }
 0xa5a   : > { %v11381_v24 = vmax.f32 %v11311_v26, 0.0  ;;  %v12778_v38 = vpop.f32.mrb[148].mxu0 }
 0xa5b   : > { %v11398_v5 = vadd.f32 %v15660_v39, %v11382_v40  ;;  %v11326_v27 = vadd.f32 %v12778_v38, %v15738_v4  ;;  %v11320_v60 = vpop.f32.mrb[149].mxu0 }
 0xa5c   : > { %v11397_v0 = vadd.f32 %v15652_v17, %v11381_v24  ;;  %v11321_v52 = vadd.f32 %v15738_v4, %v11320_v60 }
 0xa5d   : > { %11414 = vst.msk [vmem:[%s15747_s6 + $0x18] sm:$0xff] %vm275_vm0, %v11398_v5  ;;  %v11384_v55 = vmax.f32 %v11326_v27, 0.0 }
 0xa5e   : > { %11413 = vst.msk [vmem:[%s15747_s6 + $0x10] sm:$0xff] %vm275_vm0, %v11397_v0  ;;  %v11383_v61 = vmax.f32 %v11321_v52, 0.0  ;;  %v12781_v35 = vpop.f32.mrb[150].mxu0 }
 0xa5f   : > { %v11400_v49 = vadd.f32 %v15672_v33, %v11384_v55  ;;  %v11336_v39 = vadd.f32 %v12781_v35, %v15738_v4  ;;  %v11330_v2 = vpop.f32.mrb[151].mxu0 }
 0xa60   : > { %v11399_v48 = vadd.f32 %v15664_v29, %v11383_v61  ;;  %v11331_v17 = vadd.f32 %v15738_v4, %v11330_v2 }
 0xa61   : > { %11416 = vst.msk [vmem:[%s15747_s6 + $0x28] sm:$0xff] %vm275_vm0, %v11400_v49  ;;  %v11386_v59 = vmax.f32 %v11336_v39, 0.0 }
 0xa62   : > { %11415 = vst.msk [vmem:[%s15747_s6 + $0x20] sm:$0xff] %vm275_vm0, %v11399_v48  ;;  %v11385_v19 = vmax.f32 %v11331_v17, 0.0  ;;  %v12784_v3 = vpop.f32.mrb[152].mxu0 }
 0xa63   : > { %v11402_v12 = vadd.f32 %v15684_v23, %v11386_v59  ;;  %v11346_v33 = vadd.f32 %v12784_v3, %v15738_v4  ;;  %v11340_v14 = vpop.f32.mrb[153].mxu0 }
 0xa64   : > { %v11401_v10 = vadd.f32 %v15676_v11, %v11385_v19  ;;  %v11341_v29 = vadd.f32 %v15738_v4, %v11340_v14 }
 0xa65   : > { %11418 = vst.msk [vmem:[%s15747_s6 + $0x38] sm:$0xff] %vm275_vm0, %v11402_v12  ;;  %v11388_v44 = vmax.f32 %v11346_v33, 0.0 }
 0xa66   : > { %11417 = vst.msk [vmem:[%s15747_s6 + $0x30] sm:$0xff] %vm275_vm0, %v11401_v10  ;;  %v11387_v57 = vmax.f32 %v11341_v29, 0.0  ;;  %v12787_v25 = vpop.f32.mrb[154].mxu0 }
 0xa67   : > { %v11404_v22 = vadd.f32 %v15696_v45, %v11388_v44  ;;  %v11356_v23 = vadd.f32 %v12787_v25, %v15738_v4  ;;  %v11350_v9 = vpop.f32.mrb[155].mxu0 }
 0xa68   : > { %v11403_v58 = vadd.f32 %v15688_v21, %v11387_v57  ;;  %v11351_v11 = vadd.f32 %v15738_v4, %v11350_v9 }
 0xa69   : > { %11420 = vst.msk [vmem:[%s15747_s6 + $0x48] sm:$0xff] %vm275_vm0, %v11404_v22  ;;  %v11390_v62 = vmax.f32 %v11356_v23, 0.0 }
 0xa6a   : > { %11419 = vst.msk [vmem:[%s15747_s6 + $0x40] sm:$0xff] %vm275_vm0, %v11403_v58  ;;  %v11389_v37 = vmax.f32 %v11351_v11, 0.0  ;;  %v12790_v34 = vpop.f32.mrb[156].mxu0 }
 0xa6b   : > { %v11406_v36 = vadd.f32 %v15708_v13, %v11390_v62  ;;  %v11366_v45 = vadd.f32 %v12790_v34, %v15738_v4  ;;  %v11360_v6 = vpop.f32.mrb[157].mxu0 }
 0xa6c   : > { %v11405_v30 = vadd.f32 %v15700_v53, %v11389_v37  ;;  %v11361_v21 = vadd.f32 %v15738_v4, %v11360_v6 }
 0xa6d   : > { %11422 = vst.msk [vmem:[%s15747_s6 + $0x58] sm:$0xff] %vm275_vm0, %v11406_v36  ;;  %v11392_v47 = vmax.f32 %v11366_v45, 0.0 }
 0xa6e   : > { %11421 = vst.msk [vmem:[%s15747_s6 + $0x50] sm:$0xff] %vm275_vm0, %v11405_v30  ;;  %v11391_v15 = vmax.f32 %v11361_v21, 0.0  ;;  %v12793_v46 = vpop.f32.mrb[158].mxu0 }
 0xa6f   : > { %v11408_v13 = vadd.f32 %v15720_v63, %v11392_v47  ;;  %v11376_v1 = vadd.f32 %v12793_v46, %v15738_v4  ;;  %v11370_v16 = vpop.f32.mrb[159].mxu0 }
 0xa70   : > { %v11407_v53 = vadd.f32 %v15712_v56, %v11391_v15  ;;  %v11371_v41 = vadd.f32 %v15738_v4, %v11370_v16 }
 0xa71   : > { %11424 = vst.msk [vmem:[%s15747_s6 + $0x68] sm:$0xff] %vm275_vm0, %v11408_v13  ;;  %v11394_v8 = vmax.f32 %v11376_v1, 0.0 }
 0xa72   : > { %11423 = vst.msk [vmem:[%s15747_s6 + $0x60] sm:$0xff] %vm275_vm0, %v11407_v53  ;;  %v11393_v42 = vmax.f32 %v11371_v41, 0.0 }
 0xa73   : > { %v11410_v63 = vadd.f32 %v15731_v43, %v11394_v8 }
 0xa74   : > { %v11409_v56 = vadd.f32 %v15724_v51, %v11393_v42 }
 0xa75   : > { %11426 = vst.msk [vmem:[%s15747_s6 + $0x78] sm:$0xff] %vm275_vm0, %v11410_v63 }
 0xa76   : > { %11425 = vst.msk [vmem:[%s15747_s6 + $0x70] sm:$0xff] %vm275_vm0, %v11409_v56 }
 0xa77   : > { %13271 = shalt.err (!%p13268_p2)
}
 0xa78   : > { %s13272_s25 = scalar_lea.hbm %s15808_s29, 2048  ;;  %s13276_s7 = scalar_lea.hbm %s15863_s4, 4096 }
 0xa79   : > { %p13273_p13 = scmp.ne.s32.totalorder %s15808_s29, %s13272_s25  ;;  %p13277_p4 = scmp.lt.u32.totalorder %s15808_s29, %s15863_s4 }
 0xa7a   : > { %p13278_p7 = scmp.lt.u32.totalorder %s13276_s7, %s13272_s25  ;;  %p13280_p11 = scmp.lt.u32.totalorder %s13272_s25, %s15808_s29 }
 0xa7b   : > { %p13274_p6 = pnand %p13273_p13, %p16142_p0 }
 0xa7c   : > { %p13279_p8 = por %p13278_p7, %p13277_p4 }
 0xa7d   : > { %p13275_p10 = pneg %p13274_p6 }
 0xa7e   : > { %p13281_p1 = por %p13280_p11, %p13279_p8 }
 0xa80   : > { %p13282_p3 = pnand %p13281_p1, %p13275_p10 }
 0xa82   : > { %13285 = shalt.err (!%p13282_p3)
}
 0xa83   : > { %s13343_s6 = smov 128   ;;  %s13344_s9 = smov 8  }
 0xa84   : > { %12832 = dma.vmem_to_hbm [thread:$0]  (%p16142_p0), %s15810_s28, 2048, %s15808_s29, %s11428_s19, %s13343_s6, %s13343_s6, %s13344_s9  }
 0xa85 PF: > { %s11456_s27 = sand.u32 1, %s13316_s15   ;;  %p16143_p5 = scmp.ne.s32.totalorder %s15952_s22, 0 }
 0xa86   : > { %p16144_p9 = scmp.ge.s32.totalorder %s13328_s18, 2  ;;  %s11457_s20 = scalar_lea.sflag [#allocation4], %s11456_s27 }
 0xa88   : > { %p12846_p12 = pnand %p16144_p9, %p16143_p5 }
 0xa8a   : > { %13311 = dma.done.wait (!%p12846_p12), %s11457_s20, 2048  }
 0xa8b   : > { %13313 = vsyncadd (!%p12846_p12), %s11457_s20, 4294965248  ;;  %p18_p2 = scmp.ge.s32.totalorder %s13483_s11, 4   ;;  %s16145_s15 = smov %s13320_s16 }
 0xa8c   : > { %s16146_s16 = smov %s13324_s17  ;;  %s16147_s17 = smov %s13492_s14 }
 0xa8d   : > { %s16148_s18 = smov %s13483_s11  ;;  %20 = sbr.rel (!%p18_p2) target bundleno = 6 (0x6), region = 89 }
 0xa94   :  { %11462 = vsyncpa [#allocation3], 1 }
 0xa95   :  { %11464 = vsyncpa [#allocation3 + $0x1], 1 }
 0xa96   :  { %11465 = vsyncpa [#allocation6], 1 }
 0xa97   :  { %11466 = vsyncpa [#allocation4], 1 }
 0xa98   :  { %11468 = vsyncpa [#allocation4 + $0x1], 1 }

</bundles_post_ra>
